<compile_context>
chip_gen: v7x
topology: tpu7x:2x2x1
jax: 0.10.0
libtpu: 0.0.40
codegen_flags: <defaults>
</compile_context>

<pallas_src>
import functools

import jax
import jax.numpy as jnp
from jax.experimental import pallas as pl
from jax.experimental.pallas import tpu as pltpu


# ----------------------------- Pallas kernels ------------------------------

def _linear_kernel(x_ref, w_ref, b_ref, o_ref, *, relu):
    # y = x @ w + b, optional ReLU; bf16 operands, f32 accumulate.
    x = x_ref[...].astype(jnp.bfloat16)
    w = w_ref[...].astype(jnp.bfloat16)
    y = jnp.dot(x, w, preferred_element_type=jnp.float32) + b_ref[...]
    if relu:
        y = jnp.maximum(y, 0.0)
    o_ref[...] = y.astype(o_ref.dtype)


def _wadd_kernel(spec_ref, x_ref, w_ref, b_ref, o_ref, *, relu):
    # y = spectral_conv_out + (x @ w + b)  [= K(u) + W(u)], optional ReLU.
    x = x_ref[...].astype(jnp.bfloat16)
    w = w_ref[...].astype(jnp.bfloat16)
    y = jnp.dot(x, w, preferred_element_type=jnp.float32)
    y = y + b_ref[...] + spec_ref[...]
    if relu:
        y = jnp.maximum(y, 0.0)
    o_ref[...] = y.astype(o_ref.dtype)


def _mlp_kernel(x_ref, w1_ref, b1_ref, w2_ref, b2_ref, o_ref):
    # Fused fc1(+ReLU)+fc2; hidden never leaves VMEM/vregs; lane-dense output.
    x = x_ref[...].astype(jnp.bfloat16)
    w1 = w1_ref[...].astype(jnp.bfloat16)
    h = jnp.dot(x, w1, preferred_element_type=jnp.float32) + b1_ref[...]
    h = jnp.maximum(h, 0.0)
    w2 = w2_ref[...].astype(jnp.bfloat16)
    y = jnp.dot(h.astype(jnp.bfloat16), w2,
                preferred_element_type=jnp.float32) + b2_ref[...]
    o_ref[...] = y.astype(o_ref.dtype)


def _cmul_kernel(xr_ref, xi_ref, wr_ref, wi_ref, or_ref, oi_ref):
    # Complex channel mix for a whole half of the retained Fourier modes:
    # out[g,b,o] = sum_c x[g,b,c] * w[g,c,o]   (complex), 3-multiply form.
    xr = xr_ref[0]          # (G, B, Cin)
    xi = xi_ref[0]
    wr = wr_ref[0]          # (G, Cin, Cout)
    wi = wi_ref[0]
    t1 = jnp.einsum("gbc,gco->gbo", xr, wr, preferred_element_type=jnp.float32)
    t2 = jnp.einsum("gbc,gco->gbo", xi, wi, preferred_element_type=jnp.float32)
    t3 = jnp.einsum("gbc,gco->gbo", xr + xi, wr + wi,
                    preferred_element_type=jnp.float32)
    or_ref[0] = t1 - t2
    oi_ref[0] = t3 - t1 - t2


# ------------------------------ tiling helpers -------------------------------

def _token_tile(T, max_tile=1024):
    """Largest tile <= max_tile that keeps the grid length >= 2 when possible."""
    if T <= 2 * max_tile:
        tm = (T + 1) // 2            # split in two (v7x: both TensorCores busy)
    else:
        tm = max_tile
    tm = max(8, ((tm + 7) // 8) * 8)  # sublane-align
    return tm


def _pad_rows(x, Tp):
    T = x.shape[0]
    if Tp == T:
        return x
    return jnp.pad(x, ((0, Tp - T), (0, 0)))


# ------------------------------ Pallas wrappers -----------------------------

def pallas_linear(x, w, b, *, relu=False):
    """x: (T, Cin), w: (Cin, Cout) [bf16 ok], b: (1, Cout) -> (T, Cout) f32."""
    T, cin = x.shape
    cout = w.shape[1]
    tm = _token_tile(T)
    Tp = ((T + tm - 1) // tm) * tm
    out = pl.pallas_call(
        functools.partial(_linear_kernel, relu=relu),
        out_shape=jax.ShapeDtypeStruct((Tp, cout), jnp.float32),
        grid=(Tp // tm,),
        in_specs=[
            pl.BlockSpec((tm, cin), lambda i: (i, 0)),
            pl.BlockSpec((cin, cout), lambda i: (0, 0)),
            pl.BlockSpec((1, cout), lambda i: (0, 0)),
        ],
        out_specs=pl.BlockSpec((tm, cout), lambda i: (i, 0)),
        compiler_params=pltpu.CompilerParams(dimension_semantics=("parallel",)),
    )(_pad_rows(x, Tp), w, b)
    return out if Tp == T else out[:T]


def pallas_spec_plus_pointwise(spec, x, w, b, *, relu):
    """relu?(spec + x@w + b).  spec,x: (T,C); w: (C,C); b: (1,C)."""
    T, c = x.shape
    tm = _token_tile(T)
    Tp = ((T + tm - 1) // tm) * tm
    out = pl.pallas_call(
        functools.partial(_wadd_kernel, relu=relu),
        out_shape=jax.ShapeDtypeStruct((Tp, c), jnp.float32),
        grid=(Tp // tm,),
        in_specs=[
            pl.BlockSpec((tm, c), lambda i: (i, 0)),
            pl.BlockSpec((tm, c), lambda i: (i, 0)),
            pl.BlockSpec((c, c), lambda i: (0, 0)),
            pl.BlockSpec((1, c), lambda i: (0, 0)),
        ],
        out_specs=pl.BlockSpec((tm, c), lambda i: (i, 0)),
        compiler_params=pltpu.CompilerParams(dimension_semantics=("parallel",)),
    )(_pad_rows(spec, Tp), _pad_rows(x, Tp), w, b)
    return out if Tp == T else out[:T]


def pallas_mlp(x, w1, b1, w2, b2):
    """Fused fc1+ReLU+fc2.  x: (T,C); w1: (C,Hd); w2: (Hd,Cout_pad) -> (T,Cout_pad)."""
    T, cin = x.shape
    hid = w1.shape[1]
    cout = w2.shape[1]
    tm = _token_tile(T)
    Tp = ((T + tm - 1) // tm) * tm
    out = pl.pallas_call(
        _mlp_kernel,
        out_shape=jax.ShapeDtypeStruct((Tp, cout), jnp.float32),
        grid=(Tp // tm,),
        in_specs=[
            pl.BlockSpec((tm, cin), lambda i: (i, 0)),
            pl.BlockSpec((cin, hid), lambda i: (0, 0)),
            pl.BlockSpec((1, hid), lambda i: (0, 0)),
            pl.BlockSpec((hid, cout), lambda i: (0, 0)),
            pl.BlockSpec((1, cout), lambda i: (0, 0)),
        ],
        out_specs=pl.BlockSpec((tm, cout), lambda i: (i, 0)),
        compiler_params=pltpu.CompilerParams(dimension_semantics=("parallel",)),
    )(_pad_rows(x, Tp), w1, b1, w2, b2)
    return out if Tp == T else out[:T]


def pallas_complex_mode_matmul(xr, xi, wr, wi):
    """xr,xi: (2, G, B, Cin); wr,wi: (2, G, Cin, Cout) -> (out_r, out_i) same leading dims."""
    S, G, B, cin = xr.shape
    cout = wr.shape[-1]
    out_sd = jax.ShapeDtypeStruct((S, G, B, cout), jnp.float32)
    return pl.pallas_call(
        _cmul_kernel,
        out_shape=(out_sd, out_sd),
        grid=(S,),
        in_specs=[
            pl.BlockSpec((1, G, B, cin), lambda s: (s, 0, 0, 0)),
            pl.BlockSpec((1, G, B, cin), lambda s: (s, 0, 0, 0)),
            pl.BlockSpec((1, G, cin, cout), lambda s: (s, 0, 0, 0)),
            pl.BlockSpec((1, G, cin, cout), lambda s: (s, 0, 0, 0)),
        ],
        out_specs=(
            pl.BlockSpec((1, G, B, cout), lambda s: (s, 0, 0, 0)),
            pl.BlockSpec((1, G, B, cout), lambda s: (s, 0, 0, 0)),
        ),
        compiler_params=pltpu.CompilerParams(dimension_semantics=("parallel",)),
    )(xr, xi, wr, wi)


# --------------------------- SpectralConv2d (K op) ---------------------------

def spectral_conv2d_nhwc(x, wr, wi, m1, m2):
    """x: (B, H, W, C) real; wr,wi: (2, m1*m2, Cin, Cout) pre-packed real/imag."""
    B, H, W, C = x.shape
    co = wr.shape[-1]
    G = m1 * m2
    Wf = W // 2 + 1

    x_ft = jnp.fft.rfft2(x, axes=(1, 2))              # (B, H, Wf, C) complex64
    top = x_ft[:, :m1, :m2, :]                        # low positive freqs
    bot = x_ft[:, H - m1:, :m2, :]                    # low negative freqs

    def to_gbc(z):                                    # (B,m1,m2,C) -> (G,B,C)
        return jnp.transpose(z, (1, 2, 0, 3)).reshape(G, B, C)

    xm = jnp.stack([to_gbc(top), to_gbc(bot)], axis=0)          # (2,G,B,C)
    outr, outi = pallas_complex_mode_matmul(
        jnp.real(xm), jnp.imag(xm), wr, wi)                      # (2,G,B,Co)
    out_c = jax.lax.complex(outr, outi)

    def from_gbc(z):                                  # (G,B,Co) -> (B,m1,m2,Co)
        return jnp.transpose(z.reshape(m1, m2, B, co), (2, 0, 1, 3))

    top_out = from_gbc(out_c[0])
    bot_out = from_gbc(out_c[1])
    mid = jnp.zeros((B, H - 2 * m1, m2, co), dtype=out_c.dtype)
    col = jnp.concatenate([top_out, mid, bot_out], axis=1)       # (B, H, m2, Co)
    out_ft = jnp.pad(col, ((0, 0), (0, 0), (0, Wf - m2), (0, 0)))
    return jnp.fft.irfft2(out_ft, s=(H, W), axes=(1, 2))         # (B, H, W, Co)


# ------------------------------ Full FNO block -------------------------------

def fno_block2d_forward(x, q, *, width, m1, m2, num_heads):
    """x: (B, C_in, H, W) NCHW -> (B, num_heads, H, W) NCHW."""
    B, cin, H, W = x.shape
    T = B * H * W

    # to channels-last tokens (single transpose at entry)
    h = jnp.transpose(x, (0, 2, 3, 1)).reshape(T, cin)

    # fc0 lift: Linear(C_in -> width)
    h = pallas_linear(h, q["fc0_w"], q["fc0_b"], relu=False)

    # 4 Fourier layers: u' = ReLU(K(u) + W(u)) (no ReLU on the last one)
    for layer in range(4):
        spec = spectral_conv2d_nhwc(h.reshape(B, H, W, width),
                                    q[f"conv{layer}_wr"], q[f"conv{layer}_wi"],
                                    m1, m2)
        h = pallas_spec_plus_pointwise(spec.reshape(T, width), h,
                                       q[f"w{layer}_w"], q[f"w{layer}_b"],
                                       relu=(layer < 3))

    # fused fc1 + ReLU + fc2 (lane-dense, zero-padded output channels)
    out = pallas_mlp(h, q["fc1_w"], q["fc1_b"], q["fc2_w"], q["fc2_b"])
    out = out[:, :num_heads]
    return jnp.transpose(out.reshape(B, H, W, num_heads), (0, 3, 1, 2))


# ------------------------------- Param prep ----------------------------------

def init_params(key, in_heads, width, m1, m2, num_heads, hidden=128):
    """Raw PyTorch-layout parameters (Linear: (out,in); Conv1d: (out,in,1))."""
    keys = jax.random.split(key, 40)
    ki = iter(range(40))
    p = {}

    def lin(fan_in, fan_out):
        bound = 1.0 / float(fan_in) ** 0.5
        w = jax.random.uniform(keys[next(ki)], (fan_out, fan_in), jnp.float32,
                               -bound, bound)
        b = jax.random.uniform(keys[next(ki)], (fan_out,), jnp.float32,
                               -bound, bound)
        return w, b

    p["fc0_w"], p["fc0_b"] = lin(in_heads, width)

    scale = 1.0 / (width * width)
    for layer in range(4):
        for name in ("w1r", "w1i", "w2r", "w2i"):
            p[f"conv{layer}_{name}"] = scale * jax.random.uniform(
                keys[next(ki)], (width, width, m1, m2), jnp.float32)
        wl, bl = lin(width, width)                    # Conv1d(width,width,1)
        p[f"w{layer}_w"] = wl.reshape(width, width, 1)
        p[f"w{layer}_b"] = bl

    p["fc1_w"], p["fc1_b"] = lin(width, hidden)
    p["fc2_w"], p["fc2_b"] = lin(hidden, num_heads)
    return p


def prepare_params(p, width, m1, m2, num_heads):
    """One-time weight massaging hoisted out of the forward pass."""
    bf = jnp.bfloat16
    q = {}
    q["fc0_w"] = p["fc0_w"].T.astype(bf)                       # (in, width)
    q["fc0_b"] = p["fc0_b"].reshape(1, -1)

    G = m1 * m2

    def w_to_gio(w):                                           # (Ci,Co,m1,m2)->(G,Ci,Co)
        return jnp.transpose(w, (2, 3, 0, 1)).reshape(G, width, width)

    for layer in range(4):
        q[f"w{layer}_w"] = p[f"w{layer}_w"][:, :, 0].T.astype(bf)   # (in, out)
        q[f"w{layer}_b"] = p[f"w{layer}_b"].reshape(1, -1)
        q[f"conv{layer}_wr"] = jnp.stack(
            [w_to_gio(p[f"conv{layer}_w1r"]), w_to_gio(p[f"conv{layer}_w2r"])], 0)
        q[f"conv{layer}_wi"] = jnp.stack(
            [w_to_gio(p[f"conv{layer}_w1i"]), w_to_gio(p[f"conv{layer}_w2i"])], 0)

    q["fc1_w"] = p["fc1_w"].T.astype(bf)                       # (width, 128)
    q["fc1_b"] = p["fc1_b"].reshape(1, -1)

    # pad fc2 output channels to a lane-dense multiple of 128 (sliced in fwd)
    npad = ((num_heads + 127) // 128) * 128
    w2 = jnp.pad(p["fc2_w"].T, ((0, 0), (0, npad - num_heads)))
    q["fc2_w"] = w2.astype(bf)                                  # (128, npad)
    q["fc2_b"] = jnp.pad(p["fc2_b"], (0, npad - num_heads)).reshape(1, -1)
    return q


# ---------------------------------- Main --------------------------------------

if __name__ == "__main__":
    B, H, W = 2, 16, 16
    in_heads = 3            # config['experiment']['inputHeads']
    width = 32
    modes1 = modes2 = 4
    num_heads = 4

    key = jax.random.PRNGKey(0)
    kx, kp = jax.random.split(key)
    x = jax.random.normal(kx, (B, in_heads, H, W), jnp.float32)
    raw = init_params(kp, in_heads, width, modes1, modes2, num_heads)
    params = prepare_params(raw, width, modes1, modes2, num_heads)

    fwd = jax.jit(functools.partial(
        fno_block2d_forward, width=width, m1=modes1, m2=modes2,
        num_heads=num_heads))
    out = jax.block_until_ready(fwd(x, params))
    assert out.shape == (B, num_heads, H, W), out.shape
    assert bool(jnp.all(jnp.isfinite(out)))
    print("KERNEL_OK")
</pallas_src>

<mosaic_0001>
module attributes {stable_mosaic.version = 11 : i64} {
  func.func @_linear_kernel(%arg0: i32, %arg1: memref<256x3xf32, #tpu.memory_space<vmem>>, %arg2: memref<3x32xbf16, #tpu.memory_space<vmem>>, %arg3: memref<1x32xf32, #tpu.memory_space<vmem>>, %arg4: memref<256x32xf32, #tpu.memory_space<vmem>>) attributes {dimension_semantics = [#tpu.dimension_semantics<parallel>], iteration_bounds = array<i64: 2>, scalar_prefetch = 0 : i64, scratch_operands = 0 : i64, tpu.core_type = #tpu.core_type<tc>, window_params = [{transform_indices = @transform_0, window_bounds = array<i64: 256, 3>}, {pipeline_mode = #tpu.pipeline_mode<synchronous>, transform_indices = @transform_1, window_bounds = array<i64: 3, 32>}, {pipeline_mode = #tpu.pipeline_mode<synchronous>, transform_indices = @transform_2, window_bounds = array<i64: 1, 32>}, {transform_indices = @transform_3, window_bounds = array<i64: 256, 32>}]} {
    %c0 = arith.constant 0 : index
    %c0_0 = arith.constant 0 : index
    %0 = vector.load %arg1[%c0, %c0_0] : memref<256x3xf32, #tpu.memory_space<vmem>>, vector<256x3xf32>
    %1 = arith.truncf %0 : vector<256x3xf32> to vector<256x3xbf16>
    %c0_1 = arith.constant 0 : index
    %c0_2 = arith.constant 0 : index
    %2 = vector.load %arg2[%c0_1, %c0_2] : memref<3x32xbf16, #tpu.memory_space<vmem>>, vector<3x32xbf16>
    %cst = arith.constant dense<0.000000e+00> : vector<256x32xf32>
    %3 = tpu.matmul %1, %2, %cst {dimension_numbers = #tpu.dot_dimension_numbers<[1], [0], [0], [1], [0, 0, 1, 1], [], []>} : vector<256x3xbf16>, vector<3x32xbf16>, vector<256x32xf32> -> vector<256x32xf32>
    %c0_3 = arith.constant 0 : index
    %c0_4 = arith.constant 0 : index
    %4 = vector.load %arg3[%c0_3, %c0_4] : memref<1x32xf32, #tpu.memory_space<vmem>>, vector<1x32xf32>
    %5 = vector.broadcast %4 : vector<1x32xf32> to vector<256x32xf32>
    %6 = arith.addf %3, %5 : vector<256x32xf32>
    %c0_5 = arith.constant 0 : index
    %c0_6 = arith.constant 0 : index
    %7 = vector.load %arg4[%c0_5, %c0_6] : memref<256x32xf32, #tpu.memory_space<vmem>>, vector<256x32xf32>
    tpu.vector_store %arg4[%c0_5, %c0_6], %6 {strides = array<i32>} : memref<256x32xf32, #tpu.memory_space<vmem>>, vector<256x32xf32>,
    return
  }
  func.func @transform_0(%arg0: i32) -> (i32, i32) {
    %c0_i32 = arith.constant 0 : i32
    %c0_i32_0 = arith.constant 0 : i32
    return %arg0, %c0_i32 : i32, i32
  }
  func.func @transform_1(%arg0: i32) -> (i32, i32) {
    %c0_i32 = arith.constant 0 : i32
    %c0_i32_0 = arith.constant 0 : i32
    %c0_i32_1 = arith.constant 0 : i32
    return %c0_i32, %c0_i32_0 : i32, i32
  }
  func.func @transform_2(%arg0: i32) -> (i32, i32) {
    %c0_i32 = arith.constant 0 : i32
    %c0_i32_0 = arith.constant 0 : i32
    %c0_i32_1 = arith.constant 0 : i32
    return %c0_i32, %c0_i32_0 : i32, i32
  }
  func.func @transform_3(%arg0: i32) -> (i32, i32) {
    %c0_i32 = arith.constant 0 : i32
    %c0_i32_0 = arith.constant 0 : i32
    return %arg0, %c0_i32 : i32, i32
  }
}

module attributes {stable_mosaic.version = 11 : i64} {
  func.func @_cmul_kernel(%arg0: i32, %arg1: memref<1x16x2x32xf32, #tpu.memory_space<vmem>>, %arg2: memref<1x16x2x32xf32, #tpu.memory_space<vmem>>, %arg3: memref<1x16x32x32xf32, #tpu.memory_space<vmem>>, %arg4: memref<1x16x32x32xf32, #tpu.memory_space<vmem>>, %arg5: memref<1x16x2x32xf32, #tpu.memory_space<vmem>>, %arg6: memref<1x16x2x32xf32, #tpu.memory_space<vmem>>) attributes {dimension_semantics = [#tpu.dimension_semantics<parallel>], iteration_bounds = array<i64: 2>, scalar_prefetch = 0 : i64, scratch_operands = 0 : i64, tpu.core_type = #tpu.core_type<tc>, window_params = [{transform_indices = @transform_0, window_bounds = array<i64: 1, 16, 2, 32>}, {transform_indices = @transform_1, window_bounds = array<i64: 1, 16, 2, 32>}, {transform_indices = @transform_2, window_bounds = array<i64: 1, 16, 32, 32>}, {transform_indices = @transform_3, window_bounds = array<i64: 1, 16, 32, 32>}, {transform_indices = @transform_4, window_bounds = array<i64: 1, 16, 2, 32>}, {transform_indices = @transform_5, window_bounds = array<i64: 1, 16, 2, 32>}]} {
    %c0 = arith.constant 0 : index
    %c0_0 = arith.constant 0 : index
    %c0_1 = arith.constant 0 : index
    %c0_2 = arith.constant 0 : index
    %0 = vector.load %arg1[%c0, %c0_0, %c0_1, %c0_2] : memref<1x16x2x32xf32, #tpu.memory_space<vmem>>, vector<1x16x2x32xf32>
    %1 = vector.shape_cast %0 : vector<1x16x2x32xf32> to vector<16x2x32xf32>
    %c0_3 = arith.constant 0 : index
    %c0_4 = arith.constant 0 : index
    %c0_5 = arith.constant 0 : index
    %c0_6 = arith.constant 0 : index
    %2 = vector.load %arg2[%c0_3, %c0_4, %c0_5, %c0_6] : memref<1x16x2x32xf32, #tpu.memory_space<vmem>>, vector<1x16x2x32xf32>
    %3 = vector.shape_cast %2 : vector<1x16x2x32xf32> to vector<16x2x32xf32>
    %c0_7 = arith.constant 0 : index
    %c0_8 = arith.constant 0 : index
    %c0_9 = arith.constant 0 : index
    %c0_10 = arith.constant 0 : index
    %4 = vector.load %arg3[%c0_7, %c0_8, %c0_9, %c0_10] : memref<1x16x32x32xf32, #tpu.memory_space<vmem>>, vector<1x16x32x32xf32>
    %5 = vector.shape_cast %4 : vector<1x16x32x32xf32> to vector<16x32x32xf32>
    %c0_11 = arith.constant 0 : index
    %c0_12 = arith.constant 0 : index
    %c0_13 = arith.constant 0 : index
    %c0_14 = arith.constant 0 : index
    %6 = vector.load %arg4[%c0_11, %c0_12, %c0_13, %c0_14] : memref<1x16x32x32xf32, #tpu.memory_space<vmem>>, vector<1x16x32x32xf32>
    %7 = vector.shape_cast %6 : vector<1x16x32x32xf32> to vector<16x32x32xf32>
    "tpu.trace_start"() <{level = 10 : i32, message = "gbc,gco->gbo"}> : () -> ()
    %cst = arith.constant dense<0.000000e+00> : vector<16x2x32xf32>
    %8 = tpu.matmul %1, %5, %cst {dimension_numbers = #tpu.dot_dimension_numbers<[2], [1], [1], [2], [0, 0, 0, 1, 1, 2], [0], [0]>} : vector<16x2x32xf32>, vector<16x32x32xf32>, vector<16x2x32xf32> -> vector<16x2x32xf32>
    %cst_15 = arith.constant dense<0.000000e+00> : vector<16x2x32xf32>
    %9 = tpu.matmul %3, %7, %cst_15 {dimension_numbers = #tpu.dot_dimension_numbers<[2], [1], [1], [2], [0, 0, 0, 1, 1, 2], [0], [0]>} : vector<16x2x32xf32>, vector<16x32x32xf32>, vector<16x2x32xf32> -> vector<16x2x32xf32>
    "tpu.trace_stop"() : () -> ()
    %10 = arith.addf %1, %3 : vector<16x2x32xf32>
    %11 = arith.addf %5, %7 : vector<16x32x32xf32>
    "tpu.trace_start"() <{level = 10 : i32, message = "gbc,gco->gbo"}> : () -> ()
    %cst_16 = arith.constant dense<0.000000e+00> : vector<16x2x32xf32>
    %12 = tpu.matmul %10, %11, %cst_16 {dimension_numbers = #tpu.dot_dimension_numbers<[2], [1], [1], [2], [0, 0, 0, 1, 1, 2], [0], [0]>} : vector<16x2x32xf32>, vector<16x32x32xf32>, vector<16x2x32xf32> -> vector<16x2x32xf32>
    "tpu.trace_stop"() : () -> ()
    %13 = arith.subf %8, %9 : vector<16x2x32xf32>
    %c0_17 = arith.constant 0 : index
    %c0_18 = arith.constant 0 : index
    %c0_19 = arith.constant 0 : index
    %c0_20 = arith.constant 0 : index
    %14 = vector.load %arg5[%c0_17, %c0_18, %c0_19, %c0_20] : memref<1x16x2x32xf32, #tpu.memory_space<vmem>>, vector<1x16x2x32xf32>
    %15 = vector.shape_cast %14 : vector<1x16x2x32xf32> to vector<16x2x32xf32>
    %16 = vector.shape_cast %13 : vector<16x2x32xf32> to vector<1x16x2x32xf32>
    tpu.vector_store %arg5[%c0_17, %c0_18, %c0_19, %c0_20], %16 {strides = array<i32>} : memref<1x16x2x32xf32, #tpu.memory_space<vmem>>, vector<1x16x2x32xf32>,
    %17 = arith.subf %12, %8 : vector<16x2x32xf32>
    %18 = arith.subf %17, %9 : vector<16x2x32xf32>
    %c0_21 = arith.constant 0 : index
    %c0_22 = arith.constant 0 : index
    %c0_23 = arith.constant 0 : index
    %c0_24 = arith.constant 0 : index
    %19 = vector.load %arg6[%c0_21, %c0_22, %c0_23, %c0_24] : memref<1x16x2x32xf32, #tpu.memory_space<vmem>>, vector<1x16x2x32xf32>
    %20 = vector.shape_cast %19 : vector<1x16x2x32xf32> to vector<16x2x32xf32>
    %21 = vector.shape_cast %18 : vector<16x2x32xf32> to vector<1x16x2x32xf32>
    tpu.vector_store %arg6[%c0_21, %c0_22, %c0_23, %c0_24], %21 {strides = array<i32>} : memref<1x16x2x32xf32, #tpu.memory_space<vmem>>, vector<1x16x2x32xf32>,
    return
  }
  func.func @transform_0(%arg0: i32) -> (i32, i32, i32, i32) {
    %c0_i32 = arith.constant 0 : i32
    %c0_i32_0 = arith.constant 0 : i32
    %c0_i32_1 = arith.constant 0 : i32
    %c0_i32_2 = arith.constant 0 : i32
    return %arg0, %c0_i32, %c0_i32_0, %c0_i32_1 : i32, i32, i32, i32
  }
  func.func @transform_1(%arg0: i32) -> (i32, i32, i32, i32) {
    %c0_i32 = arith.constant 0 : i32
    %c0_i32_0 = arith.constant 0 : i32
    %c0_i32_1 = arith.constant 0 : i32
    %c0_i32_2 = arith.constant 0 : i32
    return %arg0, %c0_i32, %c0_i32_0, %c0_i32_1 : i32, i32, i32, i32
  }
  func.func @transform_2(%arg0: i32) -> (i32, i32, i32, i32) {
    %c0_i32 = arith.constant 0 : i32
    %c0_i32_0 = arith.constant 0 : i32
    %c0_i32_1 = arith.constant 0 : i32
    %c0_i32_2 = arith.constant 0 : i32
    return %arg0, %c0_i32, %c0_i32_0, %c0_i32_1 : i32, i32, i32, i32
  }
  func.func @transform_3(%arg0: i32) -> (i32, i32, i32, i32) {
    %c0_i32 = arith.constant 0 : i32
    %c0_i32_0 = arith.constant 0 : i32
    %c0_i32_1 = arith.constant 0 : i32
    %c0_i32_2 = arith.constant 0 : i32
    return %arg0, %c0_i32, %c0_i32_0, %c0_i32_1 : i32, i32, i32, i32
  }
  func.func @transform_4(%arg0: i32) -> (i32, i32, i32, i32) {
    %c0_i32 = arith.constant 0 : i32
    %c0_i32_0 = arith.constant 0 : i32
    %c0_i32_1 = arith.constant 0 : i32
    %c0_i32_2 = arith.constant 0 : i32
    return %arg0, %c0_i32, %c0_i32_0, %c0_i32_1 : i32, i32, i32, i32
  }
  func.func @transform_5(%arg0: i32) -> (i32, i32, i32, i32) {
    %c0_i32 = arith.constant 0 : i32
    %c0_i32_0 = arith.constant 0 : i32
    %c0_i32_1 = arith.constant 0 : i32
    %c0_i32_2 = arith.constant 0 : i32
    return %arg0, %c0_i32, %c0_i32_0, %c0_i32_1 : i32, i32, i32, i32
  }
}

module attributes {stable_mosaic.version = 11 : i64} {
  func.func @_wadd_kernel(%arg0: i32, %arg1: memref<256x32xf32, #tpu.memory_space<vmem>>, %arg2: memref<256x32xf32, #tpu.memory_space<vmem>>, %arg3: memref<32x32xbf16, #tpu.memory_space<vmem>>, %arg4: memref<1x32xf32, #tpu.memory_space<vmem>>, %arg5: memref<256x32xf32, #tpu.memory_space<vmem>>) attributes {dimension_semantics = [#tpu.dimension_semantics<parallel>], iteration_bounds = array<i64: 2>, scalar_prefetch = 0 : i64, scratch_operands = 0 : i64, tpu.core_type = #tpu.core_type<tc>, window_params = [{transform_indices = @transform_0, window_bounds = array<i64: 256, 32>}, {transform_indices = @transform_1, window_bounds = array<i64: 256, 32>}, {pipeline_mode = #tpu.pipeline_mode<synchronous>, transform_indices = @transform_2, window_bounds = array<i64: 32, 32>}, {pipeline_mode = #tpu.pipeline_mode<synchronous>, transform_indices = @transform_3, window_bounds = array<i64: 1, 32>}, {transform_indices = @transform_4, window_bounds = array<i64: 256, 32>}]} {
    %c0 = arith.constant 0 : index
    %c0_0 = arith.constant 0 : index
    %0 = vector.load %arg2[%c0, %c0_0] : memref<256x32xf32, #tpu.memory_space<vmem>>, vector<256x32xf32>
    %1 = arith.truncf %0 : vector<256x32xf32> to vector<256x32xbf16>
    %c0_1 = arith.constant 0 : index
    %c0_2 = arith.constant 0 : index
    %2 = vector.load %arg3[%c0_1, %c0_2] : memref<32x32xbf16, #tpu.memory_space<vmem>>, vector<32x32xbf16>
    %cst = arith.constant dense<0.000000e+00> : vector<256x32xf32>
    %3 = tpu.matmul %1, %2, %cst {dimension_numbers = #tpu.dot_dimension_numbers<[1], [0], [0], [1], [0, 0, 1, 1], [], []>} : vector<256x32xbf16>, vector<32x32xbf16>, vector<256x32xf32> -> vector<256x32xf32>
    %c0_3 = arith.constant 0 : index
    %c0_4 = arith.constant 0 : index
    %4 = vector.load %arg4[%c0_3, %c0_4] : memref<1x32xf32, #tpu.memory_space<vmem>>, vector<1x32xf32>
    %5 = vector.broadcast %4 : vector<1x32xf32> to vector<256x32xf32>
    %6 = arith.addf %3, %5 : vector<256x32xf32>
    %c0_5 = arith.constant 0 : index
    %c0_6 = arith.constant 0 : index
    %7 = vector.load %arg1[%c0_5, %c0_6] : memref<256x32xf32, #tpu.memory_space<vmem>>, vector<256x32xf32>
    %8 = arith.addf %6, %7 : vector<256x32xf32>
    %cst_7 = arith.constant 0.000000e+00 : f32
    %9 = vector.broadcast %cst_7 : f32 to vector<256x32xf32>
    %10 = arith.maximumf %8, %9 : vector<256x32xf32>
    %c0_8 = arith.constant 0 : index
    %c0_9 = arith.constant 0 : index
    %11 = vector.load %arg5[%c0_8, %c0_9] : memref<256x32xf32, #tpu.memory_space<vmem>>, vector<256x32xf32>
    tpu.vector_store %arg5[%c0_8, %c0_9], %10 {strides = array<i32>} : memref<256x32xf32, #tpu.memory_space<vmem>>, vector<256x32xf32>,
    return
  }
  func.func @transform_0(%arg0: i32) -> (i32, i32) {
    %c0_i32 = arith.constant 0 : i32
    %c0_i32_0 = arith.constant 0 : i32
    return %arg0, %c0_i32 : i32, i32
  }
  func.func @transform_1(%arg0: i32) -> (i32, i32) {
    %c0_i32 = arith.constant 0 : i32
    %c0_i32_0 = arith.constant 0 : i32
    return %arg0, %c0_i32 : i32, i32
  }
  func.func @transform_2(%arg0: i32) -> (i32, i32) {
    %c0_i32 = arith.constant 0 : i32
    %c0_i32_0 = arith.constant 0 : i32
    %c0_i32_1 = arith.constant 0 : i32
    return %c0_i32, %c0_i32_0 : i32, i32
  }
  func.func @transform_3(%arg0: i32) -> (i32, i32) {
    %c0_i32 = arith.constant 0 : i32
    %c0_i32_0 = arith.constant 0 : i32
    %c0_i32_1 = arith.constant 0 : i32
    return %c0_i32, %c0_i32_0 : i32, i32
  }
  func.func @transform_4(%arg0: i32) -> (i32, i32) {
    %c0_i32 = arith.constant 0 : i32
    %c0_i32_0 = arith.constant 0 : i32
    return %arg0, %c0_i32 : i32, i32
  }
}

module attributes {stable_mosaic.version = 11 : i64} {
  func.func @_wadd_kernel(%arg0: i32, %arg1: memref<256x32xf32, #tpu.memory_space<vmem>>, %arg2: memref<256x32xf32, #tpu.memory_space<vmem>>, %arg3: memref<32x32xbf16, #tpu.memory_space<vmem>>, %arg4: memref<1x32xf32, #tpu.memory_space<vmem>>, %arg5: memref<256x32xf32, #tpu.memory_space<vmem>>) attributes {dimension_semantics = [#tpu.dimension_semantics<parallel>], iteration_bounds = array<i64: 2>, scalar_prefetch = 0 : i64, scratch_operands = 0 : i64, tpu.core_type = #tpu.core_type<tc>, window_params = [{transform_indices = @transform_0, window_bounds = array<i64: 256, 32>}, {transform_indices = @transform_1, window_bounds = array<i64: 256, 32>}, {pipeline_mode = #tpu.pipeline_mode<synchronous>, transform_indices = @transform_2, window_bounds = array<i64: 32, 32>}, {pipeline_mode = #tpu.pipeline_mode<synchronous>, transform_indices = @transform_3, window_bounds = array<i64: 1, 32>}, {transform_indices = @transform_4, window_bounds = array<i64: 256, 32>}]} {
    %c0 = arith.constant 0 : index
    %c0_0 = arith.constant 0 : index
    %0 = vector.load %arg2[%c0, %c0_0] : memref<256x32xf32, #tpu.memory_space<vmem>>, vector<256x32xf32>
    %1 = arith.truncf %0 : vector<256x32xf32> to vector<256x32xbf16>
    %c0_1 = arith.constant 0 : index
    %c0_2 = arith.constant 0 : index
    %2 = vector.load %arg3[%c0_1, %c0_2] : memref<32x32xbf16, #tpu.memory_space<vmem>>, vector<32x32xbf16>
    %cst = arith.constant dense<0.000000e+00> : vector<256x32xf32>
    %3 = tpu.matmul %1, %2, %cst {dimension_numbers = #tpu.dot_dimension_numbers<[1], [0], [0], [1], [0, 0, 1, 1], [], []>} : vector<256x32xbf16>, vector<32x32xbf16>, vector<256x32xf32> -> vector<256x32xf32>
    %c0_3 = arith.constant 0 : index
    %c0_4 = arith.constant 0 : index
    %4 = vector.load %arg4[%c0_3, %c0_4] : memref<1x32xf32, #tpu.memory_space<vmem>>, vector<1x32xf32>
    %5 = vector.broadcast %4 : vector<1x32xf32> to vector<256x32xf32>
    %6 = arith.addf %3, %5 : vector<256x32xf32>
    %c0_5 = arith.constant 0 : index
    %c0_6 = arith.constant 0 : index
    %7 = vector.load %arg1[%c0_5, %c0_6] : memref<256x32xf32, #tpu.memory_space<vmem>>, vector<256x32xf32>
    %8 = arith.addf %6, %7 : vector<256x32xf32>
    %c0_7 = arith.constant 0 : index
    %c0_8 = arith.constant 0 : index
    %9 = vector.load %arg5[%c0_7, %c0_8] : memref<256x32xf32, #tpu.memory_space<vmem>>, vector<256x32xf32>
    tpu.vector_store %arg5[%c0_7, %c0_8], %8 {strides = array<i32>} : memref<256x32xf32, #tpu.memory_space<vmem>>, vector<256x32xf32>,
    return
  }
  func.func @transform_0(%arg0: i32) -> (i32, i32) {
    %c0_i32 = arith.constant 0 : i32
    %c0_i32_0 = arith.constant 0 : i32
    return %arg0, %c0_i32 : i32, i32
  }
  func.func @transform_1(%arg0: i32) -> (i32, i32) {
    %c0_i32 = arith.constant 0 : i32
    %c0_i32_0 = arith.constant 0 : i32
    return %arg0, %c0_i32 : i32, i32
  }
  func.func @transform_2(%arg0: i32) -> (i32, i32) {
    %c0_i32 = arith.constant 0 : i32
    %c0_i32_0 = arith.constant 0 : i32
    %c0_i32_1 = arith.constant 0 : i32
    return %c0_i32, %c0_i32_0 : i32, i32
  }
  func.func @transform_3(%arg0: i32) -> (i32, i32) {
    %c0_i32 = arith.constant 0 : i32
    %c0_i32_0 = arith.constant 0 : i32
    %c0_i32_1 = arith.constant 0 : i32
    return %c0_i32, %c0_i32_0 : i32, i32
  }
  func.func @transform_4(%arg0: i32) -> (i32, i32) {
    %c0_i32 = arith.constant 0 : i32
    %c0_i32_0 = arith.constant 0 : i32
    return %arg0, %c0_i32 : i32, i32
  }
}

module attributes {stable_mosaic.version = 11 : i64} {
  func.func @_mlp_kernel(%arg0: i32, %arg1: memref<256x32xf32, #tpu.memory_space<vmem>>, %arg2: memref<32x128xbf16, #tpu.memory_space<vmem>>, %arg3: memref<1x128xf32, #tpu.memory_space<vmem>>, %arg4: memref<128x128xbf16, #tpu.memory_space<vmem>>, %arg5: memref<1x128xf32, #tpu.memory_space<vmem>>, %arg6: memref<256x128xf32, #tpu.memory_space<vmem>>) attributes {dimension_semantics = [#tpu.dimension_semantics<parallel>], iteration_bounds = array<i64: 2>, scalar_prefetch = 0 : i64, scratch_operands = 0 : i64, tpu.core_type = #tpu.core_type<tc>, window_params = [{transform_indices = @transform_0, window_bounds = array<i64: 256, 32>}, {pipeline_mode = #tpu.pipeline_mode<synchronous>, transform_indices = @transform_1, window_bounds = array<i64: 32, 128>}, {pipeline_mode = #tpu.pipeline_mode<synchronous>, transform_indices = @transform_2, window_bounds = array<i64: 1, 128>}, {pipeline_mode = #tpu.pipeline_mode<synchronous>, transform_indices = @transform_3, window_bounds = array<i64: 128, 128>}, {pipeline_mode = #tpu.pipeline_mode<synchronous>, transform_indices = @transform_4, window_bounds = array<i64: 1, 128>}, {transform_indices = @transform_5, window_bounds = array<i64: 256, 128>}]} {
    %c0 = arith.constant 0 : index
    %c0_0 = arith.constant 0 : index
    %0 = vector.load %arg1[%c0, %c0_0] : memref<256x32xf32, #tpu.memory_space<vmem>>, vector<256x32xf32>
    %1 = arith.truncf %0 : vector<256x32xf32> to vector<256x32xbf16>
    %c0_1 = arith.constant 0 : index
    %c0_2 = arith.constant 0 : index
    %2 = vector.load %arg2[%c0_1, %c0_2] : memref<32x128xbf16, #tpu.memory_space<vmem>>, vector<32x128xbf16>
    %cst = arith.constant dense<0.000000e+00> : vector<256x128xf32>
    %3 = tpu.matmul %1, %2, %cst {dimension_numbers = #tpu.dot_dimension_numbers<[1], [0], [0], [1], [0, 0, 1, 1], [], []>} : vector<256x32xbf16>, vector<32x128xbf16>, vector<256x128xf32> -> vector<256x128xf32>
    %c0_3 = arith.constant 0 : index
    %c0_4 = arith.constant 0 : index
    %4 = vector.load %arg3[%c0_3, %c0_4] : memref<1x128xf32, #tpu.memory_space<vmem>>, vector<1x128xf32>
    %5 = vector.broadcast %4 : vector<1x128xf32> to vector<256x128xf32>
    %6 = arith.addf %3, %5 : vector<256x128xf32>
    %cst_5 = arith.constant 0.000000e+00 : f32
    %7 = vector.broadcast %cst_5 : f32 to vector<256x128xf32>
    %8 = arith.maximumf %6, %7 : vector<256x128xf32>
    %c0_6 = arith.constant 0 : index
    %c0_7 = arith.constant 0 : index
    %9 = vector.load %arg4[%c0_6, %c0_7] : memref<128x128xbf16, #tpu.memory_space<vmem>>, vector<128x128xbf16>
    %10 = arith.truncf %8 : vector<256x128xf32> to vector<256x128xbf16>
    %cst_8 = arith.constant dense<0.000000e+00> : vector<256x128xf32>
    %11 = tpu.matmul %10, %9, %cst_8 {dimension_numbers = #tpu.dot_dimension_numbers<[1], [0], [0], [1], [0, 0, 1, 1], [], []>} : vector<256x128xbf16>, vector<128x128xbf16>, vector<256x128xf32> -> vector<256x128xf32>
    %c0_9 = arith.constant 0 : index
    %c0_10 = arith.constant 0 : index
    %12 = vector.load %arg5[%c0_9, %c0_10] : memref<1x128xf32, #tpu.memory_space<vmem>>, vector<1x128xf32>
    %13 = vector.broadcast %12 : vector<1x128xf32> to vector<256x128xf32>
    %14 = arith.addf %11, %13 : vector<256x128xf32>
    %c0_11 = arith.constant 0 : index
    %c0_12 = arith.constant 0 : index
    %15 = vector.load %arg6[%c0_11, %c0_12] : memref<256x128xf32, #tpu.memory_space<vmem>>, vector<256x128xf32>
    tpu.vector_store %arg6[%c0_11, %c0_12], %14 {strides = array<i32>} : memref<256x128xf32, #tpu.memory_space<vmem>>, vector<256x128xf32>,
    return
  }
  func.func @transform_0(%arg0: i32) -> (i32, i32) {
    %c0_i32 = arith.constant 0 : i32
    %c0_i32_0 = arith.constant 0 : i32
    return %arg0, %c0_i32 : i32, i32
  }
  func.func @transform_1(%arg0: i32) -> (i32, i32) {
    %c0_i32 = arith.constant 0 : i32
    %c0_i32_0 = arith.constant 0 : i32
    %c0_i32_1 = arith.constant 0 : i32
    return %c0_i32, %c0_i32_0 : i32, i32
  }
  func.func @transform_2(%arg0: i32) -> (i32, i32) {
    %c0_i32 = arith.constant 0 : i32
    %c0_i32_0 = arith.constant 0 : i32
    %c0_i32_1 = arith.constant 0 : i32
    return %c0_i32, %c0_i32_0 : i32, i32
  }
  func.func @transform_3(%arg0: i32) -> (i32, i32) {
    %c0_i32 = arith.constant 0 : i32
    %c0_i32_0 = arith.constant 0 : i32
    %c0_i32_1 = arith.constant 0 : i32
    return %c0_i32, %c0_i32_0 : i32, i32
  }
  func.func @transform_4(%arg0: i32) -> (i32, i32) {
    %c0_i32 = arith.constant 0 : i32
    %c0_i32_0 = arith.constant 0 : i32
    %c0_i32_1 = arith.constant 0 : i32
    return %c0_i32, %c0_i32_0 : i32, i32
  }
  func.func @transform_5(%arg0: i32) -> (i32, i32) {
    %c0_i32 = arith.constant 0 : i32
    %c0_i32_0 = arith.constant 0 : i32
    return %arg0, %c0_i32 : i32, i32
  }
}

</mosaic_0001>

<bundles_post_ra>
// kernel: fno_block2d_forward.10
= control target key start
LH: loop header
LB: loop body
LE: loop exit
PB: predicated region body
PF: predicated region fallthrough
CT: control target
= control target key end

     0   :  { %s656_s12 = smov 0   ;;  %s836_s0 = inlined_call_operand.vmem [shape: f32[512,3], index: 0, kind: input, shape index: {}]   ;;  %s837_s1 = inlined_call_operand.vmem [shape: bf16[3,32], index: 1, kind: input, shape index: {}]   ;;  %s838_s2 = inlined_call_operand.vmem [shape: f32[1,32], index: 2, kind: input, shape index: {}]   ;;  %s839_s3 = inlined_call_operand.vmem [shape: f32[512,32], index: 3, kind: output, shape index: {}]  }
   0x1 LB: > { %s537_s13 = sadd.s32 4294967295, %s633_s12   ;;  %p541_p0 = scmp.ge.s32.totalorder %s633_s12, 1  ;;  %s633_s12 = sphi %s656_s12, %s13_s12  }
   0x2   : > { %p138_p1 = scmp.lt.s32.totalorder %s633_s12, 3 }
   0x4   : > { %p139_p2 = pnand %p541_p0, %p138_p1 }
   0x5   : > { %v223_v0 = vld [vmem:[%s837_s1] sm:$0x3] (!%p139_p2)  ;;  %vm280_vm0 = vcmask (!%p139_p2), 1040384   ;;  %vm281_vm1 = vcmask (!%p139_p2), 1041408   ;;  %s542_s16 = sshll.u32 (!%p139_p2), %s537_s13, 5  ;;  %v635_v1 = vmov (!%p139_p2), 65535  }
   0x6   : > { %142 = sbr.rel (%p139_p2) target bundleno = 263 (0x107), region = 32  ;;  %v282_v2 = vsel (!%p139_p2), %vm280_vm0, 4294967295, %v635_v1  ;;  %p163_p3 = scmp.lt.s32.totalorder (!%p139_p2), %s542_s16, 63  ;;  %vm231_vm2 = vcmask (!%p139_p2), 23552   ;;  %v728_v53 = vld [vmem:[%s838_s2] ss:$0 sm:$0xff] (!%p139_p2) }
   0x7   : > { %v283_v3 = vsel (!%p139_p2), %vm281_vm1, %v282_v2, 0  ;;  %vm448_vm3 = vcmask (!%p139_p2), 261120  }
   0x8   : > { %v285_v4 = vand.u32 (!%p139_p2), %v283_v3, %v223_v0 }
   0xa   : > { %582 = vmatprep.subr.bf16.mxu0 (!%p139_p2), %v285_v4  ;;  %616 = vmatprep.subr.bf16.mxu1 (!%p139_p2), %v285_v4 }
   0xb   : > { %583 = vmatpush3.bf16.msra.mxu0 (!%p139_p2), %v285_v4  ;;  %617 = vmatpush3.bf16.msra.mxu1 (!%p139_p2), %v285_v4 }
   0xd   : > { %s841_s16 = smov (!%p163_p3, %s542_s16), 63 }
   0xe   : > { %s543_s17 = sshll.u32 %s841_s16, 3 }
   0xf   : > { %s675_s20 = scalar_lea.vmem %s836_s0, %s543_s17  ;;  %s735_s25 = scalar_lea.vmem %s839_s3, %s543_s17 }
  0x10   : > { %v175_v5 = vld [vmem:[%s675_s20] sm:$0xff]  ;;  %v176_v6 = vld [vmem:[%s675_s20 + $0x8] sm:$0xff]  ;;  %v177_v10 = vld [vmem:[%s675_s20 + $0x10] sm:$0xff] }
  0x11   : > { %v191_v7 = vld [vmem:[%s675_s20 + $0x80] sm:$0xff]  ;;  %v207_v8 = vpack.c.bf16 %v176_v6, %v175_v5  ;;  %v192_v9 = vld [vmem:[%s675_s20 + $0x88] sm:$0xff]  ;;  %v178_v11 = vld [vmem:[%s675_s20 + $0x18] sm:$0xff] }
  0x12   : > { %v215_v12 = vpack.c.bf16 %v192_v9, %v191_v7  ;;  %v208_v13 = vpack.c.bf16 %v178_v11, %v177_v10  ;;  %v193_v14 = vld [vmem:[%s675_s20 + $0x90] sm:$0xff]  ;;  %v194_v15 = vld [vmem:[%s675_s20 + $0x98] sm:$0xff]  ;;  %v179_v16 = vld [vmem:[%s675_s20 + $0x20] sm:$0xff] }
  0x13   : > { %584 = vmatprep.mubr.msk.bf16.mxu0 %vm231_vm2, %v207_v8  ;;  %v216_v17 = vpack.c.bf16 %v194_v15, %v193_v14  ;;  %v180_v18 = vld [vmem:[%s675_s20 + $0x28] sm:$0xff]  ;;  %v195_v19 = vld [vmem:[%s675_s20 + $0xa0] sm:$0xff]  ;;  %v181_v23 = vld [vmem:[%s675_s20 + $0x30] sm:$0xff] }
  0x14   : > { %v196_v20 = vld [vmem:[%s675_s20 + $0xa8] sm:$0xff]  ;;  %600 = vmatprep.mubr.msk.bf16.mxu1 %vm231_vm2, %v215_v12  ;;  %585 = vmatmul.mubr.msk.bf16.vlgmr.msra.gmra.mrb[0].mxu0 %vm231_vm2, %v208_v13  ;;  %v209_v21 = vpack.c.bf16 %v180_v18, %v179_v16  ;;  %v182_v24 = vld [vmem:[%s675_s20 + $0x38] sm:$0xff]  ;;  %v197_v25 = vld [vmem:[%s675_s20 + $0xb0] sm:$0xff] }
  0x15   : > { %v217_v22 = vpack.c.bf16 %v196_v20, %v195_v19  ;;  %601 = vmatmul.mubr.msk.bf16.vlgmr.msra.gmra.mrb[0].mxu1 %vm231_vm2, %v216_v17  ;;  %v198_v26 = vld [vmem:[%s675_s20 + $0xb8] sm:$0xff]  ;;  %v183_v27 = vld [vmem:[%s675_s20 + $0x40] sm:$0xff]  ;;  %v184_v28 = vld [vmem:[%s675_s20 + $0x48] sm:$0xff]  ;;  %v210_v31 = vpack.c.bf16 %v182_v24, %v181_v23 }
  0x16   : > { %588 = vmatprep.mubr.msk.bf16.mxu0 %vm231_vm2, %v209_v21  ;;  %v199_v29 = vld [vmem:[%s675_s20 + $0xc0] sm:$0xff]  ;;  %v200_v30 = vld [vmem:[%s675_s20 + $0xc8] sm:$0xff]  ;;  %v218_v32 = vpack.c.bf16 %v198_v26, %v197_v25  ;;  %v211_v33 = vpack.c.bf16 %v184_v28, %v183_v27  ;;  %v185_v35 = vld [vmem:[%s675_s20 + $0x50] sm:$0xff] }
  0x17   : > { %604 = vmatprep.mubr.msk.bf16.mxu1 %vm231_vm2, %v217_v22  ;;  %v219_v34 = vpack.c.bf16 %v200_v30, %v199_v29  ;;  %v186_v36 = vld [vmem:[%s675_s20 + $0x58] sm:$0xff]  ;;  %v201_v37 = vld [vmem:[%s675_s20 + $0xd0] sm:$0xff]  ;;  %v187_v39 = vld [vmem:[%s675_s20 + $0x60] sm:$0xff] }
  0x18   : > { %v202_v38 = vld [vmem:[%s675_s20 + $0xd8] sm:$0xff]  ;;  %v188_v40 = vld [vmem:[%s675_s20 + $0x68] sm:$0xff]  ;;  %v203_v41 = vld [vmem:[%s675_s20 + $0xe0] sm:$0xff]  ;;  %v212_v43 = vpack.c.bf16 %v186_v36, %v185_v35 }
  0x19   : > { %v204_v42 = vld [vmem:[%s675_s20 + $0xe8] sm:$0xff]  ;;  %v220_v44 = vpack.c.bf16 %v202_v38, %v201_v37  ;;  %v213_v45 = vpack.c.bf16 %v188_v40, %v187_v39  ;;  %v189_v47 = vld [vmem:[%s675_s20 + $0x70] sm:$0xff]  ;;  %v190_v48 = vld [vmem:[%s675_s20 + $0x78] sm:$0xff] }
  0x1a   : > { %v221_v46 = vpack.c.bf16 %v204_v42, %v203_v41  ;;  %v205_v49 = vld [vmem:[%s675_s20 + $0xf0] sm:$0xff]  ;;  %v206_v50 = vld [vmem:[%s675_s20 + $0xf8] sm:$0xff]  ;;  %v214_v51 = vpack.c.bf16 %v190_v48, %v189_v47 }
  0x1b   : > { %v222_v52 = vpack.c.bf16 %v206_v50, %v205_v49 }
  0x1c   : > { %589 = vmatmul.mubr.msk.bf16.gmra.mrb[4].mxu0 %vm231_vm2, %v210_v31 }
  0x1d   : > { %605 = vmatmul.mubr.msk.bf16.gmra.mrb[4].mxu1 %vm231_vm2, %v218_v32  ;;  %592 = vmatprep.mubr.msk.bf16.mxu0 %vm231_vm2, %v211_v33 }
  0x1e   : > { %608 = vmatprep.mubr.msk.bf16.mxu1 %vm231_vm2, %v219_v34 }
  0x24   : > { %593 = vmatmul.mubr.msk.bf16.gmra.mrb[8].mxu0 %vm231_vm2, %v212_v43 }
  0x25   : > { %609 = vmatmul.mubr.msk.bf16.gmra.mrb[8].mxu1 %vm231_vm2, %v220_v44  ;;  %596 = vmatprep.mubr.msk.bf16.mxu0 %vm231_vm2, %v213_v45 }
  0x26   : > { %612 = vmatprep.mubr.msk.bf16.mxu1 %vm231_vm2, %v221_v46 }
  0x2c   : > { %597 = vmatmul.mubr.msk.bf16.gmra.mrb[12].mxu0 %vm231_vm2, %v214_v51 }
  0x2d   : > { %613 = vmatmul.mubr.msk.bf16.gmra.mrb[12].mxu1 %vm231_vm2, %v222_v52 }
  0xe7   : > { %v586_v54 = vpop.f32.mrb[0].mxu0 }
  0xe8   : > { %v330_v55 = vadd.f32 %v586_v54, %v728_v53  ;;  %v602_v56 = vpop.f32.mrb[0].mxu1  ;;  %v321_v57 = vpop.f32.mrb[1].mxu0 }
  0xe9   : > { %v394_v58 = vadd.f32 %v602_v56, %v728_v53  ;;  %v322_v59 = vadd.f32 %v728_v53, %v321_v57  ;;  %v385_v60 = vpop.f32.mrb[1].mxu1  ;;  %v587_v61 = vpop.f32.mrb[2].mxu0 }
  0xea   : > { %451 = vst.msk [vmem:[%s735_s25 + $0x10] sm:$0xff] %vm448_vm3, %v330_v55  ;;  %v386_v62 = vadd.f32 %v728_v53, %v385_v60  ;;  %v333_v63 = vadd.f32 %v587_v61, %v728_v53  ;;  %v603_v0 = vpop.f32.mrb[2].mxu1  ;;  %v324_v1 = vpop.f32.mrb[3].mxu0 }
  0xeb   : > { %467 = vst.msk [vmem:[%s735_s25 + $0x90] sm:$0xff] %vm448_vm3, %v394_v58  ;;  %449 = vst.msk [vmem:[%s735_s25] sm:$0xff] %vm448_vm3, %v322_v59  ;;  %v397_v2 = vadd.f32 %v603_v0, %v728_v53  ;;  %v325_v3 = vadd.f32 %v728_v53, %v324_v1  ;;  %v388_v4 = vpop.f32.mrb[3].mxu1 }
  0xec   : > { %465 = vst.msk [vmem:[%s735_s25 + $0x80] sm:$0xff] %vm448_vm3, %v386_v62  ;;  %452 = vst.msk [vmem:[%s735_s25 + $0x18] sm:$0xff] %vm448_vm3, %v333_v63  ;;  %v389_v5 = vadd.f32 %v728_v53, %v388_v4 }
  0xed   : > { %468 = vst.msk [vmem:[%s735_s25 + $0x98] sm:$0xff] %vm448_vm3, %v397_v2  ;;  %450 = vst.msk [vmem:[%s735_s25 + $0x8] sm:$0xff] %vm448_vm3, %v325_v3 }
  0xee   : > { %466 = vst.msk [vmem:[%s735_s25 + $0x88] sm:$0xff] %vm448_vm3, %v389_v5 }
  0xef   : > { %v590_v6 = vpop.f32.mrb[4].mxu0 }
  0xf0   : > { %v346_v7 = vadd.f32 %v590_v6, %v728_v53  ;;  %v606_v8 = vpop.f32.mrb[4].mxu1  ;;  %v337_v9 = vpop.f32.mrb[5].mxu0 }
  0xf1   : > { %v410_v10 = vadd.f32 %v606_v8, %v728_v53  ;;  %v338_v11 = vadd.f32 %v728_v53, %v337_v9  ;;  %v401_v12 = vpop.f32.mrb[5].mxu1  ;;  %v591_v13 = vpop.f32.mrb[6].mxu0 }
  0xf2   : > { %455 = vst.msk [vmem:[%s735_s25 + $0x30] sm:$0xff] %vm448_vm3, %v346_v7  ;;  %v402_v14 = vadd.f32 %v728_v53, %v401_v12  ;;  %v349_v15 = vadd.f32 %v591_v13, %v728_v53  ;;  %v607_v16 = vpop.f32.mrb[6].mxu1  ;;  %v340_v17 = vpop.f32.mrb[7].mxu0 }
  0xf3   : > { %471 = vst.msk [vmem:[%s735_s25 + $0xb0] sm:$0xff] %vm448_vm3, %v410_v10  ;;  %453 = vst.msk [vmem:[%s735_s25 + $0x20] sm:$0xff] %vm448_vm3, %v338_v11  ;;  %v413_v18 = vadd.f32 %v607_v16, %v728_v53  ;;  %v341_v19 = vadd.f32 %v728_v53, %v340_v17  ;;  %v404_v20 = vpop.f32.mrb[7].mxu1 }
  0xf4   : > { %469 = vst.msk [vmem:[%s735_s25 + $0xa0] sm:$0xff] %vm448_vm3, %v402_v14  ;;  %456 = vst.msk [vmem:[%s735_s25 + $0x38] sm:$0xff] %vm448_vm3, %v349_v15  ;;  %v405_v21 = vadd.f32 %v728_v53, %v404_v20 }
  0xf5   : > { %472 = vst.msk [vmem:[%s735_s25 + $0xb8] sm:$0xff] %vm448_vm3, %v413_v18  ;;  %454 = vst.msk [vmem:[%s735_s25 + $0x28] sm:$0xff] %vm448_vm3, %v341_v19 }
  0xf6   : > { %470 = vst.msk [vmem:[%s735_s25 + $0xa8] sm:$0xff] %vm448_vm3, %v405_v21 }
  0xf7   : > { %v594_v22 = vpop.f32.mrb[8].mxu0 }
  0xf8   : > { %v362_v23 = vadd.f32 %v594_v22, %v728_v53  ;;  %v610_v24 = vpop.f32.mrb[8].mxu1  ;;  %v353_v25 = vpop.f32.mrb[9].mxu0 }
  0xf9   : > { %v426_v26 = vadd.f32 %v610_v24, %v728_v53  ;;  %v354_v27 = vadd.f32 %v728_v53, %v353_v25  ;;  %v417_v28 = vpop.f32.mrb[9].mxu1  ;;  %v595_v29 = vpop.f32.mrb[10].mxu0 }
  0xfa   : > { %459 = vst.msk [vmem:[%s735_s25 + $0x50] sm:$0xff] %vm448_vm3, %v362_v23  ;;  %v418_v30 = vadd.f32 %v728_v53, %v417_v28  ;;  %v365_v31 = vadd.f32 %v595_v29, %v728_v53  ;;  %v611_v32 = vpop.f32.mrb[10].mxu1  ;;  %v356_v33 = vpop.f32.mrb[11].mxu0 }
  0xfb   : > { %475 = vst.msk [vmem:[%s735_s25 + $0xd0] sm:$0xff] %vm448_vm3, %v426_v26  ;;  %457 = vst.msk [vmem:[%s735_s25 + $0x40] sm:$0xff] %vm448_vm3, %v354_v27  ;;  %v429_v34 = vadd.f32 %v611_v32, %v728_v53  ;;  %v357_v35 = vadd.f32 %v728_v53, %v356_v33  ;;  %v420_v36 = vpop.f32.mrb[11].mxu1 }
  0xfc   : > { %473 = vst.msk [vmem:[%s735_s25 + $0xc0] sm:$0xff] %vm448_vm3, %v418_v30  ;;  %460 = vst.msk [vmem:[%s735_s25 + $0x58] sm:$0xff] %vm448_vm3, %v365_v31  ;;  %v421_v37 = vadd.f32 %v728_v53, %v420_v36 }
  0xfd   : > { %476 = vst.msk [vmem:[%s735_s25 + $0xd8] sm:$0xff] %vm448_vm3, %v429_v34  ;;  %458 = vst.msk [vmem:[%s735_s25 + $0x48] sm:$0xff] %vm448_vm3, %v357_v35 }
  0xfe   : > { %474 = vst.msk [vmem:[%s735_s25 + $0xc8] sm:$0xff] %vm448_vm3, %v421_v37 }
  0xff   : > { %v598_v38 = vpop.f32.mrb[12].mxu0 }
 0x100   : > { %v378_v39 = vadd.f32 %v598_v38, %v728_v53  ;;  %v614_v40 = vpop.f32.mrb[12].mxu1  ;;  %v369_v41 = vpop.f32.mrb[13].mxu0 }
 0x101   : > { %v442_v42 = vadd.f32 %v614_v40, %v728_v53  ;;  %v370_v43 = vadd.f32 %v728_v53, %v369_v41  ;;  %v433_v44 = vpop.f32.mrb[13].mxu1  ;;  %v599_v45 = vpop.f32.mrb[14].mxu0 }
 0x102   : > { %463 = vst.msk [vmem:[%s735_s25 + $0x70] sm:$0xff] %vm448_vm3, %v378_v39  ;;  %v434_v46 = vadd.f32 %v728_v53, %v433_v44  ;;  %v381_v47 = vadd.f32 %v599_v45, %v728_v53  ;;  %v615_v48 = vpop.f32.mrb[14].mxu1  ;;  %v372_v49 = vpop.f32.mrb[15].mxu0 }
 0x103   : > { %479 = vst.msk [vmem:[%s735_s25 + $0xf0] sm:$0xff] %vm448_vm3, %v442_v42  ;;  %461 = vst.msk [vmem:[%s735_s25 + $0x60] sm:$0xff] %vm448_vm3, %v370_v43  ;;  %v445_v50 = vadd.f32 %v615_v48, %v728_v53  ;;  %v373_v51 = vadd.f32 %v728_v53, %v372_v49  ;;  %v436_v52 = vpop.f32.mrb[15].mxu1 }
 0x104   : > { %477 = vst.msk [vmem:[%s735_s25 + $0xe0] sm:$0xff] %vm448_vm3, %v434_v46  ;;  %464 = vst.msk [vmem:[%s735_s25 + $0x78] sm:$0xff] %vm448_vm3, %v381_v47  ;;  %v437_v54 = vadd.f32 %v728_v53, %v436_v52 }
 0x105   : > { %480 = vst.msk [vmem:[%s735_s25 + $0xf8] sm:$0xff] %vm448_vm3, %v445_v50  ;;  %462 = vst.msk [vmem:[%s735_s25 + $0x68] sm:$0xff] %vm448_vm3, %v373_v51 }
 0x106   : > { %478 = vst.msk [vmem:[%s735_s25 + $0xe8] sm:$0xff] %vm448_vm3, %v437_v54 }
 0x107 PF: > { %s13_s12 = sadd.s32 1, %s633_s12  }
 0x108   : > { %p10_p4 = scmp.ge.s32.totalorder %s13_s12, 4  }
 0x10a   :  { %12 = sbr.rel (!%p10_p4) target bundleno = 1 (0x1), region = 62 }

// kernel: reverse.8
= control target key start
LH: loop header
LB: loop body
LE: loop exit
PB: predicated region body
PF: predicated region fallthrough
CT: control target
= control target key end

     0   :  { %s344_s0 = inlined_call_operand.vmem [shape: f32[2,32,16,7], index: 0, kind: input, shape index: {}]   ;;  %s345_s1 = inlined_call_operand.vmem [shape: f32[2,32,16,7], index: 1, kind: output, shape index: {}]  }
   0x1   :  { %v112_v0 = vld [vmem:[%s344_s0 + $0x60] sm:$0xff]  ;;  %v113_v1 = vld [vmem:[%s344_s0 + $0xd0] sm:$0xff]  ;;  %v138_v14 = vld [vmem:[%s344_s0 + $0x68] sm:$0xff] }
   0x2   :  { %v115_v2 = vld [vmem:[%s344_s0 + $0x50] sm:$0xff]  ;;  %4 = vst [vmem:[%s345_s1] sm:$0xff] %v112_v0  ;;  %114 = vst [vmem:[%s345_s1 + $0x70] sm:$0xff] %v113_v1  ;;  %v117_v3 = vld [vmem:[%s344_s0 + $0xc0] sm:$0xff] }
   0x3   :  { %116 = vst [vmem:[%s345_s1 + $0x10] sm:$0xff] %v115_v2  ;;  %v119_v4 = vld [vmem:[%s344_s0 + $0x40] sm:$0xff]  ;;  %v121_v5 = vld [vmem:[%s344_s0 + $0xb0] sm:$0xff]  ;;  %118 = vst [vmem:[%s345_s1 + $0x80] sm:$0xff] %v117_v3 }
   0x4   :  { %120 = vst [vmem:[%s345_s1 + $0x20] sm:$0xff] %v119_v4  ;;  %122 = vst [vmem:[%s345_s1 + $0x90] sm:$0xff] %v121_v5  ;;  %v123_v6 = vld [vmem:[%s344_s0 + $0x30] sm:$0xff]  ;;  %v125_v7 = vld [vmem:[%s344_s0 + $0xa0] sm:$0xff] }
   0x5   :  { %v127_v8 = vld [vmem:[%s344_s0 + $0x20] sm:$0xff]  ;;  %124 = vst [vmem:[%s345_s1 + $0x30] sm:$0xff] %v123_v6  ;;  %126 = vst [vmem:[%s345_s1 + $0xa0] sm:$0xff] %v125_v7  ;;  %v129_v9 = vld [vmem:[%s344_s0 + $0x90] sm:$0xff] }
   0x6   :  { %128 = vst [vmem:[%s345_s1 + $0x40] sm:$0xff] %v127_v8  ;;  %v131_v10 = vld [vmem:[%s344_s0 + $0x10] sm:$0xff]  ;;  %v133_v11 = vld [vmem:[%s344_s0 + $0x80] sm:$0xff]  ;;  %130 = vst [vmem:[%s345_s1 + $0xb0] sm:$0xff] %v129_v9 }
   0x7   :  { %132 = vst [vmem:[%s345_s1 + $0x50] sm:$0xff] %v131_v10  ;;  %134 = vst [vmem:[%s345_s1 + $0xc0] sm:$0xff] %v133_v11  ;;  %v49_v12 = vld [vmem:[%s344_s0] sm:$0xff]  ;;  %v136_v13 = vld [vmem:[%s344_s0 + $0x70] sm:$0xff] }
   0x8   :  { %135 = vst [vmem:[%s345_s1 + $0x60] sm:$0xff] %v49_v12  ;;  %137 = vst [vmem:[%s345_s1 + $0xd0] sm:$0xff] %v136_v13  ;;  %v140_v15 = vld [vmem:[%s344_s0 + $0xd8] sm:$0xff]  ;;  %v144_v17 = vld [vmem:[%s344_s0 + $0xc8] sm:$0xff] }
   0x9   :  { %139 = vst [vmem:[%s345_s1 + $0x8] sm:$0xff] %v138_v14  ;;  %v142_v16 = vld [vmem:[%s344_s0 + $0x58] sm:$0xff]  ;;  %141 = vst [vmem:[%s345_s1 + $0x78] sm:$0xff] %v140_v15  ;;  %v146_v18 = vld [vmem:[%s344_s0 + $0x48] sm:$0xff] }
   0xa   :  { %143 = vst [vmem:[%s345_s1 + $0x18] sm:$0xff] %v142_v16  ;;  %145 = vst [vmem:[%s345_s1 + $0x88] sm:$0xff] %v144_v17  ;;  %v148_v19 = vld [vmem:[%s344_s0 + $0xb8] sm:$0xff]  ;;  %v152_v21 = vld [vmem:[%s344_s0 + $0xa8] sm:$0xff] }
   0xb   :  { %v150_v20 = vld [vmem:[%s344_s0 + $0x38] sm:$0xff]  ;;  %147 = vst [vmem:[%s345_s1 + $0x28] sm:$0xff] %v146_v18  ;;  %149 = vst [vmem:[%s345_s1 + $0x98] sm:$0xff] %v148_v19  ;;  %v154_v22 = vld [vmem:[%s344_s0 + $0x28] sm:$0xff] }
   0xc   :  { %151 = vst [vmem:[%s345_s1 + $0x38] sm:$0xff] %v150_v20  ;;  %v156_v23 = vld [vmem:[%s344_s0 + $0x98] sm:$0xff]  ;;  %153 = vst [vmem:[%s345_s1 + $0xa8] sm:$0xff] %v152_v21  ;;  %v160_v25 = vld [vmem:[%s344_s0 + $0x88] sm:$0xff] }
   0xd   :  { %155 = vst [vmem:[%s345_s1 + $0x48] sm:$0xff] %v154_v22  ;;  %157 = vst [vmem:[%s345_s1 + $0xb8] sm:$0xff] %v156_v23  ;;  %v158_v24 = vld [vmem:[%s344_s0 + $0x18] sm:$0xff]  ;;  %v162_v26 = vld [vmem:[%s344_s0 + $0x8] sm:$0xff] }
   0xe   :  { %159 = vst [vmem:[%s345_s1 + $0x58] sm:$0xff] %v158_v24  ;;  %161 = vst [vmem:[%s345_s1 + $0xc8] sm:$0xff] %v160_v25  ;;  %v164_v27 = vld [vmem:[%s344_s0 + $0x78] sm:$0xff] }
   0xf   :  { %163 = vst [vmem:[%s345_s1 + $0x68] sm:$0xff] %v162_v26  ;;  %165 = vst [vmem:[%s345_s1 + $0xd8] sm:$0xff] %v164_v27 }

// kernel: fno_block2d_forward.11
= control target key start
LH: loop header
LB: loop body
LE: loop exit
PB: predicated region body
PF: predicated region fallthrough
CT: control target
= control target key end

     0   :  { %s5429_s18 = smov 0   ;;  %s6976_s0 = inlined_call_operand.vmem [shape: f32[2,16,2,32], index: 0, kind: input, shape index: {}]   ;;  %s6977_s1 = inlined_call_operand.vmem [shape: f32[2,16,2,32], index: 1, kind: input, shape index: {}]   ;;  %s6978_s2 = inlined_call_operand.vmem [shape: f32[2,16,32,32], index: 2, kind: input, shape index: {}]   ;;  %s6979_s3 = inlined_call_operand.vmem [shape: f32[2,16,32,32], index: 3, kind: input, shape index: {}]   ;;  %s6980_s4 = inlined_call_operand.vmem [shape: f32[2,16,2,32], index: 4, kind: output, shape index: {0}]   ;;  %s6981_s5 = inlined_call_operand.vmem [shape: f32[2,16,2,32], index: 5, kind: output, shape index: {1}]  }
   0x1 LB: > { %s4248_s19 = sadd.s32 4294967295, %s5394_s18   ;;  %p4252_p0 = scmp.ge.s32.totalorder %s5394_s18, 1  ;;  %s5394_s18 = sphi %s5429_s18, %s16_s18  }
   0x2   : > { %p220_p1 = scmp.lt.s32.totalorder %s5394_s18, 3 }
   0x4   : > { %p221_p2 = pnand %p4252_p0, %p220_p1 }
   0x6   : > { %224 = sbr.rel (%p221_p2) target bundleno = 433 (0x1b1), region = 36 }
   0xd   : > { %p268_p3 = scmp.lt.s32.totalorder %s4248_s19, 1  ;;  %v6988_v0 = vmov 0.0|0.0   ;;  %vm5397_vm0 = vmmov 0   ;;  %v6982_v1 = vmov 0.0   ;;  %vm458_vm1 = vcmask 261120  }
   0xe   : > { %5089 = vmatprep.subr.bf16.mxu0 %v6988_v0  ;;  %5095 = vmatprep.subr.bf16.mxu1 %v6988_v0  ;;  %vm4059_vm2 = vcmask 254976  }
   0xf   : > { %s7283_s19 = smov (!%p268_p3, %s4248_s19), 1  ;;  %4569 = vmatprep.mubr.msk.f32.mxu0 %vm5397_vm0, %v6982_v1  ;;  %4580 = vmatprep.mubr.msk.f32.mxu1 %vm5397_vm0, %v6982_v1 }
  0x10   : > { %s4317_s20 = sshll.u32 %s7283_s19, 9  ;;  %s5458_s27 = sshll.u32 %s7283_s19, 5 }
  0x11   : > { %s5446_s23 = scalar_lea.vmem %s6978_s2, %s4317_s20  ;;  %s5451_s26 = scalar_lea.vmem %s6979_s3, %s4317_s20 }
  0x12   : > { %v330_v2 = vld [vmem:[%s5446_s23] sm:$0xff]  ;;  %v331_v3 = vld [vmem:[%s5446_s23 + $0x8] sm:$0xff]  ;;  %v332_v14 = vld [vmem:[%s5446_s23 + $0x10] sm:$0xff]  ;;  %s5495_s30 = scalar_lea.vmem %s6976_s0, %s5458_s27  ;;  %s6354_s8 = scalar_lea.vmem %s6977_s1, %s5458_s27 }
  0x13   : > { %v5456_v4 = vld [vmem:[%s5451_s26] sm:$0xff]  ;;  %v5461_v5 = vld [vmem:[%s5451_s26 + $0x8] sm:$0xff]  ;;  %v5090_v6 = vpack.c.bf16 %v331_v3, %v330_v2  ;;  %v333_v17 = vld [vmem:[%s5446_s23 + $0x18] sm:$0xff]  ;;  %s6805_s11 = scalar_lea.vmem %s6980_s4, %s5458_s27  ;;  %s6908_s14 = scalar_lea.vmem %s6981_s5, %s5458_s27 }
  0x14   : > { %v5464_v7 = vadd.f32 %v5456_v4, %v330_v2  ;;  %v334_v8 = vld [vmem:[%s5446_s23 + $0x20] sm:$0xff]  ;;  %v335_v9 = vld [vmem:[%s5446_s23 + $0x28] sm:$0xff]  ;;  %v5469_v10 = vadd.f32 %v5461_v5, %v331_v3  ;;  %v5486_v18 = vld [vmem:[%s5451_s26 + $0x10] sm:$0xff]  ;;  %v5093_v21 = vpack.c.bf16 %v333_v17, %v332_v14 }
  0x15   : > { %v5472_v11 = vld [vmem:[%s5451_s26 + $0x20] sm:$0xff]  ;;  %v5475_v12 = vld [vmem:[%s5451_s26 + $0x28] sm:$0xff]  ;;  %v5096_v13 = vpack.c.bf16 %v335_v9, %v334_v8  ;;  %5091 = vmatpush3.bf16.msra.mxu0 %v5090_v6  ;;  %v5489_v19 = vld [vmem:[%s5451_s26 + $0x18] sm:$0xff]  ;;  %v5501_v22 = vadd.f32 %v5486_v18, %v332_v14 }
  0x16   : > { %7073 = vst [vmem:[#allocation2_spill] sm:$0xff] %v5464_v7  ;;  %7074 = vst [vmem:[#allocation3_spill] sm:$0xff] %v5469_v10  ;;  %v5479_v15 = vadd.f32 %v5472_v11, %v334_v8  ;;  %v5482_v16 = vadd.f32 %v5475_v12, %v335_v9  ;;  %5092 = vmatprep.subr.bf16.mxu0 %v6988_v0  ;;  %v336_v23 = vld [vmem:[%s5446_s23 + $0x30] sm:$0xff]  ;;  %v337_v24 = vld [vmem:[%s5446_s23 + $0x38] sm:$0xff]  ;;  %v5512_v27 = vadd.f32 %v5489_v19, %v333_v17 }
  0x17   : > { %5097 = vmatpush3.bf16.msra.mxu1 %v5096_v13  ;;  %7077 = vst [vmem:[#allocation6_spill] sm:$0xff] %v5501_v22  ;;  %v5506_v25 = vld [vmem:[%s5451_s26 + $0x30] sm:$0xff]  ;;  %v5515_v28 = vld [vmem:[%s5451_s26 + $0x38] sm:$0xff]  ;;  %v5099_v29 = vpack.c.bf16 %v337_v24, %v336_v23  ;;  %v5524_v32 = vld [vmem:[%s5495_s30] sm:$0x3] }
  0x18   : > { %7075 = vst [vmem:[#allocation4_spill] sm:$0xff] %v5479_v15  ;;  %7076 = vst [vmem:[#allocation5_spill] sm:$0xff] %v5482_v16  ;;  %5098 = vmatprep.subr.bf16.mxu1 %v6988_v0  ;;  %v5518_v30 = vadd.f32 %v5506_v25, %v336_v23  ;;  %v5521_v31 = vadd.f32 %v5515_v28, %v337_v24  ;;  %v5527_v33 = vld [vmem:[%s5446_s23 + $0x40] sm:$0xff]  ;;  %v5530_v34 = vld [vmem:[%s5446_s23 + $0x48] sm:$0xff] }
  0x19   : > { %7078 = vst [vmem:[#allocation7_spill] sm:$0xff] %v5512_v27  ;;  %7081 = vst [vmem:[#allocation10_spill] sm:$0xff] %v5524_v32  ;;  %5094 = vmatpush3.bf16.msra.mxu0 %v5093_v21  ;;  %v5533_v35 = vld [vmem:[%s5446_s23 + $0x60] sm:$0xff]  ;;  %v5536_v36 = vld [vmem:[%s5446_s23 + $0x68] sm:$0xff]  ;;  %v5102_v39 = vpack.c.bf16 %v5530_v34, %v5527_v33 }
  0x1a   : > { %7079 = vst [vmem:[#allocation8_spill] sm:$0xff] %v5518_v30  ;;  %7080 = vst [vmem:[#allocation9_spill] sm:$0xff] %v5521_v31  ;;  %v5541_v38 = vld [vmem:[%s5495_s30 + $0x2] sm:$0x3]  ;;  %5101 = vmatprep.subr.bf16.mxu0 %v6988_v0  ;;  %v5108_v40 = vpack.c.bf16 %v5536_v36, %v5533_v35  ;;  %v5549_v41 = vld [vmem:[%s5446_s23 + $0x50] sm:$0xff] }
  0x1b   : > { %5100 = vmatpush3.bf16.msra.mxu1 %v5099_v29  ;;  %7082 = vst [vmem:[#allocation11_spill] sm:$0xff] %v5541_v38  ;;  %v5552_v42 = vld [vmem:[%s5446_s23 + $0x58] sm:$0xff]  ;;  %v5558_v44 = vld [vmem:[%s5446_s23 + $0x70] sm:$0xff]  ;;  %v5573_v48 = vld [vmem:[%s5446_s23 + $0x80] sm:$0xff] }
  0x1c   : > { %5107 = vmatprep.subr.bf16.mxu1 %v6988_v0  ;;  %v5561_v45 = vld [vmem:[%s5446_s23 + $0x78] sm:$0xff]  ;;  %4570 = vmatmul.mubr.msk.f32.vlgmr.msra.gmra.mrb[0].mxu0 %vm458_vm1, %v5524_v32  ;;  %v5105_v46 = vpack.c.bf16 %v5552_v42, %v5549_v41  ;;  %v5576_v49 = vld [vmem:[%s5446_s23 + $0x88] sm:$0xff]  ;;  %v5582_v50 = vld [vmem:[%s5446_s23 + $0xa0] sm:$0xff] }
  0x1d   : > { %5103 = vmatpush3.bf16.msra.mxu0 %v5102_v39  ;;  %v5111_v47 = vpack.c.bf16 %v5561_v45, %v5558_v44  ;;  %4591 = vmatprep.mubr.msk.f32.mxu0 %vm5397_vm0, %v6982_v1  ;;  %v5585_v51 = vld [vmem:[%s5446_s23 + $0xa8] sm:$0xff]  ;;  %v5590_v52 = vld [vmem:[%s5495_s30 + $0x4] sm:$0x3]  ;;  %v5114_v53 = vpack.c.bf16 %v5576_v49, %v5573_v48  ;;  %v5595_v54 = vld [vmem:[%s5495_s30 + $0x6] sm:$0x3] }
  0x1e   : > { %4581 = vmatmul.mubr.msk.f32.vlgmr.msra.gmra.mrb[0].mxu1 %vm458_vm1, %v5541_v38  ;;  %5104 = vmatprep.subr.bf16.mxu0 %v6988_v0  ;;  %7083 = vst [vmem:[#allocation12_spill] sm:$0xff] %v5590_v52  ;;  %7084 = vst [vmem:[#allocation13_spill] sm:$0xff] %v5595_v54  ;;  %v5120_v55 = vpack.c.bf16 %v5585_v51, %v5582_v50  ;;  %v5601_v56 = vld [vmem:[%s5446_s23 + $0x90] sm:$0xff]  ;;  %v5604_v57 = vld [vmem:[%s5446_s23 + $0x98] sm:$0xff] }
  0x1f   : > { %5109 = vmatpush3.bf16.msra.mxu1 %v5108_v40  ;;  %4602 = vmatprep.mubr.msk.f32.mxu1 %vm5397_vm0, %v6982_v1  ;;  %v5608_v58 = vld [vmem:[%s5446_s23 + $0xb0] sm:$0xff]  ;;  %v5611_v59 = vld [vmem:[%s5446_s23 + $0xb8] sm:$0xff]  ;;  %v5117_v60 = vpack.c.bf16 %v5604_v57, %v5601_v56  ;;  %v5623_v62 = vld [vmem:[%s5446_s23 + $0xc0] sm:$0xff] }
  0x20   : > { %5110 = vmatprep.subr.bf16.mxu1 %v6988_v0  ;;  %v5123_v61 = vpack.c.bf16 %v5611_v59, %v5608_v58  ;;  %v5626_v63 = vld [vmem:[%s5446_s23 + $0xc8] sm:$0xff]  ;;  %v5632_v2 = vld [vmem:[%s5446_s23 + $0xe0] sm:$0xff]  ;;  %v5651_v14 = vld [vmem:[%s5446_s23 + $0xd0] sm:$0xff] }
  0x21   : > { %5106 = vmatpush3.bf16.msra.mxu0 %v5105_v46  ;;  %v5635_v3 = vld [vmem:[%s5446_s23 + $0xe8] sm:$0xff]  ;;  %v5126_v8 = vpack.c.bf16 %v5626_v63, %v5623_v62  ;;  %v5654_v17 = vld [vmem:[%s5446_s23 + $0xd8] sm:$0xff]  ;;  %v5658_v21 = vld [vmem:[%s5446_s23 + $0xf0] sm:$0xff] }
  0x22   : > { %5113 = vmatprep.subr.bf16.mxu0 %v6988_v0  ;;  %v5640_v6 = vld [vmem:[%s5495_s30 + $0x8] sm:$0x3]  ;;  %v5645_v9 = vld [vmem:[%s5495_s30 + $0xa] sm:$0x3]  ;;  %v5132_v13 = vpack.c.bf16 %v5635_v3, %v5632_v2  ;;  %v5661_v23 = vld [vmem:[%s5446_s23 + $0xf8] sm:$0xff]  ;;  %v5129_v24 = vpack.c.bf16 %v5654_v17, %v5651_v14 }
  0x23   : > { %5112 = vmatpush3.bf16.msra.mxu1 %v5111_v47  ;;  %7085 = vst [vmem:[#allocation14_spill] sm:$0xff] %v5640_v6  ;;  %7086 = vst [vmem:[#allocation15_spill] sm:$0xff] %v5645_v9  ;;  %v5135_v29 = vpack.c.bf16 %v5661_v23, %v5658_v21  ;;  %v5673_v39 = vld [vmem:[%s5446_s23 + $0x100] sm:$0xff]  ;;  %v5676_v40 = vld [vmem:[%s5446_s23 + $0x108] sm:$0xff] }
  0x24   : > { %5119 = vmatprep.subr.bf16.mxu1 %v6988_v0  ;;  %4592 = vmatmul.mubr.msk.f32.vlgmr.msra.gmra.mrb[2].mxu0 %vm458_vm1, %v5590_v52  ;;  %v5682_v46 = vld [vmem:[%s5446_s23 + $0x120] sm:$0xff]  ;;  %v5685_v47 = vld [vmem:[%s5446_s23 + $0x128] sm:$0xff]  ;;  %v5827_v31 = vld [vmem:[%s5495_s30 + $0x10] sm:$0x3] }
  0x25   : > { %5115 = vmatpush3.bf16.msra.mxu0 %v5114_v53  ;;  %4613 = vmatprep.mubr.msk.f32.mxu0 %vm5397_vm0, %v6982_v1  ;;  %v5690_v53 = vld [vmem:[%s5451_s26 + $0x40] sm:$0xff]  ;;  %v5707_v43 = vld [vmem:[%s5451_s26 + $0x68] sm:$0xff]  ;;  %v5144_v20 = vpack.c.bf16 %v5685_v47, %v5682_v46  ;;  %7108 = vst [vmem:[#allocation35_spill] sm:$0xff] %v5827_v31  ;;  %v5835_v38 = vld [vmem:[%s5446_s23 + $0x150] sm:$0xff] }
  0x26   : > { %4603 = vmatmul.mubr.msk.f32.vlgmr.msra.gmra.mrb[2].mxu1 %vm458_vm1, %v5595_v54  ;;  %5116 = vmatprep.subr.bf16.mxu0 %v6988_v0  ;;  %v5711_v37 = vadd.f32 %v5690_v53, %v5527_v33  ;;  %v5728_v33 = vld [vmem:[%s5446_s23 + $0x118] sm:$0xff]  ;;  %v5810_v22 = vld [vmem:[%s5451_s26 + $0xa0] sm:$0xff]  ;;  %v5856_v16 = vld [vmem:[%s5446_s23 + $0x170] sm:$0xff] }
  0x27   : > { %5121 = vmatpush3.bf16.msra.mxu1 %v5120_v55  ;;  %4624 = vmatprep.mubr.msk.f32.mxu1 %vm5397_vm0, %v6982_v1  ;;  %v5693_v55 = vld [vmem:[%s5451_s26 + $0x48] sm:$0xff]  ;;  %7103 = vst [vmem:[#allocation30_spill] sm:$0xff] %v5810_v22  ;;  %v5853_v15 = vld [vmem:[%s5446_s23 + $0x158] sm:$0xff]  ;;  %v5894_v10 = vld [vmem:[%s5446_s23 + $0x180] sm:$0xff] }
  0x28   : > { %5122 = vmatprep.subr.bf16.mxu1 %v6988_v0  ;;  %7089 = vst [vmem:[#allocation18_spill] sm:$0xff] %v5711_v37  ;;  %v5715_v26 = vadd.f32 %v5693_v55, %v5530_v34  ;;  %v5735_v34 = vadd.f32 %v5707_v43, %v5536_v36  ;;  %v5756_v36 = vld [vmem:[%s5451_s26 + $0x70] sm:$0xff]  ;;  %v5800_v37 = vld [vmem:[%s5451_s26 + $0x80] sm:$0xff]  ;;  %v5897_v7 = vld [vmem:[%s5446_s23 + $0x188] sm:$0xff] }
  0x29   : > { %5118 = vmatpush3.bf16.msra.mxu0 %v5117_v60  ;;  %v5696_v60 = vld [vmem:[%s5451_s26 + $0x60] sm:$0xff]  ;;  %7094 = vst [vmem:[#allocation23_spill] sm:$0xff] %v5756_v36  ;;  %7101 = vst [vmem:[#allocation28_spill] sm:$0xff] %v5800_v37 }
  0x2a   : > { %5125 = vmatprep.subr.bf16.mxu0 %v6988_v0  ;;  %7090 = vst [vmem:[#allocation19_spill] sm:$0xff] %v5715_v26  ;;  %7092 = vst [vmem:[#allocation21_spill] sm:$0xff] %v5735_v34  ;;  %v5797_v34 = vld [vmem:[%s5446_s23 + $0x168] sm:$0xff] }
  0x2b   : > { %5124 = vmatpush3.bf16.msra.mxu1 %v5123_v61  ;;  %v5699_v61 = vld [vmem:[%s5495_s30 + $0xc] sm:$0x3] }
  0x2c   : > { %5131 = vmatprep.subr.bf16.mxu1 %v6988_v0  ;;  %4614 = vmatmul.mubr.msk.f32.vlgmr.msra.gmra.mrb[4].mxu0 %vm458_vm1, %v5640_v6  ;;  %7087 = vst [vmem:[#allocation16_spill] sm:$0xff] %v5699_v61  ;;  %v5745_v6 = vld [vmem:[%s5451_s26 + $0x58] sm:$0xff]  ;;  %v5803_v26 = vld [vmem:[%s5451_s26 + $0x88] sm:$0xff] }
  0x2d   : > { %5127 = vmatpush3.bf16.msra.mxu0 %v5126_v8  ;;  %4635 = vmatprep.mubr.msk.f32.mxu0 %vm5397_vm0, %v6982_v1  ;;  %v5702_v8 = vld [vmem:[%s5495_s30 + $0xe] sm:$0x3]  ;;  %v5765_v54 = vadd.f32 %v5745_v6, %v5552_v42  ;;  %v7099_v42 = vmov 0.0|0.0   ;;  %7102 = vst [vmem:[#allocation29_spill] sm:$0xff] %v5803_v26  ;;  %v5824_v27 = vadd.f32 %v5803_v26, %v5576_v49 }
  0x2e   : > { %4625 = vmatmul.mubr.msk.f32.vlgmr.msra.gmra.mrb[4].mxu1 %vm458_vm1, %v5645_v9  ;;  %5128 = vmatprep.subr.bf16.mxu0 %v6988_v0  ;;  %7088 = vst [vmem:[#allocation17_spill] sm:$0xff] %v5702_v8  ;;  %v5731_v9 = vld [vmem:[%s5451_s26 + $0x50] sm:$0xff]  ;;  %v6020_v26 = vld [vmem:[%s5446_s23 + $0x1e8] sm:$0xff] }
  0x2f   : > { %5133 = vmatpush3.bf16.msra.mxu1 %v5132_v13  ;;  %4646 = vmatprep.mubr.msk.f32.mxu1 %vm5397_vm0, %v6982_v1  ;;  %v5138_v13 = vpack.c.bf16 %v5676_v40, %v5673_v39  ;;  %v5725_v1 = vld [vmem:[%s5446_s23 + $0x110] sm:$0xff]  ;;  %v5751_v52 = vadd.f32 %v5731_v9, %v5549_v41  ;;  %7096 = vst [vmem:[#allocation25_spill] sm:$0xff] %v5765_v54  ;;  %7107 = vst [vmem:[#allocation34_spill] sm:$0xff] %v5824_v27 }
  0x30   : > { %5134 = vmatprep.subr.bf16.mxu1 %v6988_v0  ;;  %v5141_v41 = vpack.c.bf16 %v5728_v33, %v5725_v1  ;;  %v5820_v54 = vadd.f32 %v5800_v37, %v5573_v48  ;;  %v5839_v48 = vadd.f32 %v5810_v22, %v5582_v50  ;;  %v5859_v50 = vld [vmem:[%s5451_s26 + $0x98] sm:$0xff]  ;;  %v5950_v27 = vld [vmem:[%s5451_s26 + $0xd0] sm:$0xff] }
  0x31   : > { %5130 = vmatpush3.bf16.msra.mxu0 %v5129_v24  ;;  %v5719_v24 = vadd.f32 %v5696_v60, %v5533_v35  ;;  %v5739_v35 = vld [vmem:[%s5446_s23 + $0x130] sm:$0xff]  ;;  %7093 = vst [vmem:[#allocation22_spill] sm:$0xff] %v5751_v52  ;;  %7113 = vst [vmem:[#allocation40_spill] sm:$0xff] %v5859_v50 }
  0x32   : > { %5137 = vmatprep.subr.bf16.mxu0 %v6988_v0  ;;  %v5816_v52 = vld [vmem:[%s5451_s26 + $0x90] sm:$0xff]  ;;  %7106 = vst [vmem:[#allocation33_spill] sm:$0xff] %v5820_v54  ;;  %7110 = vst [vmem:[#allocation37_spill] sm:$0xff] %v5839_v48  ;;  %v5947_v54 = vld [vmem:[%s5446_s23 + $0x198] sm:$0xff] }
  0x33   : > { %7091 = vst [vmem:[#allocation20_spill] sm:$0xff] %v5719_v24  ;;  %5136 = vmatpush3.bf16.msra.mxu1 %v5135_v29  ;;  %v5742_v29 = vld [vmem:[%s5446_s23 + $0x138] sm:$0xff]  ;;  %v5786_v24 = vld [vmem:[%s5446_s23 + $0x148] sm:$0xff]  ;;  %7105 = vst [vmem:[#allocation32_spill] sm:$0xff] %v5816_v52 }
  0x34   : > { %5143 = vmatprep.subr.bf16.mxu1 %v6988_v0  ;;  %4636 = vmatmul.mubr.msk.f32.vlgmr.msra.gmra.mrb[6].mxu0 %vm458_vm1, %v5699_v61  ;;  %v5759_v0 = vld [vmem:[%s5451_s26 + $0x78] sm:$0xff]  ;;  %v5773_v61 = vadd.f32 %v5756_v36, %v5558_v44  ;;  %v5789_v44 = vld [vmem:[%s5446_s23 + $0x160] sm:$0xff]  ;;  %7127 = vst [vmem:[#allocation54_spill] sm:$0xff] %v5950_v27 }
  0x35   : > { %7095 = vst [vmem:[#allocation24_spill] sm:$0xff] %v5759_v0  ;;  %5139 = vmatpush3.bf16.msra.mxu0 %v5138_v13  ;;  %v5777_v30 = vadd.f32 %v5759_v0, %v5561_v45  ;;  %v5147_v13 = vpack.c.bf16 %v5742_v29, %v5739_v35  ;;  %v5813_v45 = vld [vmem:[%s5451_s26 + $0xa8] sm:$0xff]  ;;  %v5156_v32 = vpack.c.bf16 %v5797_v34, %v5789_v44  ;;  %v6111_v36 = vld [vmem:[%s5451_s26 + $0x160] sm:$0xff] }
  0x36   : > { %4647 = vmatmul.mubr.msk.f32.vlgmr.msra.gmra.mrb[6].mxu1 %vm458_vm1, %v5702_v8  ;;  %7097 = vst [vmem:[#allocation26_spill] sm:$0xff] %v5773_v61  ;;  %5140 = vmatprep.subr.bf16.mxu0 %v7099_v42  ;;  %v5783_v8 = vld [vmem:[%s5446_s23 + $0x140] sm:$0xff]  ;;  %7104 = vst [vmem:[#allocation31_spill] sm:$0xff] %v5813_v45  ;;  %v5830_v61 = vld [vmem:[%s5495_s30 + $0x12] sm:$0x3]  ;;  %v5843_v49 = vadd.f32 %v5813_v45, %v5585_v51 }
  0x37   : > { %7098 = vst [vmem:[#allocation27_spill] sm:$0xff] %v5777_v30  ;;  %5145 = vmatpush3.bf16.msra.mxu1 %v5144_v20  ;;  %v7100_v20 = vmov 0.0   ;;  %7109 = vst [vmem:[#allocation36_spill] sm:$0xff] %v5830_v61  ;;  %v5150_v30 = vpack.c.bf16 %v5786_v24, %v5783_v8  ;;  %v5863_v51 = vld [vmem:[%s5446_s23 + $0x178] sm:$0xff]  ;;  %v6108_v0 = vld [vmem:[%s5451_s26 + $0x148] sm:$0xff] }
  0x38   : > { %5146 = vmatprep.subr.bf16.mxu1 %v7099_v42  ;;  %4657 = vmatprep.mubr.msk.f32.mxu0 %vm5397_vm0, %v7100_v20  ;;  %7111 = vst [vmem:[#allocation38_spill] sm:$0xff] %v5843_v49 }
  0x39   : > { %4668 = vmatprep.mubr.msk.f32.mxu1 %vm5397_vm0, %v7100_v20  ;;  %5142 = vmatpush3.bf16.msra.mxu0 %v5141_v41  ;;  %v5847_v41 = vadd.f32 %v5816_v52, %v5601_v56  ;;  %v5866_v56 = vld [vmem:[%s5451_s26 + $0xb0] sm:$0xff]  ;;  %v5877_v52 = vadd.f32 %v5859_v50, %v5604_v57  ;;  %v5153_v57 = vpack.c.bf16 %v5853_v15, %v5835_v38  ;;  %v5987_v50 = vld [vmem:[%s5451_s26 + $0xf8] sm:$0xff] }
  0x3a   : > { %5149 = vmatprep.subr.bf16.mxu0 %v7099_v42  ;;  %7114 = vst [vmem:[#allocation41_spill] sm:$0xff] %v5866_v56  ;;  %v5883_v45 = vadd.f32 %v5866_v56, %v5608_v58  ;;  %v5922_v58 = vld [vmem:[%s5446_s23 + $0x1a8] sm:$0xff]  ;;  %v5969_v56 = vld [vmem:[%s5446_s23 + $0x1c0] sm:$0xff]  ;;  %7133 = vst [vmem:[#allocation60_spill] sm:$0xff] %v5987_v50 }
  0x3b   : > { %7112 = vst [vmem:[#allocation39_spill] sm:$0xff] %v5847_v41  ;;  %5148 = vmatpush3.bf16.msra.mxu1 %v5147_v13  ;;  %v5869_v13 = vld [vmem:[%s5451_s26 + $0xb8] sm:$0xff]  ;;  %7116 = vst [vmem:[#allocation43_spill] sm:$0xff] %v5877_v52  ;;  %v5925_v41 = vld [vmem:[%s5451_s26 + $0xe0] sm:$0xff] }
  0x3c   : > { %5155 = vmatprep.subr.bf16.mxu1 %v7099_v42  ;;  %7115 = vst [vmem:[#allocation42_spill] sm:$0xff] %v5869_v13  ;;  %4658 = vmatmul.mubr.msk.f32.vlgmr.msra.gmra.mrb[8].mxu0 %vm458_vm1, %v5827_v31  ;;  %7117 = vst [vmem:[#allocation44_spill] sm:$0xff] %v5883_v45  ;;  %v5887_v22 = vadd.f32 %v5869_v13, %v5611_v59  ;;  %v5905_v59 = vld [vmem:[%s5446_s23 + $0x1a0] sm:$0xff]  ;;  %v5911_v31 = vld [vmem:[%s5451_s26 + $0xc8] sm:$0xff] }
  0x3d   : > { %5151 = vmatpush3.bf16.msra.mxu0 %v5150_v30  ;;  %v5159_v30 = vpack.c.bf16 %v5863_v51, %v5856_v16  ;;  %7120 = vst [vmem:[#allocation47_spill] sm:$0xff] %v5911_v31  ;;  %4679 = vmatprep.mubr.msk.f32.mxu0 %vm5397_vm0, %v7100_v20  ;;  %7122 = vst [vmem:[#allocation49_spill] sm:$0xff] %v5925_v41  ;;  %v5928_v52 = vld [vmem:[%s5451_s26 + $0xe8] sm:$0xff]  ;;  %v5936_v48 = vadd.f32 %v5911_v31, %v5626_v63  ;;  %v5941_v45 = vld [vmem:[%s5495_s30 + $0x16] sm:$0x3] }
  0x3e   : > { %7118 = vst [vmem:[#allocation45_spill] sm:$0xff] %v5887_v22  ;;  %4669 = vmatmul.mubr.msk.f32.vlgmr.msra.gmra.mrb[8].mxu1 %vm458_vm1, %v5830_v61  ;;  %5152 = vmatprep.subr.bf16.mxu0 %v7099_v42  ;;  %v5908_v61 = vld [vmem:[%s5451_s26 + $0xc0] sm:$0xff]  ;;  %7123 = vst [vmem:[#allocation50_spill] sm:$0xff] %v5928_v52  ;;  %v5944_v22 = vld [vmem:[%s5446_s23 + $0x190] sm:$0xff]  ;;  %v5958_v63 = vadd.f32 %v5928_v52, %v5635_v3  ;;  %v5162_v31 = vpack.c.bf16 %v5897_v7, %v5894_v10 }
  0x3f   : > { %5157 = vmatpush3.bf16.msra.mxu1 %v5156_v32  ;;  %7119 = vst [vmem:[#allocation46_spill] sm:$0xff] %v5908_v61  ;;  %v5919_v32 = vld [vmem:[%s5495_s30 + $0x14] sm:$0x3]  ;;  %v5932_v49 = vadd.f32 %v5908_v61, %v5623_v62  ;;  %7125 = vst [vmem:[#allocation52_spill] sm:$0xff] %v5936_v48  ;;  %4690 = vmatprep.mubr.msk.f32.mxu1 %vm5397_vm0, %v7100_v20  ;;  %v5954_v62 = vadd.f32 %v5925_v41, %v5632_v2  ;;  %v5966_v13 = vld [vmem:[%s5446_s23 + $0x1b8] sm:$0xff] }
  0x40   : > { %5158 = vmatprep.subr.bf16.mxu1 %v7099_v42  ;;  %7121 = vst [vmem:[#allocation48_spill] sm:$0xff] %v5919_v32  ;;  %7126 = vst [vmem:[#allocation53_spill] sm:$0xff] %v5941_v45  ;;  %v5963_v61 = vld [vmem:[%s5446_s23 + $0x1b0] sm:$0xff]  ;;  %v5975_v3 = vadd.f32 %v5950_v27, %v5651_v14  ;;  %v5981_v52 = vld [vmem:[%s5451_s26 + $0xd8] sm:$0xff]  ;;  %v6011_v2 = vadd.f32 %v5987_v50, %v5661_v23 }
  0x41   : > { %7124 = vst [vmem:[#allocation51_spill] sm:$0xff] %v5932_v49  ;;  %7128 = vst [vmem:[#allocation55_spill] sm:$0xff] %v5954_v62  ;;  %5154 = vmatpush3.bf16.msra.mxu0 %v5153_v57  ;;  %v5168_v57 = vpack.c.bf16 %v5922_v58, %v5905_v59  ;;  %v5984_v41 = vld [vmem:[%s5451_s26 + $0xf0] sm:$0xff]  ;;  %v5993_v14 = vld [vmem:[%s5446_s23 + $0x1c8] sm:$0xff]  ;;  %v6003_v48 = vadd.f32 %v5981_v52, %v5654_v17 }
  0x42   : > { %7129 = vst [vmem:[#allocation56_spill] sm:$0xff] %v5958_v63  ;;  %7130 = vst [vmem:[#allocation57_spill] sm:$0xff] %v5975_v3  ;;  %5161 = vmatprep.subr.bf16.mxu0 %v7099_v42  ;;  %v5999_v49 = vld [vmem:[%s5451_s26 + $0x100] sm:$0xff]  ;;  %v6007_v27 = vadd.f32 %v5984_v41, %v5658_v21  ;;  %v6023_v17 = vld [vmem:[%s5446_s23 + $0x1d0] sm:$0xff]  ;;  %v5165_v63 = vpack.c.bf16 %v5947_v54, %v5944_v22 }
  0x43   : > { %5160 = vmatpush3.bf16.msra.mxu1 %v5159_v30  ;;  %7131 = vst [vmem:[#allocation58_spill] sm:$0xff] %v5981_v52  ;;  %7132 = vst [vmem:[#allocation59_spill] sm:$0xff] %v5984_v41  ;;  %v5996_v30 = vld [vmem:[%s5446_s23 + $0x1e0] sm:$0xff]  ;;  %v6026_v21 = vld [vmem:[%s5446_s23 + $0x1d8] sm:$0xff]  ;;  %v6030_v23 = vadd.f32 %v5999_v49, %v5673_v39 }
  0x44   : > { %5167 = vmatprep.subr.bf16.mxu1 %v7099_v42  ;;  %7134 = vst [vmem:[#allocation61_spill] sm:$0xff] %v5999_v49  ;;  %7135 = vst [vmem:[#allocation62_spill] sm:$0xff] %v6003_v48  ;;  %4680 = vmatmul.mubr.msk.f32.vlgmr.msra.gmra.mrb[10].mxu0 %vm458_vm1, %v5919_v32  ;;  %v6037_v62 = vld [vmem:[%s5446_s23 + $0x1f0] sm:$0xff]  ;;  %v6040_v32 = vld [vmem:[%s5446_s23 + $0x1f8] sm:$0xff] }
  0x45   : > { %7136 = vst [vmem:[#allocation63_spill] sm:$0xff] %v6007_v27  ;;  %7137 = vst [vmem:[#allocation64_spill] sm:$0xff] %v6011_v2  ;;  %5163 = vmatpush3.bf16.msra.mxu0 %v5162_v31  ;;  %v6043_v50 = vld [vmem:[%s5451_s26 + $0x108] sm:$0xff]  ;;  %v5171_v31 = vpack.c.bf16 %v5966_v13, %v5963_v61  ;;  %v6055_v41 = vld [vmem:[%s5451_s26 + $0x120] sm:$0xff]  ;;  %4701 = vmatprep.mubr.msk.f32.mxu0 %vm5397_vm0, %v7100_v20 }
  0x46   : > { %7138 = vst [vmem:[#allocation65_spill] sm:$0xff] %v6030_v23  ;;  %4691 = vmatmul.mubr.msk.f32.vlgmr.msra.gmra.mrb[10].mxu1 %vm458_vm1, %v5941_v45  ;;  %7139 = vst [vmem:[#allocation66_spill] sm:$0xff] %v6043_v50  ;;  %5164 = vmatprep.subr.bf16.mxu0 %v7099_v42  ;;  %v5174_v45 = vpack.c.bf16 %v5993_v14, %v5969_v56  ;;  %v6059_v39 = vadd.f32 %v6043_v50, %v5676_v40  ;;  %v6069_v27 = vld [vmem:[%s5451_s26 + $0x128] sm:$0xff]  ;;  %v6072_v2 = vld [vmem:[%s5451_s26 + $0x110] sm:$0xff] }
  0x47   : > { %5169 = vmatpush3.bf16.msra.mxu1 %v5168_v57  ;;  %7140 = vst [vmem:[#allocation67_spill] sm:$0xff] %v6055_v41  ;;  %v5180_v57 = vpack.c.bf16 %v6020_v26, %v5996_v30  ;;  %v6075_v40 = vld [vmem:[%s5451_s26 + $0x118] sm:$0xff]  ;;  %v6079_v3 = vadd.f32 %v6055_v41, %v5682_v46  ;;  %4712 = vmatprep.mubr.msk.f32.mxu1 %vm5397_vm0, %v7100_v20  ;;  %v6086_v50 = vld [vmem:[%s5451_s26 + $0x130] sm:$0xff]  ;;  %v6092_v52 = vld [vmem:[%s5451_s26 + $0x140] sm:$0xff] }
  0x48   : > { %7141 = vst [vmem:[#allocation68_spill] sm:$0xff] %v6059_v39  ;;  %5170 = vmatprep.subr.bf16.mxu1 %v7099_v42  ;;  %v6089_v49 = vld [vmem:[%s5451_s26 + $0x138] sm:$0xff]  ;;  %7144 = vst [vmem:[#allocation71_spill] sm:$0xff] %v6092_v52  ;;  %v6098_v46 = vadd.f32 %v6069_v27, %v5685_v47  ;;  %v6102_v41 = vadd.f32 %v6072_v2, %v5725_v1  ;;  %v6115_v37 = vadd.f32 %v6075_v40, %v5728_v33  ;;  %v6134_v33 = vld [vmem:[%s5451_s26 + $0x168] sm:$0xff] }
  0x49   : > { %7142 = vst [vmem:[#allocation69_spill] sm:$0xff] %v6079_v3  ;;  %7143 = vst [vmem:[#allocation70_spill] sm:$0xff] %v6089_v49  ;;  %5166 = vmatpush3.bf16.msra.mxu0 %v5165_v63  ;;  %v6105_v48 = vld [vmem:[%s5495_s30 + $0x18] sm:$0x3]  ;;  %v6119_v47 = vadd.f32 %v6086_v50, %v5739_v35  ;;  %v6123_v1 = vadd.f32 %v6089_v49, %v5742_v29  ;;  %v6127_v63 = vadd.f32 %v6092_v52, %v5783_v8  ;;  %v6130_v23 = vld [vmem:[%s5495_s30 + $0x1a] sm:$0x3] }
  0x4a   : > { %7145 = vst [vmem:[#allocation72_spill] sm:$0xff] %v6098_v46  ;;  %7146 = vst [vmem:[#allocation73_spill] sm:$0xff] %v6105_v48  ;;  %5173 = vmatprep.subr.bf16.mxu0 %v7099_v42  ;;  %v6137_v39 = vld [vmem:[%s5451_s26 + $0x150] sm:$0xff]  ;;  %v6143_v29 = vadd.f32 %v6108_v0, %v5786_v24  ;;  %v6147_v8 = vadd.f32 %v6111_v36, %v5789_v44  ;;  %v6157_v49 = vld [vmem:[%s5451_s26 + $0x178] sm:$0xff]  ;;  %v6165_v3 = vadd.f32 %v6134_v33, %v5797_v34 }
  0x4b   : > { %7147 = vst [vmem:[#allocation74_spill] sm:$0xff] %v6119_v47  ;;  %7148 = vst [vmem:[#allocation75_spill] sm:$0xff] %v6123_v1  ;;  %5172 = vmatpush3.bf16.msra.mxu1 %v5171_v31  ;;  %v6151_v31 = vld [vmem:[%s5451_s26 + $0x158] sm:$0xff]  ;;  %v6154_v52 = vld [vmem:[%s5451_s26 + $0x170] sm:$0xff]  ;;  %v6169_v44 = vadd.f32 %v6137_v39, %v5835_v38  ;;  %v7164_v1 = vpack.c.bf16 %v5461_v5, %v5456_v4  ;;  %v5195_v4 = vpack.c.bf16 %v5515_v28, %v5506_v25 }
  0x4c   : > { %7149 = vst [vmem:[#allocation76_spill] sm:$0xff] %v6127_v63  ;;  %7150 = vst [vmem:[#allocation77_spill] sm:$0xff] %v6130_v23  ;;  %5179 = vmatprep.subr.bf16.mxu1 %v7099_v42  ;;  %4702 = vmatmul.mubr.msk.f32.vlgmr.msra.gmra.mrb[12].mxu0 %vm458_vm1, %v6105_v48  ;;  %v6174_v46 = vld [vmem:[%s5451_s26 + $0x180] sm:$0xff]  ;;  %v6177_v35 = vld [vmem:[%s5451_s26 + $0x188] sm:$0xff]  ;;  %v6183_v34 = vadd.f32 %v6151_v31, %v5853_v15  ;;  %v6187_v38 = vadd.f32 %v6154_v52, %v5856_v16 }
  0x4d   : > { %7151 = vst [vmem:[#allocation78_spill] sm:$0xff] %v6143_v29  ;;  %7152 = vst [vmem:[#allocation79_spill] sm:$0xff] %v6147_v8  ;;  %v6191_v48 = vadd.f32 %v6157_v49, %v5863_v51  ;;  %5175 = vmatpush3.bf16.msra.mxu0 %v5174_v45  ;;  %v6196_v47 = vld [vmem:[%s5451_s26 + $0x1a0] sm:$0xff]  ;;  %v6202_v16 = vadd.f32 %v6174_v46, %v5894_v10  ;;  %v6206_v51 = vadd.f32 %v6177_v35, %v5897_v7  ;;  %v6210_v45 = vld [vmem:[%s5451_s26 + $0x1a8] sm:$0xff] }
  0x4e   : > { %7153 = vst [vmem:[#allocation80_spill] sm:$0xff] %v6165_v3  ;;  %7154 = vst [vmem:[#allocation81_spill] sm:$0xff] %v6169_v44  ;;  %4713 = vmatmul.mubr.msk.f32.vlgmr.msra.gmra.mrb[12].mxu1 %vm458_vm1, %v6130_v23  ;;  %5176 = vmatprep.subr.bf16.mxu0 %v7099_v42  ;;  %v6213_v24 = vld [vmem:[%s5451_s26 + $0x190] sm:$0xff]  ;;  %v6216_v23 = vld [vmem:[%s5451_s26 + $0x198] sm:$0xff]  ;;  %v6224_v7 = vadd.f32 %v6196_v47, %v5905_v59  ;;  %v6242_v59 = vadd.f32 %v6210_v45, %v5922_v58 }
  0x4f   : > { %7155 = vst [vmem:[#allocation82_spill] sm:$0xff] %v6183_v34  ;;  %7156 = vst [vmem:[#allocation83_spill] sm:$0xff] %v6187_v38  ;;  %5181 = vmatpush3.bf16.msra.mxu1 %v5180_v57  ;;  %4723 = vmatprep.mubr.msk.f32.mxu0 %vm5397_vm0, %v7100_v20  ;;  %v6230_v57 = vld [vmem:[%s5451_s26 + $0x1b0] sm:$0xff]  ;;  %v6233_v8 = vld [vmem:[%s5451_s26 + $0x1b8] sm:$0xff]  ;;  %v6246_v10 = vadd.f32 %v6213_v24, %v5944_v22  ;;  %v6261_v58 = vadd.f32 %v6216_v23, %v5947_v54 }
  0x50   : > { %7157 = vst [vmem:[#allocation84_spill] sm:$0xff] %v6191_v48  ;;  %7158 = vst [vmem:[#allocation85_spill] sm:$0xff] %v6202_v16  ;;  %5182 = vmatprep.subr.bf16.mxu1 %v7099_v42  ;;  %v6236_v3 = vld [vmem:[%s5451_s26 + $0x1c0] sm:$0xff]  ;;  %4734 = vmatprep.mubr.msk.f32.mxu1 %vm5397_vm0, %v7100_v20  ;;  %v6251_v38 = vld [vmem:[%s5451_s26 + $0x1c8] sm:$0xff]  ;;  %v6265_v22 = vadd.f32 %v6230_v57, %v5963_v61  ;;  %v6269_v15 = vadd.f32 %v6233_v8, %v5966_v13 }
  0x51   : > { %7159 = vst [vmem:[#allocation86_spill] sm:$0xff] %v6206_v51  ;;  %7160 = vst [vmem:[#allocation87_spill] sm:$0xff] %v6224_v7  ;;  %v6254_v48 = vld [vmem:[%s5451_s26 + $0x1e0] sm:$0xff]  ;;  %v6257_v44 = vld [vmem:[%s5451_s26 + $0x1e8] sm:$0xff]  ;;  %v6273_v16 = vadd.f32 %v6236_v3, %v5969_v56  ;;  %v7162_v51 = vpack.c.bf16 %v6026_v21, %v6023_v17  ;;  %v6288_v13 = vadd.f32 %v6251_v38, %v5993_v14 }
  0x52   : > { %7161 = vst [vmem:[#allocation88_spill] sm:$0xff] %v6242_v59  ;;  %v6279_v34 = vld [vmem:[%s5495_s30 + $0x1c] sm:$0x3]  ;;  %v6282_v54 = vld [vmem:[%s5451_s26 + $0x1d0] sm:$0xff]  ;;  %v6292_v56 = vadd.f32 %v6254_v48, %v5996_v30  ;;  %v6296_v63 = vadd.f32 %v6257_v44, %v6020_v26  ;;  %v6302_v29 = vld [vmem:[%s5495_s30 + $0x1e] sm:$0x3]  ;;  %v5201_v25 = vpack.c.bf16 %v5745_v6, %v5731_v9 }
  0x53   : > { %5178 = vmatpush3.bf16.msra.mxu0 %v7162_v51  ;;  %v7163_v51 = vpack.c.bf16 %v6040_v32, %v6037_v62  ;;  %v6306_v61 = vld [vmem:[%s5451_s26 + $0x1d8] sm:$0xff]  ;;  %v6309_v14 = vld [vmem:[%s5451_s26 + $0x1f0] sm:$0xff]  ;;  %v6317_v7 = vadd.f32 %v6282_v54, %v6023_v17  ;;  %v5366_v59 = vpack.c.bf16 %v6288_v13, %v6273_v16  ;;  %v7166_v28 = vld [vmem:[#allocation23_spill] sm:$0xff] }
  0x54   : > { %5185 = vmatprep.subr.bf16.mxu0 %v7099_v42  ;;  %v6329_v30 = vadd.f32 %v6306_v61, %v6026_v21  ;;  %v6333_v26 = vadd.f32 %v6309_v14, %v6037_v62  ;;  %v5189_v21 = vpack.c.bf16 %v5489_v19, %v5486_v18  ;;  %v6375_v18 = vld [vmem:[%s6354_s8 + $0x2] sm:$0x3]  ;;  %v5204_v19 = vpack.c.bf16 %v5707_v43, %v5696_v60  ;;  %v6396_v43 = vld [vmem:[%s6354_s8 + $0x4] sm:$0x3]  ;;  %v7168_v60 = vld [vmem:[#allocation28_spill] sm:$0xff] }
  0x55   : > { %5184 = vmatpush3.bf16.msra.mxu1 %v7163_v51  ;;  %v6321_v51 = vld [vmem:[%s5451_s26 + $0x1f8] sm:$0xff]  ;;  %v6401_v9 = vld [vmem:[%s6354_s8 + $0x6] sm:$0x3] }
  0x56   : > { %5191 = vmatprep.subr.bf16.mxu1 %v7099_v42  ;;  %4724 = vmatmul.mubr.msk.f32.vlgmr.msra.gmra.mrb[14].mxu0 %vm458_vm1, %v6279_v34  ;;  %v6339_v17 = vadd.f32 %v6321_v51, %v6040_v32  ;;  %v5369_v62 = vpack.c.bf16 %v6329_v30, %v6317_v7  ;;  %v7165_v32 = vpack.c.bf16 %v5475_v12, %v5472_v11  ;;  %v6370_v11 = vld [vmem:[%s6354_s8] sm:$0x3] }
  0x57   : > { %5187 = vmatpush3.bf16.msra.mxu0 %v7164_v1  ;;  %4745 = vmatprep.mubr.msk.f32.mxu0 %vm5397_vm0, %v7100_v20  ;;  %v5198_v12 = vpack.c.bf16 %v5693_v55, %v5690_v53  ;;  %v7167_v53 = vld [vmem:[#allocation24_spill] sm:$0xff]  ;;  %v7169_v1 = vld [vmem:[#allocation29_spill] sm:$0xff] }
  0x58   : > { %4735 = vmatmul.mubr.msk.f32.vlgmr.msra.gmra.mrb[14].mxu1 %vm458_vm1, %v6302_v29  ;;  %5188 = vmatprep.subr.bf16.mxu0 %v7099_v42  ;;  %v5375_v5 = vpack.c.bf16 %v6339_v17, %v6333_v26  ;;  %v5207_v55 = vpack.c.bf16 %v7167_v53, %v7166_v28  ;;  %v5210_v6 = vpack.c.bf16 %v7169_v1, %v7168_v60  ;;  %v7174_v28 = vld [vmem:[#allocation41_spill] sm:$0xff]  ;;  %v7175_v53 = vld [vmem:[#allocation42_spill] sm:$0xff]  ;;  %v6422_v60 = vld [vmem:[%s6354_s8 + $0x8] sm:$0x3] }
  0x59   : > { %5193 = vmatpush3.bf16.msra.mxu1 %v7165_v32  ;;  %4756 = vmatprep.mubr.msk.f32.mxu1 %vm5397_vm0, %v7100_v20  ;;  %v7171_v32 = vld [vmem:[#allocation31_spill] sm:$0xff]  ;;  %v7176_v1 = vld [vmem:[#allocation46_spill] sm:$0xff] }
  0x5a   : > { %5194 = vmatprep.subr.bf16.mxu1 %v7099_v42 }
  0x5b   : > { %5190 = vmatpush3.bf16.msra.mxu0 %v5189_v21  ;;  %v7170_v21 = vld [vmem:[#allocation30_spill] sm:$0xff] }
  0x5c   : > { %5197 = vmatprep.subr.bf16.mxu0 %v7099_v42 }
  0x5d   : > { %5196 = vmatpush3.bf16.msra.mxu1 %v5195_v4  ;;  %v5216_v4 = vpack.c.bf16 %v7171_v32, %v7170_v21  ;;  %v6427_v32 = vld [vmem:[%s6354_s8 + $0xa] sm:$0x3] }
  0x5e   : > { %5203 = vmatprep.subr.bf16.mxu1 %v7099_v42  ;;  %4746 = vmatmul.mubr.msk.f32.vlgmr.msra.gmra.mrb[16].mxu0 %vm458_vm1, %v6370_v11 }
  0x5f   : > { %5199 = vmatpush3.bf16.msra.mxu0 %v5198_v12  ;;  %4767 = vmatprep.mubr.msk.f32.mxu0 %vm5397_vm0, %v7100_v20  ;;  %v7172_v12 = vld [vmem:[#allocation32_spill] sm:$0xff] }
  0x60   : > { %4757 = vmatmul.mubr.msk.f32.vlgmr.msra.gmra.mrb[16].mxu1 %vm458_vm1, %v6375_v18  ;;  %5200 = vmatprep.subr.bf16.mxu0 %v7099_v42 }
  0x61   : > { %5205 = vmatpush3.bf16.msra.mxu1 %v5204_v19  ;;  %4778 = vmatprep.mubr.msk.f32.mxu1 %vm5397_vm0, %v7100_v20  ;;  %v7173_v19 = vld [vmem:[#allocation40_spill] sm:$0xff] }
  0x62   : > { %5206 = vmatprep.subr.bf16.mxu1 %v7099_v42 }
  0x63   : > { %5202 = vmatpush3.bf16.msra.mxu0 %v5201_v25  ;;  %v5213_v25 = vpack.c.bf16 %v7173_v19, %v7172_v12  ;;  %v7179_v12 = vld [vmem:[#allocation50_spill] sm:$0xff] }
  0x64   : > { %5209 = vmatprep.subr.bf16.mxu0 %v7099_v42 }
  0x65   : > { %5208 = vmatpush3.bf16.msra.mxu1 %v5207_v55  ;;  %v5219_v55 = vpack.c.bf16 %v7175_v53, %v7174_v28  ;;  %v7181_v28 = vld [vmem:[#allocation58_spill] sm:$0xff] }
  0x66   : > { %5215 = vmatprep.subr.bf16.mxu1 %v7099_v42  ;;  %4768 = vmatmul.mubr.msk.f32.vlgmr.msra.gmra.mrb[18].mxu0 %vm458_vm1, %v6396_v43 }
  0x67   : > { %5211 = vmatpush3.bf16.msra.mxu0 %v5210_v6  ;;  %4789 = vmatprep.mubr.msk.f32.mxu0 %vm5397_vm0, %v7100_v20  ;;  %v7177_v6 = vld [vmem:[#allocation47_spill] sm:$0xff] }
  0x68   : > { %4779 = vmatmul.mubr.msk.f32.vlgmr.msra.gmra.mrb[18].mxu1 %vm458_vm1, %v6401_v9  ;;  %5212 = vmatprep.subr.bf16.mxu0 %v7099_v42  ;;  %v5222_v21 = vpack.c.bf16 %v7177_v6, %v7176_v1  ;;  %v7183_v1 = vld [vmem:[#allocation60_spill] sm:$0xff] }
  0x69   : > { %5217 = vmatpush3.bf16.msra.mxu1 %v5216_v4  ;;  %4800 = vmatprep.mubr.msk.f32.mxu1 %vm5397_vm0, %v7100_v20  ;;  %v7178_v4 = vld [vmem:[#allocation49_spill] sm:$0xff] }
  0x6a   : > { %5218 = vmatprep.subr.bf16.mxu1 %v7099_v42  ;;  %v5228_v19 = vpack.c.bf16 %v7179_v12, %v7178_v4  ;;  %v6448_v4 = vld [vmem:[%s6354_s8 + $0xc] sm:$0x3]  ;;  %v7185_v12 = vld [vmem:[#allocation66_spill] sm:$0xff] }
  0x6b   : > { %5214 = vmatpush3.bf16.msra.mxu0 %v5213_v25  ;;  %v7180_v25 = vld [vmem:[#allocation54_spill] sm:$0xff] }
  0x6c   : > { %5221 = vmatprep.subr.bf16.mxu0 %v7099_v42  ;;  %v5225_v53 = vpack.c.bf16 %v7181_v28, %v7180_v25  ;;  %v7186_v28 = vld [vmem:[#allocation67_spill] sm:$0xff] }
  0x6d   : > { %5220 = vmatpush3.bf16.msra.mxu1 %v5219_v55  ;;  %v7182_v55 = vld [vmem:[#allocation59_spill] sm:$0xff] }
  0x6e   : > { %5227 = vmatprep.subr.bf16.mxu1 %v7099_v42  ;;  %4790 = vmatmul.mubr.msk.f32.vlgmr.msra.gmra.mrb[20].mxu0 %vm458_vm1, %v6422_v60  ;;  %v5231_v6 = vpack.c.bf16 %v7183_v1, %v7182_v55  ;;  %v5240_v55 = vpack.c.bf16 %v6069_v27, %v7186_v28  ;;  %v7187_v1 = vld [vmem:[#allocation70_spill] sm:$0xff]  ;;  %v6474_v27 = vld [vmem:[%s6354_s8 + $0x10] sm:$0x3] }
  0x6f   : > { %5223 = vmatpush3.bf16.msra.mxu0 %v5222_v21  ;;  %4811 = vmatprep.mubr.msk.f32.mxu0 %vm5397_vm0, %v7100_v20  ;;  %v7184_v21 = vld [vmem:[#allocation61_spill] sm:$0xff] }
  0x70   : > { %4801 = vmatmul.mubr.msk.f32.vlgmr.msra.gmra.mrb[20].mxu1 %vm458_vm1, %v6427_v32  ;;  %5224 = vmatprep.subr.bf16.mxu0 %v7099_v42  ;;  %v5234_v25 = vpack.c.bf16 %v7185_v12, %v7184_v21  ;;  %v7188_v21 = vld [vmem:[#allocation71_spill] sm:$0xff]  ;;  %v5255_v12 = vpack.c.bf16 %v6157_v49, %v6154_v52  ;;  %v5264_v52 = vpack.c.bf16 %v6210_v45, %v6196_v47  ;;  %v6526_v47 = vld [vmem:[%s6354_s8 + $0x18] sm:$0x3] }
  0x71   : > { %5229 = vmatpush3.bf16.msra.mxu1 %v5228_v19  ;;  %4822 = vmatprep.mubr.msk.f32.mxu1 %vm5397_vm0, %v7100_v20  ;;  %v6453_v19 = vld [vmem:[%s6354_s8 + $0xe] sm:$0x3]  ;;  %v5261_v49 = vpack.c.bf16 %v6216_v23, %v6213_v24  ;;  %v5270_v23 = vpack.c.bf16 %v6251_v38, %v6236_v3  ;;  %v5273_v3 = vpack.c.bf16 %v6306_v61, %v6282_v54  ;;  %v6555_v24 = vld [vmem:[%s6354_s8 + $0x1e] sm:$0x3]  ;;  %v7190_v38 = vld [vmem:[#allocation2_spill] sm:$0xff] }
  0x72   : > { %5230 = vmatprep.subr.bf16.mxu1 %v7099_v42  ;;  %v7193_v54 = vld [vmem:[#allocation4_spill] sm:$0xff]  ;;  %v2810_v16 = vadd.f32 %v6555_v24, %v6302_v29 }
  0x73   : > { %5226 = vmatpush3.bf16.msra.mxu0 %v5225_v53  ;;  %v5237_v53 = vpack.c.bf16 %v6075_v40, %v6072_v2  ;;  %v5246_v2 = vpack.c.bf16 %v6108_v0, %v7188_v21  ;;  %v6479_v40 = vld [vmem:[%s6354_s8 + $0x12] sm:$0x3]  ;;  %v5249_v0 = vpack.c.bf16 %v6151_v31, %v6137_v39  ;;  %v5258_v39 = vpack.c.bf16 %v6177_v35, %v6174_v46  ;;  %v6531_v35 = vld [vmem:[%s6354_s8 + $0x1a] sm:$0x3] }
  0x74   : > { %5233 = vmatprep.subr.bf16.mxu0 %v7099_v42  ;;  %v5267_v46 = vpack.c.bf16 %v6233_v8, %v6230_v57  ;;  %v5276_v8 = vpack.c.bf16 %v6257_v44, %v6254_v48  ;;  %v5279_v31 = vpack.c.bf16 %v6321_v51, %v6309_v14  ;;  %v6552_v48 = vld [vmem:[%s6354_s8 + $0x1c] sm:$0x3]  ;;  %v7189_v44 = vld [vmem:[#allocation3_spill] sm:$0xff]  ;;  %v7195_v14 = vld [vmem:[#allocation10_spill] sm:$0xff] }
  0x75   : > { %5232 = vmatpush3.bf16.msra.mxu1 %v5231_v6  ;;  %v5243_v6 = vpack.c.bf16 %v7187_v1, %v6086_v50  ;;  %v5252_v50 = vpack.c.bf16 %v6134_v33, %v6111_v36  ;;  %v6500_v36 = vld [vmem:[%s6354_s8 + $0x14] sm:$0x3]  ;;  %v6505_v33 = vld [vmem:[%s6354_s8 + $0x16] sm:$0x3]  ;;  %v7191_v45 = vpack.c.bf16 %v7189_v44, %v7190_v38  ;;  %v7192_v57 = vld [vmem:[#allocation5_spill] sm:$0xff]  ;;  %v2795_v51 = vadd.f32 %v6370_v11, %v7195_v14 }
  0x76   : > { %5239 = vmatprep.subr.bf16.mxu1 %v7099_v42  ;;  %4812 = vmatmul.mubr.msk.f32.vlgmr.msra.gmra.mrb[22].mxu0 %vm458_vm1, %v6448_v4  ;;  %v7194_v61 = vpack.c.bf16 %v7192_v57, %v7193_v54  ;;  %v7201_v21 = vld [vmem:[#allocation8_spill] sm:$0xff]  ;;  %v7203_v11 = vld [vmem:[#allocation19_spill] sm:$0xff]  ;;  %v7215_v38 = vld [vmem:[#allocation26_spill] sm:$0xff] }
  0x77   : > { %5235 = vmatpush3.bf16.msra.mxu0 %v5234_v25  ;;  %4833 = vmatprep.mubr.msk.f32.mxu0 %vm5397_vm0, %v7100_v20  ;;  %v7196_v25 = vld [vmem:[#allocation11_spill] sm:$0xff]  ;;  %v7218_v57 = vld [vmem:[#allocation33_spill] sm:$0xff] }
  0x78   : > { %4823 = vmatmul.mubr.msk.f32.vlgmr.msra.gmra.mrb[22].mxu1 %vm458_vm1, %v6453_v19  ;;  %5236 = vmatprep.subr.bf16.mxu0 %v7099_v42  ;;  %v2796_v28 = vadd.f32 %v6375_v18, %v7196_v25  ;;  %v7206_v18 = vld [vmem:[#allocation21_spill] sm:$0xff]  ;;  %v7214_v44 = vld [vmem:[#allocation27_spill] sm:$0xff] }
  0x79   : > { %5241 = vmatpush3.bf16.msra.mxu1 %v5240_v55  ;;  %4844 = vmatprep.mubr.msk.f32.mxu1 %vm5397_vm0, %v7100_v20  ;;  %v7197_v55 = vld [vmem:[#allocation7_spill] sm:$0xff] }
  0x7a   : > { %5242 = vmatprep.subr.bf16.mxu1 %v7099_v42 }
  0x7b   : > { %5238 = vmatpush3.bf16.msra.mxu0 %v5237_v53  ;;  %v7198_v53 = vld [vmem:[#allocation6_spill] sm:$0xff] }
  0x7c   : > { %5245 = vmatprep.subr.bf16.mxu0 %v7099_v42  ;;  %v7199_v1 = vpack.c.bf16 %v7197_v55, %v7198_v53  ;;  %v7225_v53 = vld [vmem:[#allocation43_spill] sm:$0xff] }
  0x7d   : > { %5244 = vmatpush3.bf16.msra.mxu1 %v5243_v6  ;;  %v7200_v6 = vld [vmem:[#allocation9_spill] sm:$0xff] }
  0x7e   : > { %5251 = vmatprep.subr.bf16.mxu1 %v7099_v42  ;;  %4834 = vmatmul.mubr.msk.f32.vlgmr.msra.gmra.mrb[24].mxu0 %vm458_vm1, %v6474_v27 }
  0x7f   : > { %5247 = vmatpush3.bf16.msra.mxu0 %v5246_v2  ;;  %4855 = vmatprep.mubr.msk.f32.mxu0 %vm5397_vm0, %v7100_v20  ;;  %v7202_v2 = vpack.c.bf16 %v7200_v6, %v7201_v21  ;;  %v7228_v21 = vld [vmem:[#allocation45_spill] sm:$0xff] }
  0x80   : > { %4845 = vmatmul.mubr.msk.f32.vlgmr.msra.gmra.mrb[24].mxu1 %vm458_vm1, %v6479_v40  ;;  %5248 = vmatprep.subr.bf16.mxu0 %v7099_v42 }
  0x81   : > { %5253 = vmatpush3.bf16.msra.mxu1 %v5252_v50  ;;  %4866 = vmatprep.mubr.msk.f32.mxu1 %vm5397_vm0, %v7100_v20  ;;  %v7204_v50 = vld [vmem:[#allocation18_spill] sm:$0xff] }
  0x82   : > { %5254 = vmatprep.subr.bf16.mxu1 %v7099_v42 }
  0x83   : > { %5250 = vmatpush3.bf16.msra.mxu0 %v5249_v0  ;;  %v7205_v0 = vpack.c.bf16 %v7203_v11, %v7204_v50  ;;  %v7232_v50 = vld [vmem:[#allocation51_spill] sm:$0xff] }
  0x84   : > { %5257 = vmatprep.subr.bf16.mxu0 %v7099_v42 }
  0x85   : > { %5256 = vmatpush3.bf16.msra.mxu1 %v5255_v12  ;;  %v7207_v12 = vld [vmem:[#allocation20_spill] sm:$0xff] }
  0x86   : > { %5263 = vmatprep.subr.bf16.mxu1 %v7099_v42  ;;  %4856 = vmatmul.mubr.msk.f32.vlgmr.msra.gmra.mrb[26].mxu0 %vm458_vm1, %v6500_v36 }
  0x87   : > { %5259 = vmatpush3.bf16.msra.mxu0 %v5258_v39  ;;  %4877 = vmatprep.mubr.msk.f32.mxu0 %vm5397_vm0, %v7100_v20  ;;  %v7208_v39 = vpack.c.bf16 %v7206_v18, %v7207_v12  ;;  %v7235_v18 = vld [vmem:[#allocation55_spill] sm:$0xff] }
  0x88   : > { %4867 = vmatmul.mubr.msk.f32.vlgmr.msra.gmra.mrb[26].mxu1 %vm458_vm1, %v6505_v33  ;;  %5260 = vmatprep.subr.bf16.mxu0 %v7099_v42 }
  0x89   : > { %5265 = vmatpush3.bf16.msra.mxu1 %v5264_v52  ;;  %4888 = vmatprep.mubr.msk.f32.mxu1 %vm5397_vm0, %v7100_v20  ;;  %v7209_v52 = vld [vmem:[#allocation12_spill] sm:$0xff] }
  0x8a   : > { %5266 = vmatprep.subr.bf16.mxu1 %v7099_v42 }
  0x8b   : > { %5262 = vmatpush3.bf16.msra.mxu0 %v5261_v49  ;;  %v2797_v49 = vadd.f32 %v6396_v43, %v7209_v52  ;;  %v7217_v43 = vld [vmem:[#allocation34_spill] sm:$0xff] }
  0x8c   : > { %5269 = vmatprep.subr.bf16.mxu0 %v7099_v42  ;;  %v7219_v54 = vpack.c.bf16 %v7217_v43, %v7218_v57  ;;  %v7249_v57 = vld [vmem:[#allocation69_spill] sm:$0xff] }
  0x8d   : > { %5268 = vmatpush3.bf16.msra.mxu1 %v5267_v46  ;;  %v7210_v46 = vld [vmem:[#allocation13_spill] sm:$0xff] }
  0x8e   : > { %5275 = vmatprep.subr.bf16.mxu1 %v7099_v42  ;;  %4878 = vmatmul.mubr.msk.f32.vlgmr.msra.gmra.mrb[28].mxu0 %vm458_vm1, %v6526_v47 }
  0x8f   : > { %5271 = vmatpush3.bf16.msra.mxu0 %v5270_v23  ;;  %4899 = vmatprep.mubr.msk.f32.mxu0 %vm5397_vm0, %v7100_v20  ;;  %v2798_v23 = vadd.f32 %v6401_v9, %v7210_v46  ;;  %v7220_v9 = vld [vmem:[#allocation38_spill] sm:$0xff] }
  0x90   : > { %4889 = vmatmul.mubr.msk.f32.vlgmr.msra.gmra.mrb[28].mxu1 %vm458_vm1, %v6531_v35  ;;  %5272 = vmatprep.subr.bf16.mxu0 %v7099_v42 }
  0x91   : > { %5277 = vmatpush3.bf16.msra.mxu1 %v5276_v8  ;;  %4910 = vmatprep.mubr.msk.f32.mxu1 %vm5397_vm0, %v7100_v20  ;;  %v7211_v8 = vld [vmem:[#allocation25_spill] sm:$0xff] }
  0x92   : > { %5278 = vmatprep.subr.bf16.mxu1 %v7099_v42 }
  0x93   : > { %5274 = vmatpush3.bf16.msra.mxu0 %v5273_v3  ;;  %v7212_v3 = vld [vmem:[#allocation22_spill] sm:$0xff] }
  0x94   : > { %5281 = vmatprep.subr.bf16.mxu0 %v7099_v42 }
  0x95   : > { %5280 = vmatpush3.bf16.msra.mxu1 %v5279_v31  ;;  %v7213_v31 = vpack.c.bf16 %v7211_v8, %v7212_v3  ;;  %v7240_v8 = vld [vmem:[#allocation57_spill] sm:$0xff] }
  0x96   : > { %5287 = vmatprep.subr.bf16.mxu1 %v7099_v42  ;;  %4900 = vmatmul.mubr.msk.f32.vlgmr.msra.gmra.mrb[30].mxu0 %vm458_vm1, %v6552_v48 }
  0x97   : > { %5283 = vmatpush3.bf16.msra.mxu0 %v7191_v45  ;;  %4921 = vmatprep.mubr.msk.f32.mxu0 %vm5397_vm0, %v7100_v20  ;;  %v7216_v45 = vpack.c.bf16 %v7214_v44, %v7215_v38  ;;  %v7243_v44 = vld [vmem:[#allocation63_spill] sm:$0xff] }
  0x98   : > { %4911 = vmatmul.mubr.msk.f32.vlgmr.msra.gmra.mrb[30].mxu1 %vm458_vm1, %v6555_v24  ;;  %5284 = vmatprep.subr.bf16.mxu0 %v7099_v42 }
  0x99   : > { %5289 = vmatpush3.bf16.msra.mxu1 %v7194_v61  ;;  %4932 = vmatprep.mubr.msk.f32.mxu1 %vm5397_vm0, %v7100_v20  ;;  %v7221_v61 = vld [vmem:[#allocation37_spill] sm:$0xff] }
  0x9a   : > { %5290 = vmatprep.subr.bf16.mxu1 %v7099_v42  ;;  %v7222_v14 = vpack.c.bf16 %v7220_v9, %v7221_v61  ;;  %v7251_v9 = vld [vmem:[#allocation35_spill] sm:$0xff] }
  0x9b   : > { %5286 = vmatpush3.bf16.msra.mxu0 %v7199_v1  ;;  %v7226_v1 = vld [vmem:[#allocation39_spill] sm:$0xff]  ;;  %v2803_v61 = vadd.f32 %v6474_v27, %v7251_v9  ;;  %v7257_v27 = vld [vmem:[#allocation78_spill] sm:$0xff] }
  0x9c   : > { %5293 = vmatprep.subr.bf16.mxu0 %v7099_v42  ;;  %v7227_v6 = vpack.c.bf16 %v7225_v53, %v7226_v1  ;;  %v7258_v1 = vld [vmem:[#allocation76_spill] sm:$0xff] }
  0x9d   : > { %5292 = vmatpush3.bf16.msra.mxu1 %v7202_v2  ;;  %v7229_v2 = vld [vmem:[#allocation44_spill] sm:$0xff] }
  0x9e   : > { %5299 = vmatprep.subr.bf16.mxu1 %v7099_v42  ;;  %4922 = vmatmul.mubr.msk.f32.vlgmr.msra.gmra.mrb[32].mxu0 %vm458_vm1, %v2795_v51  ;;  %v7223_v51 = vld [vmem:[#allocation14_spill] sm:$0xff]  ;;  %v7230_v11 = vpack.c.bf16 %v7228_v21, %v7229_v2  ;;  %v7261_v21 = vld [vmem:[#allocation79_spill] sm:$0xff] }
  0x9f   : > { %5295 = vmatpush3.bf16.msra.mxu0 %v7205_v0  ;;  %4943 = vmatprep.mubr.msk.f32.mxu0 %vm5397_vm0, %v7100_v20  ;;  %v2799_v25 = vadd.f32 %v6422_v60, %v7223_v51  ;;  %v7231_v60 = vld [vmem:[#allocation52_spill] sm:$0xff] }
  0xa0   : > { %4933 = vmatmul.mubr.msk.f32.vlgmr.msra.gmra.mrb[32].mxu1 %vm458_vm1, %v2796_v28  ;;  %5296 = vmatprep.subr.bf16.mxu0 %v7099_v42  ;;  %v7224_v28 = vld [vmem:[#allocation15_spill] sm:$0xff]  ;;  %v7233_v0 = vpack.c.bf16 %v7231_v60, %v7232_v50  ;;  %v7265_v50 = vld [vmem:[#allocation82_spill] sm:$0xff] }
  0xa1   : > { %5301 = vmatpush3.bf16.msra.mxu1 %v7208_v39  ;;  %4954 = vmatprep.mubr.msk.f32.mxu1 %vm5397_vm0, %v7100_v20  ;;  %v2800_v55 = vadd.f32 %v6427_v32, %v7224_v28  ;;  %v7234_v32 = vld [vmem:[#allocation56_spill] sm:$0xff]  ;;  %v7254_v28 = vld [vmem:[#allocation75_spill] sm:$0xff] }
  0xa2   : > { %5302 = vmatprep.subr.bf16.mxu1 %v7099_v42  ;;  %v7236_v12 = vpack.c.bf16 %v7234_v32, %v7235_v18  ;;  %v7237_v39 = vld [vmem:[#allocation16_spill] sm:$0xff] }
  0xa3   : > { %5298 = vmatpush3.bf16.msra.mxu0 %v7213_v31  ;;  %v2801_v52 = vadd.f32 %v6448_v4, %v7237_v39  ;;  %v7242_v31 = vld [vmem:[#allocation64_spill] sm:$0xff] }
  0xa4   : > { %5305 = vmatprep.subr.bf16.mxu0 %v7099_v42  ;;  %v7244_v38 = vpack.c.bf16 %v7242_v31, %v7243_v44  ;;  %v7245_v4 = vld [vmem:[#allocation68_spill] sm:$0xff]  ;;  %v7278_v31 = vld [vmem:[#allocation77_spill] sm:$0xff] }
  0xa5   : > { %5304 = vmatpush3.bf16.msra.mxu1 %v7216_v45  ;;  %v7246_v45 = vld [vmem:[#allocation65_spill] sm:$0xff]  ;;  %v7268_v18 = vld [vmem:[#allocation84_spill] sm:$0xff]  ;;  %v2808_v44 = vadd.f32 %v6531_v35, %v7278_v31 }
  0xa6   : > { %5311 = vmatprep.subr.bf16.mxu1 %v7099_v42  ;;  %4944 = vmatmul.mubr.msk.f32.vlgmr.msra.gmra.mrb[34].mxu0 %vm458_vm1, %v2797_v49  ;;  %v7238_v49 = vld [vmem:[#allocation17_spill] sm:$0xff]  ;;  %v7247_v43 = vpack.c.bf16 %v7245_v4, %v7246_v45  ;;  %v7280_v4 = vpack.c.bf16 %v6269_v15, %v6265_v22  ;;  %v2809_v15 = vadd.f32 %v6552_v48, %v6279_v34 }
  0xa7   : > { %5307 = vmatpush3.bf16.msra.mxu0 %v7219_v54  ;;  %4965 = vmatprep.mubr.msk.f32.mxu0 %vm5397_vm0, %v7100_v20  ;;  %v2802_v46 = vadd.f32 %v6453_v19, %v7238_v49  ;;  %v7248_v19 = vld [vmem:[#allocation72_spill] sm:$0xff] }
  0xa8   : > { %4955 = vmatmul.mubr.msk.f32.vlgmr.msra.gmra.mrb[34].mxu1 %vm458_vm1, %v2798_v23  ;;  %5308 = vmatprep.subr.bf16.mxu0 %v7099_v42  ;;  %v7239_v23 = vld [vmem:[#allocation62_spill] sm:$0xff]  ;;  %v7250_v54 = vpack.c.bf16 %v7248_v19, %v7249_v57 }
  0xa9   : > { %5313 = vmatpush3.bf16.msra.mxu1 %v7222_v14  ;;  %4976 = vmatprep.mubr.msk.f32.mxu1 %vm5397_vm0, %v7100_v20  ;;  %v7241_v3 = vpack.c.bf16 %v7239_v23, %v7240_v8  ;;  %v7252_v14 = vld [vmem:[#allocation36_spill] sm:$0xff]  ;;  %v7277_v8 = vld [vmem:[#allocation73_spill] sm:$0xff] }
  0xaa   : > { %5314 = vmatprep.subr.bf16.mxu1 %v7099_v42  ;;  %v2804_v51 = vadd.f32 %v6479_v40, %v7252_v14  ;;  %v7260_v40 = vld [vmem:[#allocation80_spill] sm:$0xff] }
  0xab   : > { %5310 = vmatpush3.bf16.msra.mxu0 %v7227_v6  ;;  %v7259_v6 = vpack.c.bf16 %v7257_v27, %v7258_v1 }
  0xac   : > { %5317 = vmatprep.subr.bf16.mxu0 %v7099_v42 }
  0xad   : > { %5316 = vmatpush3.bf16.msra.mxu1 %v7230_v11  ;;  %v7264_v11 = vld [vmem:[#allocation53_spill] sm:$0xff] }
  0xae   : > { %5323 = vmatprep.subr.bf16.mxu1 %v7099_v42  ;;  %4966 = vmatmul.mubr.msk.f32.vlgmr.msra.gmra.mrb[36].mxu0 %vm458_vm1, %v2799_v25  ;;  %v7253_v25 = vpack.c.bf16 %v6115_v37, %v6102_v41  ;;  %v7262_v37 = vpack.c.bf16 %v7260_v40, %v7261_v21  ;;  %v7263_v41 = vld [vmem:[#allocation48_spill] sm:$0xff]  ;;  %v2806_v60 = vadd.f32 %v6505_v33, %v7264_v11 }
  0xaf   : > { %5319 = vmatpush3.bf16.msra.mxu0 %v7233_v0  ;;  %4987 = vmatprep.mubr.msk.f32.mxu0 %vm5397_vm0, %v7100_v20  ;;  %v2805_v2 = vadd.f32 %v6500_v36, %v7263_v41  ;;  %v7266_v0 = vld [vmem:[#allocation81_spill] sm:$0xff]  ;;  %v7271_v36 = vld [vmem:[#allocation86_spill] sm:$0xff]  ;;  %v7274_v33 = vld [vmem:[#allocation88_spill] sm:$0xff] }
  0xb0   : > { %4977 = vmatmul.mubr.msk.f32.vlgmr.msra.gmra.mrb[36].mxu1 %vm458_vm1, %v2800_v55  ;;  %5320 = vmatprep.subr.bf16.mxu0 %v7099_v42  ;;  %v7255_v55 = vld [vmem:[#allocation74_spill] sm:$0xff]  ;;  %v7267_v32 = vpack.c.bf16 %v7265_v50, %v7266_v0 }
  0xb1   : > { %5325 = vmatpush3.bf16.msra.mxu1 %v7236_v12  ;;  %4998 = vmatprep.mubr.msk.f32.mxu1 %vm5397_vm0, %v7100_v20  ;;  %v7256_v53 = vpack.c.bf16 %v7254_v28, %v7255_v55  ;;  %v7269_v12 = vld [vmem:[#allocation83_spill] sm:$0xff] }
  0xb2   : > { %5326 = vmatprep.subr.bf16.mxu1 %v7099_v42  ;;  %v7270_v39 = vpack.c.bf16 %v7268_v18, %v7269_v12 }
  0xb3   : > { %5322 = vmatpush3.bf16.msra.mxu0 %v7241_v3  ;;  %v2807_v3 = vadd.f32 %v6526_v47, %v7277_v8 }
  0xb4   : > { %5329 = vmatprep.subr.bf16.mxu0 %v7099_v42 }
  0xb5   : > { %5328 = vmatpush3.bf16.msra.mxu1 %v7244_v38  ;;  %v7279_v38 = vpack.c.bf16 %v6261_v58, %v6246_v10  ;;  %v7281_v10 = vpack.c.bf16 %v6296_v63, %v6292_v56 }
  0xb6   : > { %5335 = vmatprep.subr.bf16.mxu1 %v7099_v42  ;;  %4988 = vmatmul.mubr.msk.f32.vlgmr.msra.gmra.mrb[38].mxu0 %vm458_vm1, %v2801_v52  ;;  %v7272_v52 = vld [vmem:[#allocation85_spill] sm:$0xff] }
  0xb7   : > { %5331 = vmatpush3.bf16.msra.mxu0 %v7247_v43  ;;  %5009 = vmatprep.mubr.msk.f32.mxu0 %vm5397_vm0, %v7100_v20  ;;  %v7273_v49 = vpack.c.bf16 %v7271_v36, %v7272_v52 }
  0xb8   : > { %4999 = vmatmul.mubr.msk.f32.vlgmr.msra.gmra.mrb[38].mxu1 %vm458_vm1, %v2802_v46  ;;  %5332 = vmatprep.subr.bf16.mxu0 %v7099_v42  ;;  %v7275_v46 = vld [vmem:[#allocation87_spill] sm:$0xff] }
  0xb9   : > { %5337 = vmatpush3.bf16.msra.mxu1 %v7250_v54  ;;  %5020 = vmatprep.mubr.msk.f32.mxu1 %vm5397_vm0, %v7100_v20  ;;  %v7276_v23 = vpack.c.bf16 %v7274_v33, %v7275_v46 }
  0xba   : > { %5338 = vmatprep.subr.bf16.mxu1 %v7099_v42 }
  0xbb   : > { %5334 = vmatpush3.bf16.msra.mxu0 %v7253_v25 }
  0xbc   : > { %5341 = vmatprep.subr.bf16.mxu0 %v7099_v42 }
  0xbd   : > { %5340 = vmatpush3.bf16.msra.mxu1 %v7256_v53 }
  0xbe   : > { %5347 = vmatprep.subr.bf16.mxu1 %v7099_v42  ;;  %5010 = vmatmul.mubr.msk.f32.vlgmr.msra.gmra.mrb[40].mxu0 %vm458_vm1, %v2803_v61 }
  0xbf   : > { %5343 = vmatpush3.bf16.msra.mxu0 %v7259_v6  ;;  %5031 = vmatprep.mubr.msk.f32.mxu0 %vm5397_vm0, %v7100_v20 }
  0xc0   : > { %5021 = vmatmul.mubr.msk.f32.vlgmr.msra.gmra.mrb[40].mxu1 %vm458_vm1, %v2804_v51  ;;  %5344 = vmatprep.subr.bf16.mxu0 %v7099_v42 }
  0xc1   : > { %5349 = vmatpush3.bf16.msra.mxu1 %v7262_v37  ;;  %5042 = vmatprep.mubr.msk.f32.mxu1 %vm5397_vm0, %v7100_v20 }
  0xc2   : > { %5350 = vmatprep.subr.bf16.mxu1 %v7099_v42 }
  0xc3   : > { %5346 = vmatpush3.bf16.msra.mxu0 %v7267_v32 }
  0xc4   : > { %5353 = vmatprep.subr.bf16.mxu0 %v7099_v42 }
  0xc5   : > { %5352 = vmatpush3.bf16.msra.mxu1 %v7270_v39 }
  0xc6   : > { %5359 = vmatprep.subr.bf16.mxu1 %v7099_v42  ;;  %5032 = vmatmul.mubr.msk.f32.vlgmr.msra.gmra.mrb[42].mxu0 %vm458_vm1, %v2805_v2 }
  0xc7   : > { %5355 = vmatpush3.bf16.msra.mxu0 %v7273_v49  ;;  %5053 = vmatprep.mubr.msk.f32.mxu0 %vm5397_vm0, %v7100_v20 }
  0xc8   : > { %5043 = vmatmul.mubr.msk.f32.vlgmr.msra.gmra.mrb[42].mxu1 %vm458_vm1, %v2806_v60  ;;  %5356 = vmatprep.subr.bf16.mxu0 %v7099_v42 }
  0xc9   : > { %5361 = vmatpush3.bf16.msra.mxu1 %v7276_v23  ;;  %5064 = vmatprep.mubr.msk.f32.mxu1 %vm5397_vm0, %v7100_v20 }
  0xca   : > { %5362 = vmatprep.subr.bf16.mxu1 %v7099_v42 }
  0xcb   : > { %5358 = vmatpush3.bf16.msra.mxu0 %v7279_v38 }
  0xcc   : > { %5365 = vmatprep.subr.bf16.mxu0 %v7099_v42 }
  0xcd   : > { %5364 = vmatpush3.bf16.msra.mxu1 %v7280_v4 }
  0xce   : > { %5371 = vmatprep.subr.bf16.mxu1 %v7099_v42  ;;  %5054 = vmatmul.mubr.msk.f32.vlgmr.msra.gmra.mrb[44].mxu0 %vm458_vm1, %v2807_v3 }
  0xcf   : > { %5367 = vmatpush3.bf16.msra.mxu0 %v5366_v59  ;;  %5075 = vmatprep.mubr.msk.f32.mxu0 %vm5397_vm0, %v7100_v20 }
  0xd0   : > { %5065 = vmatmul.mubr.msk.f32.vlgmr.msra.gmra.mrb[44].mxu1 %vm458_vm1, %v2808_v44  ;;  %5368 = vmatprep.subr.bf16.mxu0 %v7099_v42 }
  0xd1   : > { %5373 = vmatpush3.bf16.msra.mxu1 %v7281_v10  ;;  %5086 = vmatprep.mubr.msk.f32.mxu1 %vm5397_vm0, %v7100_v20 }
  0xd2   : > { %5374 = vmatprep.subr.bf16.mxu1 %v7099_v42 }
  0xd3   : > { %5370 = vmatpush3.bf16.msra.mxu0 %v5369_v62 }
  0xd5   : > { %5376 = vmatpush3.bf16.msra.mxu1 %v5375_v5 }
  0xd6   : > { %5076 = vmatmul.mubr.msk.f32.vlgmr.msra.gmra.mrb[46].mxu0 %vm458_vm1, %v2809_v15 }
  0xd8   : > { %5087 = vmatmul.mubr.msk.f32.vlgmr.msra.gmra.mrb[46].mxu1 %vm458_vm1, %v2810_v16 }
  0xef   : > { %v6769_v42 = vpop.f32.mrb[0].mxu0 }
  0xf0   : > { %v4571_v20 = vpop.f32.mrb[1].mxu0 }
  0xf1   : > { %v6771_v63 = vpop.f32.mrb[0].mxu1 }
  0xf2   : > { %v4582_v34 = vpop.f32.mrb[1].mxu1 }
  0xf7   : > { %v6773_v59 = vpop.f32.mrb[2].mxu0 }
  0xf8   : > { %v4593_v7 = vpop.f32.mrb[3].mxu0 }
  0xf9   : > { %v6775_v29 = vpop.f32.mrb[2].mxu1 }
  0xfa   : > { %v4604_v58 = vpop.f32.mrb[3].mxu1 }
  0xff   : > { %v6777_v22 = vpop.f32.mrb[4].mxu0 }
 0x100   : > { %v4615_v56 = vpop.f32.mrb[5].mxu0 }
 0x101   : > { %v6779_v13 = vpop.f32.mrb[4].mxu1 }
 0x102   : > { %v4626_v30 = vpop.f32.mrb[5].mxu1 }
 0x107   : > { %v6781_v26 = vpop.f32.mrb[6].mxu0 }
 0x108   : > { %v4637_v62 = vpop.f32.mrb[7].mxu0 }
 0x109   : > { %v6783_v17 = vpop.f32.mrb[6].mxu1 }
 0x10a   : > { %v4648_v5 = vpop.f32.mrb[7].mxu1 }
 0x10f   : > { %v6785_v47 = vpop.f32.mrb[8].mxu0 }
 0x110   : > { %v4659_v48 = vpop.f32.mrb[9].mxu0 }
 0x111   : > { %v6787_v35 = vpop.f32.mrb[8].mxu1 }
 0x112   : > { %v4670_v24 = vpop.f32.mrb[9].mxu1 }
 0x117   : > { %v6789_v45 = vpop.f32.mrb[10].mxu0 }
 0x118   : > { %v4681_v19 = vpop.f32.mrb[11].mxu0 }
 0x119   : > { %v6791_v43 = vpop.f32.mrb[10].mxu1 }
 0x11a   : > { %v4692_v57 = vpop.f32.mrb[11].mxu1 }
 0x11f   : > { %v6793_v54 = vpop.f32.mrb[12].mxu0 }
 0x120   : > { %v4703_v61 = vpop.f32.mrb[13].mxu0 }
 0x121   : > { %v6795_v9 = vpop.f32.mrb[12].mxu1 }
 0x122   : > { %v4714_v14 = vpop.f32.mrb[13].mxu1 }
 0x129   : > { %v6797_v51 = vpop.f32.mrb[14].mxu0 }
 0x12a   : > { %v4725_v28 = vpop.f32.mrb[15].mxu0 }
 0x12b   : > { %v6799_v25 = vpop.f32.mrb[14].mxu1 }
 0x12c   : > { %v4736_v55 = vpop.f32.mrb[15].mxu1 }
 0x131   : > { %v6807_v53 = vpop.f32.mrb[16].mxu0 }
 0x132   : > { %v4043_v27 = vsub.f32 %v6769_v42, %v6807_v53  ;;  %v4747_v6 = vpop.f32.mrb[17].mxu0 }
 0x133   : > { %v6811_v1 = vpop.f32.mrb[16].mxu1 }
 0x134   : > { %v4044_v40 = vsub.f32 %v6771_v63, %v6811_v1  ;;  %v4758_v21 = vpop.f32.mrb[17].mxu1  ;;  %4060 = vst.msk [vmem:[%s6805_s11] sm:$0x3] %vm4059_vm2, %v4043_v27 }
 0x136   : > { %4061 = vst.msk [vmem:[%s6805_s11 + $0x2] sm:$0x3] %vm4059_vm2, %v4044_v40 }
 0x139   : > { %v6819_v37 = vpop.f32.mrb[18].mxu0 }
 0x13a   : > { %v4045_v41 = vsub.f32 %v6773_v59, %v6819_v37  ;;  %v4769_v11 = vpop.f32.mrb[19].mxu0 }
 0x13b   : > { %v6823_v2 = vpop.f32.mrb[18].mxu1 }
 0x13c   : > { %v4046_v60 = vsub.f32 %v6775_v29, %v6823_v2  ;;  %v4780_v50 = vpop.f32.mrb[19].mxu1  ;;  %4062 = vst.msk [vmem:[%s6805_s11 + $0x4] sm:$0x3] %vm4059_vm2, %v4045_v41 }
 0x13e   : > { %4063 = vst.msk [vmem:[%s6805_s11 + $0x6] sm:$0x3] %vm4059_vm2, %v4046_v60 }
 0x141   : > { %v6831_v0 = vpop.f32.mrb[20].mxu0 }
 0x142   : > { %v4047_v32 = vsub.f32 %v6777_v22, %v6831_v0  ;;  %v4791_v12 = vpop.f32.mrb[21].mxu0 }
 0x143   : > { %v6835_v18 = vpop.f32.mrb[20].mxu1 }
 0x144   : > { %v4048_v39 = vsub.f32 %v6779_v13, %v6835_v18  ;;  %v4802_v36 = vpop.f32.mrb[21].mxu1  ;;  %4064 = vst.msk [vmem:[%s6805_s11 + $0x8] sm:$0x3] %vm4059_vm2, %v4047_v32 }
 0x146   : > { %4065 = vst.msk [vmem:[%s6805_s11 + $0xa] sm:$0x3] %vm4059_vm2, %v4048_v39 }
 0x149   : > { %v6843_v52 = vpop.f32.mrb[22].mxu0 }
 0x14a   : > { %v4049_v49 = vsub.f32 %v6781_v26, %v6843_v52  ;;  %v4813_v46 = vpop.f32.mrb[23].mxu0 }
 0x14b   : > { %v6847_v33 = vpop.f32.mrb[22].mxu1 }
 0x14c   : > { %v4050_v23 = vsub.f32 %v6783_v17, %v6847_v33  ;;  %v4824_v8 = vpop.f32.mrb[23].mxu1  ;;  %4066 = vst.msk [vmem:[%s6805_s11 + $0xc] sm:$0x3] %vm4059_vm2, %v4049_v49 }
 0x14e   : > { %4067 = vst.msk [vmem:[%s6805_s11 + $0xe] sm:$0x3] %vm4059_vm2, %v4050_v23 }
 0x151   : > { %v6855_v3 = vpop.f32.mrb[24].mxu0 }
 0x152   : > { %v4051_v31 = vsub.f32 %v6785_v47, %v6855_v3  ;;  %v4835_v38 = vpop.f32.mrb[25].mxu0 }
 0x153   : > { %v6859_v44 = vpop.f32.mrb[24].mxu1 }
 0x154   : > { %v4052_v4 = vsub.f32 %v6787_v35, %v6859_v44  ;;  %v4846_v10 = vpop.f32.mrb[25].mxu1  ;;  %4068 = vst.msk [vmem:[%s6805_s11 + $0x10] sm:$0x3] %vm4059_vm2, %v4051_v31 }
 0x156   : > { %4069 = vst.msk [vmem:[%s6805_s11 + $0x12] sm:$0x3] %vm4059_vm2, %v4052_v4 }
 0x159   : > { %v6867_v15 = vpop.f32.mrb[26].mxu0 }
 0x15a   : > { %v4053_v16 = vsub.f32 %v6789_v45, %v6867_v15  ;;  %v4857_v34 = vpop.f32.mrb[27].mxu0 }
 0x15b   : > { %v6871_v20 = vpop.f32.mrb[26].mxu1 }
 0x15c   : > { %v4054_v7 = vsub.f32 %v6791_v43, %v6871_v20  ;;  %v4868_v58 = vpop.f32.mrb[27].mxu1  ;;  %4070 = vst.msk [vmem:[%s6805_s11 + $0x14] sm:$0x3] %vm4059_vm2, %v4053_v16 }
 0x15e   : > { %4071 = vst.msk [vmem:[%s6805_s11 + $0x16] sm:$0x3] %vm4059_vm2, %v4054_v7 }
 0x161   : > { %v6879_v56 = vpop.f32.mrb[28].mxu0 }
 0x162   : > { %v4055_v30 = vsub.f32 %v6793_v54, %v6879_v56  ;;  %v4879_v5 = vpop.f32.mrb[29].mxu0 }
 0x163   : > { %v6883_v62 = vpop.f32.mrb[28].mxu1 }
 0x164   : > { %v4056_v48 = vsub.f32 %v6795_v9, %v6883_v62  ;;  %v4890_v24 = vpop.f32.mrb[29].mxu1  ;;  %4072 = vst.msk [vmem:[%s6805_s11 + $0x18] sm:$0x3] %vm4059_vm2, %v4055_v30 }
 0x166   : > { %4073 = vst.msk [vmem:[%s6805_s11 + $0x1a] sm:$0x3] %vm4059_vm2, %v4056_v48 }
 0x169   : > { %v6891_v19 = vpop.f32.mrb[30].mxu0 }
 0x16a   : > { %v4057_v57 = vsub.f32 %v6797_v51, %v6891_v19  ;;  %v4901_v14 = vpop.f32.mrb[31].mxu0 }
 0x16b   : > { %v6895_v61 = vpop.f32.mrb[30].mxu1 }
 0x16c   : > { %v4058_v28 = vsub.f32 %v6799_v25, %v6895_v61  ;;  %v4912_v55 = vpop.f32.mrb[31].mxu1  ;;  %4074 = vst.msk [vmem:[%s6805_s11 + $0x1c] sm:$0x3] %vm4059_vm2, %v4057_v57 }
 0x16e   : > { %4075 = vst.msk [vmem:[%s6805_s11 + $0x1e] sm:$0x3] %vm4059_vm2, %v4058_v28 }
 0x171   : > { %v2944_v27 = vpop.f32.mrb[32].mxu0 }
 0x172   : > { %v4076_v6 = vsub.f32 %v2944_v27, %v6769_v42  ;;  %v4923_v21 = vpop.f32.mrb[33].mxu0 }
 0x173   : > { %v3017_v40 = vpop.f32.mrb[32].mxu1 }
 0x174   : > { %v4077_v41 = vsub.f32 %v3017_v40, %v6771_v63  ;;  %v4934_v11 = vpop.f32.mrb[33].mxu1  ;;  %v4092_v60 = vsub.f32 %v4076_v6, %v6807_v53 }
 0x176   : > { %v4093_v50 = vsub.f32 %v4077_v41, %v6811_v1  ;;  %4108 = vst.msk [vmem:[%s6908_s14] sm:$0x3] %vm4059_vm2, %v4092_v60 }
 0x178   : > { %4109 = vst.msk [vmem:[%s6908_s14 + $0x2] sm:$0x3] %vm4059_vm2, %v4093_v50 }
 0x179   : > { %v3090_v42 = vpop.f32.mrb[34].mxu0 }
 0x17a   : > { %v4078_v32 = vsub.f32 %v3090_v42, %v6773_v59  ;;  %v4945_v39 = vpop.f32.mrb[35].mxu0 }
 0x17b   : > { %v3163_v12 = vpop.f32.mrb[34].mxu1 }
 0x17c   : > { %v4079_v36 = vsub.f32 %v3163_v12, %v6775_v29  ;;  %v4956_v49 = vpop.f32.mrb[35].mxu1  ;;  %v4094_v63 = vsub.f32 %v4078_v32, %v6819_v37 }
 0x17e   : > { %v4095_v53 = vsub.f32 %v4079_v36, %v6823_v2  ;;  %4110 = vst.msk [vmem:[%s6908_s14 + $0x4] sm:$0x3] %vm4059_vm2, %v4094_v63 }
 0x180   : > { %4111 = vst.msk [vmem:[%s6908_s14 + $0x6] sm:$0x3] %vm4059_vm2, %v4095_v53 }
 0x181   : > { %v3236_v1 = vpop.f32.mrb[36].mxu0 }
 0x182   : > { %v4080_v46 = vsub.f32 %v3236_v1, %v6777_v22  ;;  %v4967_v59 = vpop.f32.mrb[37].mxu0 }
 0x183   : > { %v3309_v23 = vpop.f32.mrb[36].mxu1 }
 0x184   : > { %v4081_v8 = vsub.f32 %v3309_v23, %v6779_v13  ;;  %v4978_v31 = vpop.f32.mrb[37].mxu1  ;;  %v4096_v29 = vsub.f32 %v4080_v46, %v6831_v0 }
 0x186   : > { %v4097_v37 = vsub.f32 %v4081_v8, %v6835_v18  ;;  %4112 = vst.msk [vmem:[%s6908_s14 + $0x8] sm:$0x3] %vm4059_vm2, %v4096_v29 }
 0x188   : > { %4113 = vst.msk [vmem:[%s6908_s14 + $0xa] sm:$0x3] %vm4059_vm2, %v4097_v37 }
 0x189   : > { %v3382_v2 = vpop.f32.mrb[38].mxu0 }
 0x18a   : > { %v4082_v38 = vsub.f32 %v3382_v2, %v6781_v26  ;;  %v4989_v22 = vpop.f32.mrb[39].mxu0 }
 0x18b   : > { %v3455_v4 = vpop.f32.mrb[38].mxu1 }
 0x18c   : > { %v4083_v10 = vsub.f32 %v3455_v4, %v6783_v17  ;;  %v5000_v16 = vpop.f32.mrb[39].mxu1  ;;  %v4098_v13 = vsub.f32 %v4082_v38, %v6843_v52 }
 0x18e   : > { %v4099_v0 = vsub.f32 %v4083_v10, %v6847_v33  ;;  %4114 = vst.msk [vmem:[%s6908_s14 + $0xc] sm:$0x3] %vm4059_vm2, %v4098_v13 }
 0x190   : > { %4115 = vst.msk [vmem:[%s6908_s14 + $0xe] sm:$0x3] %vm4059_vm2, %v4099_v0 }
 0x191   : > { %v3528_v18 = vpop.f32.mrb[40].mxu0 }
 0x192   : > { %v4084_v34 = vsub.f32 %v3528_v18, %v6785_v47  ;;  %v5011_v26 = vpop.f32.mrb[41].mxu0 }
 0x193   : > { %v3601_v7 = vpop.f32.mrb[40].mxu1 }
 0x194   : > { %v4085_v58 = vsub.f32 %v3601_v7, %v6787_v35  ;;  %v5022_v30 = vpop.f32.mrb[41].mxu1  ;;  %v4100_v17 = vsub.f32 %v4084_v34, %v6855_v3 }
 0x196   : > { %v4101_v52 = vsub.f32 %v4085_v58, %v6859_v44  ;;  %4116 = vst.msk [vmem:[%s6908_s14 + $0x10] sm:$0x3] %vm4059_vm2, %v4100_v17 }
 0x198   : > { %4117 = vst.msk [vmem:[%s6908_s14 + $0x12] sm:$0x3] %vm4059_vm2, %v4101_v52 }
 0x199   : > { %v3674_v33 = vpop.f32.mrb[42].mxu0 }
 0x19a   : > { %v4086_v5 = vsub.f32 %v3674_v33, %v6789_v45  ;;  %v5033_v47 = vpop.f32.mrb[43].mxu0 }
 0x19b   : > { %v3747_v48 = vpop.f32.mrb[42].mxu1 }
 0x19c   : > { %v4087_v24 = vsub.f32 %v3747_v48, %v6791_v43  ;;  %v5044_v57 = vpop.f32.mrb[43].mxu1  ;;  %v4102_v35 = vsub.f32 %v4086_v5, %v6867_v15 }
 0x19e   : > { %v4103_v3 = vsub.f32 %v4087_v24, %v6871_v20  ;;  %4118 = vst.msk [vmem:[%s6908_s14 + $0x14] sm:$0x3] %vm4059_vm2, %v4102_v35 }
 0x1a0   : > { %4119 = vst.msk [vmem:[%s6908_s14 + $0x16] sm:$0x3] %vm4059_vm2, %v4103_v3 }
 0x1a1   : > { %v3820_v44 = vpop.f32.mrb[44].mxu0 }
 0x1a2   : > { %v4088_v14 = vsub.f32 %v3820_v44, %v6793_v54  ;;  %v5055_v45 = vpop.f32.mrb[45].mxu0 }
 0x1a3   : > { %v3893_v28 = vpop.f32.mrb[44].mxu1 }
 0x1a4   : > { %v4089_v55 = vsub.f32 %v3893_v28, %v6795_v9  ;;  %v5066_v27 = vpop.f32.mrb[45].mxu1  ;;  %v4104_v43 = vsub.f32 %v4088_v14, %v6879_v56 }
 0x1a6   : > { %v4105_v15 = vsub.f32 %v4089_v55, %v6883_v62  ;;  %4120 = vst.msk [vmem:[%s6908_s14 + $0x18] sm:$0x3] %vm4059_vm2, %v4104_v43 }
 0x1a8   : > { %4121 = vst.msk [vmem:[%s6908_s14 + $0x1a] sm:$0x3] %vm4059_vm2, %v4105_v15 }
 0x1a9   : > { %v3966_v20 = vpop.f32.mrb[46].mxu0 }
 0x1aa   : > { %v4090_v6 = vsub.f32 %v3966_v20, %v6797_v51  ;;  %v5077_v54 = vpop.f32.mrb[47].mxu0 }
 0x1ab   : > { %v4039_v40 = vpop.f32.mrb[46].mxu1 }
 0x1ac   : > { %v4091_v21 = vsub.f32 %v4039_v40, %v6799_v25  ;;  %v5088_v41 = vpop.f32.mrb[47].mxu1  ;;  %v4106_v11 = vsub.f32 %v4090_v6, %v6891_v19 }
 0x1ae   : > { %v4107_v9 = vsub.f32 %v4091_v21, %v6895_v61  ;;  %4122 = vst.msk [vmem:[%s6908_s14 + $0x1c] sm:$0x3] %vm4059_vm2, %v4106_v11 }
 0x1b0   : > { %4123 = vst.msk [vmem:[%s6908_s14 + $0x1e] sm:$0x3] %vm4059_vm2, %v4107_v9 }
 0x1b1 PF: > { %s16_s18 = sadd.s32 1, %s5394_s18  }
 0x1b2   : > { %p13_p4 = scmp.ge.s32.totalorder %s16_s18, 4  }
 0x1b4   :  { %15 = sbr.rel (!%p13_p4) target bundleno = 1 (0x1), region = 87 }

// kernel: fno_block2d_forward.12
= control target key start
LH: loop header
LB: loop body
LE: loop exit
PB: predicated region body
PF: predicated region fallthrough
CT: control target
= control target key end

     0   :  { %s834_s15 = smov 0   ;;  %s1052_s0 = inlined_call_operand.vmem [shape: f32[512,32], index: 0, kind: input, shape index: {}]   ;;  %s1053_s1 = inlined_call_operand.vmem [shape: f32[512,32], index: 1, kind: input, shape index: {}]   ;;  %s1054_s2 = inlined_call_operand.vmem [shape: bf16[32,32], index: 2, kind: input, shape index: {}]   ;;  %s1055_s3 = inlined_call_operand.vmem [shape: f32[1,32], index: 3, kind: input, shape index: {}]   ;;  %s1056_s4 = inlined_call_operand.vmem [shape: f32[512,32], index: 4, kind: output, shape index: {}]  }
   0x1 LB: > { %s701_s16 = sadd.s32 4294967295, %s807_s15   ;;  %p705_p0 = scmp.ge.s32.totalorder %s807_s15, 1  ;;  %s807_s15 = sphi %s834_s15, %s14_s15  }
   0x2   : > { %p174_p1 = scmp.lt.s32.totalorder %s807_s15, 3 }
   0x4   : > { %p175_p2 = pnand %p705_p0, %p174_p1 }
   0x5   : > { %v799_v0 = vld [vmem:[%s1054_s2] sm:$0xff] (!%p175_p2)   ;;  %s706_s19 = sshll.u32 (!%p175_p2), %s701_s16, 5  ;;  %v800_v1 = vld [vmem:[%s1054_s2 + $0x8] sm:$0xff] (!%p175_p2)   ;;  %vm295_vm0 = vcmask (!%p175_p2), 261120  }
   0x6   : > { %178 = sbr.rel (%p175_p2) target bundleno = 267 (0x10b), region = 36  ;;  %p206_p3 = scmp.lt.s32.totalorder (!%p175_p2), %s706_s19, 63  ;;  %751 = vmatprep.subr.bf16.mxu0 (!%p175_p2), %v799_v0  ;;  %787 = vmatprep.subr.bf16.mxu1 (!%p175_p2), %v799_v0  ;;  %v913_v50 = vld [vmem:[%s1055_s3] ss:$0 sm:$0xff] (!%p175_p2) }
   0x7   : > { %752 = vmatpush3.bf16.msra.mxu0 (!%p175_p2), %v799_v0  ;;  %789 = vmatpush3.bf16.msra.mxu1 (!%p175_p2), %v799_v0 }
   0x8   : > { %753 = vmatprep.subr.bf16.mxu0 (!%p175_p2), %v800_v1  ;;  %788 = vmatprep.subr.bf16.mxu1 (!%p175_p2), %v800_v1 }
   0xb   : > { %754 = vmatpush3.bf16.msra.mxu0 (!%p175_p2), %v800_v1  ;;  %790 = vmatpush3.bf16.msra.mxu1 (!%p175_p2), %v800_v1 }
   0xd   : > { %s1058_s19 = smov (!%p206_p3, %s706_s19), 63 }
   0xe   : > { %s848_s22 = sshll.u32 %s1058_s19, 3 }
   0xf   : > { %s854_s25 = scalar_lea.vmem %s1053_s1, %s848_s22  ;;  %s908_s28 = scalar_lea.vmem %s1052_s0, %s848_s22 }
  0x10   : > { %v224_v2 = vld [vmem:[%s854_s25] sm:$0xff]  ;;  %v225_v3 = vld [vmem:[%s854_s25 + $0x8] sm:$0xff]  ;;  %v226_v7 = vld [vmem:[%s854_s25 + $0x10] sm:$0xff]  ;;  %s931_s7 = scalar_lea.vmem %s1056_s4, %s848_s22 }
  0x11   : > { %v240_v4 = vld [vmem:[%s854_s25 + $0x80] sm:$0xff]  ;;  %v256_v5 = vpack.c.bf16 %v225_v3, %v224_v2  ;;  %v241_v6 = vld [vmem:[%s854_s25 + $0x88] sm:$0xff]  ;;  %v227_v8 = vld [vmem:[%s854_s25 + $0x18] sm:$0xff] }
  0x12   : > { %v264_v9 = vpack.c.bf16 %v241_v6, %v240_v4  ;;  %v257_v10 = vpack.c.bf16 %v227_v8, %v226_v7  ;;  %v242_v11 = vld [vmem:[%s854_s25 + $0x90] sm:$0xff]  ;;  %v243_v12 = vld [vmem:[%s854_s25 + $0x98] sm:$0xff]  ;;  %v228_v13 = vld [vmem:[%s854_s25 + $0x20] sm:$0xff] }
  0x13   : > { %755 = vmatprep.mubr.msk.bf16.mxu0 %vm295_vm0, %v256_v5  ;;  %v265_v14 = vpack.c.bf16 %v243_v12, %v242_v11  ;;  %v229_v15 = vld [vmem:[%s854_s25 + $0x28] sm:$0xff]  ;;  %v244_v16 = vld [vmem:[%s854_s25 + $0xa0] sm:$0xff]  ;;  %v230_v20 = vld [vmem:[%s854_s25 + $0x30] sm:$0xff] }
  0x14   : > { %v245_v17 = vld [vmem:[%s854_s25 + $0xa8] sm:$0xff]  ;;  %771 = vmatprep.mubr.msk.bf16.mxu1 %vm295_vm0, %v264_v9  ;;  %756 = vmatmul.mubr.msk.bf16.vlgmr.msra.gmra.mrb[0].mxu0 %vm295_vm0, %v257_v10  ;;  %v258_v18 = vpack.c.bf16 %v229_v15, %v228_v13  ;;  %v231_v21 = vld [vmem:[%s854_s25 + $0x38] sm:$0xff]  ;;  %v246_v22 = vld [vmem:[%s854_s25 + $0xb0] sm:$0xff] }
  0x15   : > { %v266_v19 = vpack.c.bf16 %v245_v17, %v244_v16  ;;  %772 = vmatmul.mubr.msk.bf16.vlgmr.msra.gmra.mrb[0].mxu1 %vm295_vm0, %v265_v14  ;;  %v247_v23 = vld [vmem:[%s854_s25 + $0xb8] sm:$0xff]  ;;  %v232_v24 = vld [vmem:[%s854_s25 + $0x40] sm:$0xff]  ;;  %v233_v25 = vld [vmem:[%s854_s25 + $0x48] sm:$0xff]  ;;  %v259_v28 = vpack.c.bf16 %v231_v21, %v230_v20 }
  0x16   : > { %759 = vmatprep.mubr.msk.bf16.mxu0 %vm295_vm0, %v258_v18  ;;  %v248_v26 = vld [vmem:[%s854_s25 + $0xc0] sm:$0xff]  ;;  %v249_v27 = vld [vmem:[%s854_s25 + $0xc8] sm:$0xff]  ;;  %v267_v29 = vpack.c.bf16 %v247_v23, %v246_v22  ;;  %v260_v30 = vpack.c.bf16 %v233_v25, %v232_v24  ;;  %v234_v32 = vld [vmem:[%s854_s25 + $0x50] sm:$0xff] }
  0x17   : > { %775 = vmatprep.mubr.msk.bf16.mxu1 %vm295_vm0, %v266_v19  ;;  %v268_v31 = vpack.c.bf16 %v249_v27, %v248_v26  ;;  %v235_v33 = vld [vmem:[%s854_s25 + $0x58] sm:$0xff]  ;;  %v250_v34 = vld [vmem:[%s854_s25 + $0xd0] sm:$0xff]  ;;  %v236_v36 = vld [vmem:[%s854_s25 + $0x60] sm:$0xff] }
  0x18   : > { %v251_v35 = vld [vmem:[%s854_s25 + $0xd8] sm:$0xff]  ;;  %v237_v37 = vld [vmem:[%s854_s25 + $0x68] sm:$0xff]  ;;  %v252_v38 = vld [vmem:[%s854_s25 + $0xe0] sm:$0xff]  ;;  %v261_v40 = vpack.c.bf16 %v235_v33, %v234_v32 }
  0x19   : > { %v253_v39 = vld [vmem:[%s854_s25 + $0xe8] sm:$0xff]  ;;  %v269_v41 = vpack.c.bf16 %v251_v35, %v250_v34  ;;  %v262_v42 = vpack.c.bf16 %v237_v37, %v236_v36  ;;  %v238_v44 = vld [vmem:[%s854_s25 + $0x70] sm:$0xff]  ;;  %v239_v45 = vld [vmem:[%s854_s25 + $0x78] sm:$0xff] }
  0x1a   : > { %v270_v43 = vpack.c.bf16 %v253_v39, %v252_v38  ;;  %v254_v46 = vld [vmem:[%s854_s25 + $0xf0] sm:$0xff]  ;;  %v255_v47 = vld [vmem:[%s854_s25 + $0xf8] sm:$0xff]  ;;  %v263_v48 = vpack.c.bf16 %v239_v45, %v238_v44  ;;  %v505_v57 = vld [vmem:[%s908_s28] sm:$0xff] }
  0x1b   : > { %v271_v49 = vpack.c.bf16 %v255_v47, %v254_v46  ;;  %v507_v52 = vld [vmem:[%s908_s28 + $0x10] sm:$0xff]  ;;  %v521_v61 = vld [vmem:[%s908_s28 + $0x80] sm:$0xff]  ;;  %v508_v63 = vld [vmem:[%s908_s28 + $0x18] sm:$0xff] }
  0x1c   : > { %760 = vmatmul.mubr.msk.bf16.gmra.mrb[4].mxu0 %vm295_vm0, %v259_v28  ;;  %v523_v55 = vld [vmem:[%s908_s28 + $0x90] sm:$0xff]  ;;  %v524_v4 = vld [vmem:[%s908_s28 + $0x98] sm:$0xff]  ;;  %v506_v6 = vld [vmem:[%s908_s28 + $0x8] sm:$0xff] }
  0x1d   : > { %776 = vmatmul.mubr.msk.bf16.gmra.mrb[4].mxu1 %vm295_vm0, %v267_v29  ;;  %763 = vmatprep.mubr.msk.bf16.mxu0 %vm295_vm0, %v260_v30  ;;  %v522_v12 = vld [vmem:[%s908_s28 + $0x88] sm:$0xff]  ;;  %v511_v27 = vld [vmem:[%s908_s28 + $0x30] sm:$0xff]  ;;  %v509_v33 = vld [vmem:[%s908_s28 + $0x20] sm:$0xff] }
  0x1e   : > { %779 = vmatprep.mubr.msk.bf16.mxu1 %vm295_vm0, %v268_v31  ;;  %v527_v31 = vld [vmem:[%s908_s28 + $0xb0] sm:$0xff]  ;;  %v525_v37 = vld [vmem:[%s908_s28 + $0xa0] sm:$0xff]  ;;  %v512_v39 = vld [vmem:[%s908_s28 + $0x38] sm:$0xff] }
  0x1f   : > { %v528_v44 = vld [vmem:[%s908_s28 + $0xb8] sm:$0xff]  ;;  %v510_v46 = vld [vmem:[%s908_s28 + $0x28] sm:$0xff] }
  0x24   : > { %764 = vmatmul.mubr.msk.bf16.gmra.mrb[8].mxu0 %vm295_vm0, %v261_v40 }
  0x25   : > { %780 = vmatmul.mubr.msk.bf16.gmra.mrb[8].mxu1 %vm295_vm0, %v269_v41  ;;  %767 = vmatprep.mubr.msk.bf16.mxu0 %vm295_vm0, %v262_v42 }
  0x26   : > { %783 = vmatprep.mubr.msk.bf16.mxu1 %vm295_vm0, %v270_v43 }
  0x2c   : > { %768 = vmatmul.mubr.msk.bf16.gmra.mrb[12].mxu0 %vm295_vm0, %v263_v48 }
  0x2d   : > { %784 = vmatmul.mubr.msk.bf16.gmra.mrb[12].mxu1 %vm295_vm0, %v271_v49 }
  0xe7   : > { %v757_v51 = vpop.f32.mrb[0].mxu0 }
  0xe8   : > { %v387_v53 = vadd.f32 %v757_v51, %v913_v50  ;;  %v773_v54 = vpop.f32.mrb[0].mxu1  ;;  %v378_v56 = vpop.f32.mrb[1].mxu0 }
  0xe9   : > { %v451_v58 = vadd.f32 %v773_v54, %v913_v50  ;;  %v379_v59 = vadd.f32 %v913_v50, %v378_v56  ;;  %v442_v60 = vpop.f32.mrb[1].mxu1  ;;  %v758_v62 = vpop.f32.mrb[2].mxu0 }
  0xea   : > { %v539_v0 = vadd.f32 %v507_v52, %v387_v53  ;;  %v443_v1 = vadd.f32 %v913_v50, %v442_v60  ;;  %v390_v2 = vadd.f32 %v758_v62, %v913_v50  ;;  %v774_v3 = vpop.f32.mrb[2].mxu1  ;;  %v381_v5 = vpop.f32.mrb[3].mxu0  ;;  %v526_v53 = vld [vmem:[%s908_s28 + $0xa8] sm:$0xff] }
  0xeb   : > { %v555_v7 = vadd.f32 %v523_v55, %v451_v58  ;;  %v537_v8 = vadd.f32 %v505_v57, %v379_v59  ;;  %v454_v9 = vadd.f32 %v774_v3, %v913_v50  ;;  %v382_v10 = vadd.f32 %v913_v50, %v381_v5  ;;  %v445_v11 = vpop.f32.mrb[3].mxu1 }
  0xec   : > { %v571_v13 = vmax.f32 %v539_v0, 0.0  ;;  %v553_v14 = vadd.f32 %v521_v61, %v443_v1  ;;  %v540_v15 = vadd.f32 %v508_v63, %v390_v2  ;;  %v446_v16 = vadd.f32 %v913_v50, %v445_v11 }
  0xed   : > { %v587_v17 = vmax.f32 %v555_v7, 0.0  ;;  %v569_v18 = vmax.f32 %v537_v8, 0.0  ;;  %v556_v19 = vadd.f32 %v524_v4, %v454_v9  ;;  %v538_v20 = vadd.f32 %v506_v6, %v382_v10  ;;  %v515_v4 = vld [vmem:[%s908_s28 + $0x50] sm:$0xff]  ;;  %v513_v10 = vld [vmem:[%s908_s28 + $0x40] sm:$0xff] }
  0xee   : > { %603 = vst.msk [vmem:[%s931_s7 + $0x10] sm:$0xff] %vm295_vm0, %v571_v13  ;;  %v585_v21 = vmax.f32 %v553_v14, 0.0  ;;  %v572_v22 = vmax.f32 %v540_v15, 0.0  ;;  %v554_v23 = vadd.f32 %v522_v12, %v446_v16  ;;  %v531_v8 = vld [vmem:[%s908_s28 + $0xd0] sm:$0xff]  ;;  %v529_v14 = vld [vmem:[%s908_s28 + $0xc0] sm:$0xff]  ;;  %v516_v16 = vld [vmem:[%s908_s28 + $0x58] sm:$0xff] }
  0xef   : > { %619 = vst.msk [vmem:[%s931_s7 + $0x90] sm:$0xff] %vm295_vm0, %v587_v17  ;;  %601 = vst.msk [vmem:[%s931_s7] sm:$0xff] %vm295_vm0, %v569_v18  ;;  %v588_v24 = vmax.f32 %v556_v19, 0.0  ;;  %v570_v25 = vmax.f32 %v538_v20, 0.0  ;;  %v761_v26 = vpop.f32.mrb[4].mxu0 }
  0xf0   : > { %617 = vst.msk [vmem:[%s931_s7 + $0x80] sm:$0xff] %vm295_vm0, %v585_v21  ;;  %604 = vst.msk [vmem:[%s931_s7 + $0x18] sm:$0xff] %vm295_vm0, %v572_v22  ;;  %v586_v28 = vmax.f32 %v554_v23, 0.0  ;;  %v403_v29 = vadd.f32 %v761_v26, %v913_v50  ;;  %v777_v30 = vpop.f32.mrb[4].mxu1  ;;  %v394_v32 = vpop.f32.mrb[5].mxu0  ;;  %v532_v21 = vld [vmem:[%s908_s28 + $0xd8] sm:$0xff] }
  0xf1   : > { %620 = vst.msk [vmem:[%s931_s7 + $0x98] sm:$0xff] %vm295_vm0, %v588_v24  ;;  %602 = vst.msk [vmem:[%s931_s7 + $0x8] sm:$0xff] %vm295_vm0, %v570_v25  ;;  %v467_v34 = vadd.f32 %v777_v30, %v913_v50  ;;  %v395_v35 = vadd.f32 %v913_v50, %v394_v32  ;;  %v458_v36 = vpop.f32.mrb[5].mxu1  ;;  %v762_v38 = vpop.f32.mrb[6].mxu0  ;;  %v514_v23 = vld [vmem:[%s908_s28 + $0x48] sm:$0xff] }
  0xf2   : > { %618 = vst.msk [vmem:[%s931_s7 + $0x88] sm:$0xff] %vm295_vm0, %v586_v28  ;;  %v543_v40 = vadd.f32 %v511_v27, %v403_v29  ;;  %v459_v41 = vadd.f32 %v913_v50, %v458_v36  ;;  %v406_v42 = vadd.f32 %v762_v38, %v913_v50  ;;  %v778_v43 = vpop.f32.mrb[6].mxu1  ;;  %v397_v45 = vpop.f32.mrb[7].mxu0  ;;  %v530_v29 = vld [vmem:[%s908_s28 + $0xc8] sm:$0xff] }
  0xf3   : > { %v559_v47 = vadd.f32 %v527_v31, %v467_v34  ;;  %v541_v48 = vadd.f32 %v509_v33, %v395_v35  ;;  %v470_v49 = vadd.f32 %v778_v43, %v913_v50  ;;  %v398_v51 = vadd.f32 %v913_v50, %v397_v45  ;;  %v461_v52 = vpop.f32.mrb[7].mxu1 }
  0xf4   : > { %v575_v54 = vmax.f32 %v543_v40, 0.0  ;;  %v557_v55 = vadd.f32 %v525_v37, %v459_v41  ;;  %v544_v56 = vadd.f32 %v512_v39, %v406_v42  ;;  %v462_v57 = vadd.f32 %v913_v50, %v461_v52 }
  0xf5   : > { %v591_v58 = vmax.f32 %v559_v47, 0.0  ;;  %v573_v59 = vmax.f32 %v541_v48, 0.0  ;;  %v560_v60 = vadd.f32 %v528_v44, %v470_v49  ;;  %v542_v61 = vadd.f32 %v510_v46, %v398_v51  ;;  %v519_v44 = vld [vmem:[%s908_s28 + $0x70] sm:$0xff]  ;;  %v517_v51 = vld [vmem:[%s908_s28 + $0x60] sm:$0xff] }
  0xf6   : > { %607 = vst.msk [vmem:[%s931_s7 + $0x30] sm:$0xff] %vm295_vm0, %v575_v54  ;;  %v589_v62 = vmax.f32 %v557_v55, 0.0  ;;  %v576_v63 = vmax.f32 %v544_v56, 0.0  ;;  %v558_v0 = vadd.f32 %v526_v53, %v462_v57  ;;  %v535_v48 = vld [vmem:[%s908_s28 + $0xf0] sm:$0xff]  ;;  %v533_v55 = vld [vmem:[%s908_s28 + $0xe0] sm:$0xff]  ;;  %v520_v57 = vld [vmem:[%s908_s28 + $0x78] sm:$0xff] }
  0xf7   : > { %623 = vst.msk [vmem:[%s931_s7 + $0xb0] sm:$0xff] %vm295_vm0, %v591_v58  ;;  %605 = vst.msk [vmem:[%s931_s7 + $0x20] sm:$0xff] %vm295_vm0, %v573_v59  ;;  %v592_v1 = vmax.f32 %v560_v60, 0.0  ;;  %v574_v2 = vmax.f32 %v542_v61, 0.0  ;;  %v765_v3 = vpop.f32.mrb[8].mxu0 }
  0xf8   : > { %621 = vst.msk [vmem:[%s931_s7 + $0xa0] sm:$0xff] %vm295_vm0, %v589_v62  ;;  %608 = vst.msk [vmem:[%s931_s7 + $0x38] sm:$0xff] %vm295_vm0, %v576_v63  ;;  %v590_v5 = vmax.f32 %v558_v0, 0.0  ;;  %v419_v6 = vadd.f32 %v765_v3, %v913_v50  ;;  %v781_v7 = vpop.f32.mrb[8].mxu1  ;;  %v410_v9 = vpop.f32.mrb[9].mxu0  ;;  %v536_v62 = vld [vmem:[%s908_s28 + $0xf8] sm:$0xff] }
  0xf9   : > { %624 = vst.msk [vmem:[%s931_s7 + $0xb8] sm:$0xff] %vm295_vm0, %v592_v1  ;;  %606 = vst.msk [vmem:[%s931_s7 + $0x28] sm:$0xff] %vm295_vm0, %v574_v2  ;;  %v483_v11 = vadd.f32 %v781_v7, %v913_v50  ;;  %v411_v12 = vadd.f32 %v913_v50, %v410_v9  ;;  %v474_v13 = vpop.f32.mrb[9].mxu1  ;;  %v766_v15 = vpop.f32.mrb[10].mxu0  ;;  %v518_v0 = vld [vmem:[%s908_s28 + $0x68] sm:$0xff] }
  0xfa   : > { %622 = vst.msk [vmem:[%s931_s7 + $0xa8] sm:$0xff] %vm295_vm0, %v590_v5  ;;  %v547_v17 = vadd.f32 %v515_v4, %v419_v6  ;;  %v475_v18 = vadd.f32 %v913_v50, %v474_v13  ;;  %v422_v19 = vadd.f32 %v766_v15, %v913_v50  ;;  %v782_v20 = vpop.f32.mrb[10].mxu1  ;;  %v413_v22 = vpop.f32.mrb[11].mxu0  ;;  %v534_v6 = vld [vmem:[%s908_s28 + $0xe8] sm:$0xff] }
  0xfb   : > { %v563_v24 = vadd.f32 %v531_v8, %v483_v11  ;;  %v545_v25 = vadd.f32 %v513_v10, %v411_v12  ;;  %v486_v26 = vadd.f32 %v782_v20, %v913_v50  ;;  %v414_v27 = vadd.f32 %v913_v50, %v413_v22  ;;  %v477_v28 = vpop.f32.mrb[11].mxu1 }
  0xfc   : > { %v579_v30 = vmax.f32 %v547_v17, 0.0  ;;  %v561_v31 = vadd.f32 %v529_v14, %v475_v18  ;;  %v548_v32 = vadd.f32 %v516_v16, %v422_v19  ;;  %v478_v33 = vadd.f32 %v913_v50, %v477_v28 }
  0xfd   : > { %v595_v34 = vmax.f32 %v563_v24, 0.0  ;;  %v577_v35 = vmax.f32 %v545_v25, 0.0  ;;  %v564_v36 = vadd.f32 %v532_v21, %v486_v26  ;;  %v546_v37 = vadd.f32 %v514_v23, %v414_v27 }
  0xfe   : > { %611 = vst.msk [vmem:[%s931_s7 + $0x50] sm:$0xff] %vm295_vm0, %v579_v30  ;;  %v593_v38 = vmax.f32 %v561_v31, 0.0  ;;  %v580_v39 = vmax.f32 %v548_v32, 0.0  ;;  %v562_v40 = vadd.f32 %v530_v29, %v478_v33 }
  0xff   : > { %627 = vst.msk [vmem:[%s931_s7 + $0xd0] sm:$0xff] %vm295_vm0, %v595_v34  ;;  %609 = vst.msk [vmem:[%s931_s7 + $0x40] sm:$0xff] %vm295_vm0, %v577_v35  ;;  %v596_v41 = vmax.f32 %v564_v36, 0.0  ;;  %v578_v42 = vmax.f32 %v546_v37, 0.0  ;;  %v769_v43 = vpop.f32.mrb[12].mxu0 }
 0x100   : > { %625 = vst.msk [vmem:[%s931_s7 + $0xc0] sm:$0xff] %vm295_vm0, %v593_v38  ;;  %612 = vst.msk [vmem:[%s931_s7 + $0x58] sm:$0xff] %vm295_vm0, %v580_v39  ;;  %v594_v45 = vmax.f32 %v562_v40, 0.0  ;;  %v435_v46 = vadd.f32 %v769_v43, %v913_v50  ;;  %v785_v47 = vpop.f32.mrb[12].mxu1  ;;  %v426_v49 = vpop.f32.mrb[13].mxu0 }
 0x101   : > { %628 = vst.msk [vmem:[%s931_s7 + $0xd8] sm:$0xff] %vm295_vm0, %v596_v41  ;;  %610 = vst.msk [vmem:[%s931_s7 + $0x48] sm:$0xff] %vm295_vm0, %v578_v42  ;;  %v499_v52 = vadd.f32 %v785_v47, %v913_v50  ;;  %v427_v53 = vadd.f32 %v913_v50, %v426_v49  ;;  %v490_v54 = vpop.f32.mrb[13].mxu1  ;;  %v770_v56 = vpop.f32.mrb[14].mxu0 }
 0x102   : > { %626 = vst.msk [vmem:[%s931_s7 + $0xc8] sm:$0xff] %vm295_vm0, %v594_v45  ;;  %v551_v58 = vadd.f32 %v519_v44, %v435_v46  ;;  %v491_v59 = vadd.f32 %v913_v50, %v490_v54  ;;  %v438_v60 = vadd.f32 %v770_v56, %v913_v50  ;;  %v786_v61 = vpop.f32.mrb[14].mxu1  ;;  %v429_v63 = vpop.f32.mrb[15].mxu0 }
 0x103   : > { %v567_v1 = vadd.f32 %v535_v48, %v499_v52  ;;  %v549_v2 = vadd.f32 %v517_v51, %v427_v53  ;;  %v502_v3 = vadd.f32 %v786_v61, %v913_v50  ;;  %v430_v4 = vadd.f32 %v913_v50, %v429_v63  ;;  %v493_v5 = vpop.f32.mrb[15].mxu1 }
 0x104   : > { %v583_v7 = vmax.f32 %v551_v58, 0.0  ;;  %v565_v8 = vadd.f32 %v533_v55, %v491_v59  ;;  %v552_v9 = vadd.f32 %v520_v57, %v438_v60  ;;  %v494_v10 = vadd.f32 %v913_v50, %v493_v5 }
 0x105   : > { %v599_v11 = vmax.f32 %v567_v1, 0.0  ;;  %v581_v12 = vmax.f32 %v549_v2, 0.0  ;;  %v568_v13 = vadd.f32 %v536_v62, %v502_v3  ;;  %v550_v14 = vadd.f32 %v518_v0, %v430_v4 }
 0x106   : > { %615 = vst.msk [vmem:[%s931_s7 + $0x70] sm:$0xff] %vm295_vm0, %v583_v7  ;;  %v597_v15 = vmax.f32 %v565_v8, 0.0  ;;  %v584_v16 = vmax.f32 %v552_v9, 0.0  ;;  %v566_v17 = vadd.f32 %v534_v6, %v494_v10 }
 0x107   : > { %631 = vst.msk [vmem:[%s931_s7 + $0xf0] sm:$0xff] %vm295_vm0, %v599_v11  ;;  %613 = vst.msk [vmem:[%s931_s7 + $0x60] sm:$0xff] %vm295_vm0, %v581_v12  ;;  %v600_v18 = vmax.f32 %v568_v13, 0.0  ;;  %v582_v19 = vmax.f32 %v550_v14, 0.0 }
 0x108   : > { %629 = vst.msk [vmem:[%s931_s7 + $0xe0] sm:$0xff] %vm295_vm0, %v597_v15  ;;  %616 = vst.msk [vmem:[%s931_s7 + $0x78] sm:$0xff] %vm295_vm0, %v584_v16  ;;  %v598_v50 = vmax.f32 %v566_v17, 0.0 }
 0x109   : > { %632 = vst.msk [vmem:[%s931_s7 + $0xf8] sm:$0xff] %vm295_vm0, %v600_v18  ;;  %614 = vst.msk [vmem:[%s931_s7 + $0x68] sm:$0xff] %vm295_vm0, %v582_v19 }
 0x10a   : > { %630 = vst.msk [vmem:[%s931_s7 + $0xe8] sm:$0xff] %vm295_vm0, %v598_v50 }
 0x10b PF: > { %s14_s15 = sadd.s32 1, %s807_s15  }
 0x10c   : > { %p11_p4 = scmp.ge.s32.totalorder %s14_s15, 4  }
 0x10e   :  { %13 = sbr.rel (!%p11_p4) target bundleno = 1 (0x1), region = 69 }

// kernel: fno_block2d_forward.18
= control target key start
LH: loop header
LB: loop body
LE: loop exit
PB: predicated region body
PF: predicated region fallthrough
CT: control target
= control target key end

     0   :  { %s802_s15 = smov 0   ;;  %s1020_s0 = inlined_call_operand.vmem [shape: f32[512,32], index: 0, kind: input, shape index: {}]   ;;  %s1021_s1 = inlined_call_operand.vmem [shape: f32[512,32], index: 1, kind: input, shape index: {}]   ;;  %s1022_s2 = inlined_call_operand.vmem [shape: bf16[32,32], index: 2, kind: input, shape index: {}]   ;;  %s1023_s3 = inlined_call_operand.vmem [shape: f32[1,32], index: 3, kind: input, shape index: {}]   ;;  %s1024_s4 = inlined_call_operand.vmem [shape: f32[512,32], index: 4, kind: output, shape index: {}]  }
   0x1 LB: > { %s669_s16 = sadd.s32 4294967295, %s775_s15   ;;  %p673_p0 = scmp.ge.s32.totalorder %s775_s15, 1  ;;  %s775_s15 = sphi %s802_s15, %s14_s15  }
   0x2   : > { %p174_p1 = scmp.lt.s32.totalorder %s775_s15, 3 }
   0x4   : > { %p175_p2 = pnand %p673_p0, %p174_p1 }
   0x5   : > { %v767_v0 = vld [vmem:[%s1022_s2] sm:$0xff] (!%p175_p2)   ;;  %s674_s19 = sshll.u32 (!%p175_p2), %s669_s16, 5  ;;  %v768_v1 = vld [vmem:[%s1022_s2 + $0x8] sm:$0xff] (!%p175_p2)   ;;  %vm295_vm0 = vcmask (!%p175_p2), 261120  }
   0x6   : > { %178 = sbr.rel (%p175_p2) target bundleno = 265 (0x109), region = 36  ;;  %p206_p3 = scmp.lt.s32.totalorder (!%p175_p2), %s674_s19, 63  ;;  %719 = vmatprep.subr.bf16.mxu0 (!%p175_p2), %v767_v0  ;;  %755 = vmatprep.subr.bf16.mxu1 (!%p175_p2), %v767_v0  ;;  %v881_v50 = vld [vmem:[%s1023_s3] ss:$0 sm:$0xff] (!%p175_p2) }
   0x7   : > { %720 = vmatpush3.bf16.msra.mxu0 (!%p175_p2), %v767_v0  ;;  %757 = vmatpush3.bf16.msra.mxu1 (!%p175_p2), %v767_v0 }
   0x8   : > { %721 = vmatprep.subr.bf16.mxu0 (!%p175_p2), %v768_v1  ;;  %756 = vmatprep.subr.bf16.mxu1 (!%p175_p2), %v768_v1 }
   0xb   : > { %722 = vmatpush3.bf16.msra.mxu0 (!%p175_p2), %v768_v1  ;;  %758 = vmatpush3.bf16.msra.mxu1 (!%p175_p2), %v768_v1 }
   0xd   : > { %s1026_s19 = smov (!%p206_p3, %s674_s19), 63 }
   0xe   : > { %s816_s22 = sshll.u32 %s1026_s19, 3 }
   0xf   : > { %s822_s25 = scalar_lea.vmem %s1021_s1, %s816_s22  ;;  %s876_s28 = scalar_lea.vmem %s1020_s0, %s816_s22 }
  0x10   : > { %v224_v2 = vld [vmem:[%s822_s25] sm:$0xff]  ;;  %v225_v3 = vld [vmem:[%s822_s25 + $0x8] sm:$0xff]  ;;  %v226_v7 = vld [vmem:[%s822_s25 + $0x10] sm:$0xff]  ;;  %s891_s7 = scalar_lea.vmem %s1024_s4, %s816_s22 }
  0x11   : > { %v240_v4 = vld [vmem:[%s822_s25 + $0x80] sm:$0xff]  ;;  %v256_v5 = vpack.c.bf16 %v225_v3, %v224_v2  ;;  %v241_v6 = vld [vmem:[%s822_s25 + $0x88] sm:$0xff]  ;;  %v227_v8 = vld [vmem:[%s822_s25 + $0x18] sm:$0xff] }
  0x12   : > { %v264_v9 = vpack.c.bf16 %v241_v6, %v240_v4  ;;  %v257_v10 = vpack.c.bf16 %v227_v8, %v226_v7  ;;  %v242_v11 = vld [vmem:[%s822_s25 + $0x90] sm:$0xff]  ;;  %v243_v12 = vld [vmem:[%s822_s25 + $0x98] sm:$0xff]  ;;  %v228_v13 = vld [vmem:[%s822_s25 + $0x20] sm:$0xff] }
  0x13   : > { %723 = vmatprep.mubr.msk.bf16.mxu0 %vm295_vm0, %v256_v5  ;;  %v265_v14 = vpack.c.bf16 %v243_v12, %v242_v11  ;;  %v229_v15 = vld [vmem:[%s822_s25 + $0x28] sm:$0xff]  ;;  %v244_v16 = vld [vmem:[%s822_s25 + $0xa0] sm:$0xff]  ;;  %v230_v20 = vld [vmem:[%s822_s25 + $0x30] sm:$0xff] }
  0x14   : > { %v245_v17 = vld [vmem:[%s822_s25 + $0xa8] sm:$0xff]  ;;  %739 = vmatprep.mubr.msk.bf16.mxu1 %vm295_vm0, %v264_v9  ;;  %724 = vmatmul.mubr.msk.bf16.vlgmr.msra.gmra.mrb[0].mxu0 %vm295_vm0, %v257_v10  ;;  %v258_v18 = vpack.c.bf16 %v229_v15, %v228_v13  ;;  %v231_v21 = vld [vmem:[%s822_s25 + $0x38] sm:$0xff]  ;;  %v246_v22 = vld [vmem:[%s822_s25 + $0xb0] sm:$0xff] }
  0x15   : > { %v266_v19 = vpack.c.bf16 %v245_v17, %v244_v16  ;;  %740 = vmatmul.mubr.msk.bf16.vlgmr.msra.gmra.mrb[0].mxu1 %vm295_vm0, %v265_v14  ;;  %v247_v23 = vld [vmem:[%s822_s25 + $0xb8] sm:$0xff]  ;;  %v232_v24 = vld [vmem:[%s822_s25 + $0x40] sm:$0xff]  ;;  %v233_v25 = vld [vmem:[%s822_s25 + $0x48] sm:$0xff]  ;;  %v259_v28 = vpack.c.bf16 %v231_v21, %v230_v20 }
  0x16   : > { %727 = vmatprep.mubr.msk.bf16.mxu0 %vm295_vm0, %v258_v18  ;;  %v248_v26 = vld [vmem:[%s822_s25 + $0xc0] sm:$0xff]  ;;  %v249_v27 = vld [vmem:[%s822_s25 + $0xc8] sm:$0xff]  ;;  %v267_v29 = vpack.c.bf16 %v247_v23, %v246_v22  ;;  %v260_v30 = vpack.c.bf16 %v233_v25, %v232_v24  ;;  %v234_v32 = vld [vmem:[%s822_s25 + $0x50] sm:$0xff] }
  0x17   : > { %743 = vmatprep.mubr.msk.bf16.mxu1 %vm295_vm0, %v266_v19  ;;  %v268_v31 = vpack.c.bf16 %v249_v27, %v248_v26  ;;  %v235_v33 = vld [vmem:[%s822_s25 + $0x58] sm:$0xff]  ;;  %v250_v34 = vld [vmem:[%s822_s25 + $0xd0] sm:$0xff]  ;;  %v236_v36 = vld [vmem:[%s822_s25 + $0x60] sm:$0xff] }
  0x18   : > { %v251_v35 = vld [vmem:[%s822_s25 + $0xd8] sm:$0xff]  ;;  %v237_v37 = vld [vmem:[%s822_s25 + $0x68] sm:$0xff]  ;;  %v252_v38 = vld [vmem:[%s822_s25 + $0xe0] sm:$0xff]  ;;  %v261_v40 = vpack.c.bf16 %v235_v33, %v234_v32 }
  0x19   : > { %v253_v39 = vld [vmem:[%s822_s25 + $0xe8] sm:$0xff]  ;;  %v269_v41 = vpack.c.bf16 %v251_v35, %v250_v34  ;;  %v262_v42 = vpack.c.bf16 %v237_v37, %v236_v36  ;;  %v238_v44 = vld [vmem:[%s822_s25 + $0x70] sm:$0xff]  ;;  %v239_v45 = vld [vmem:[%s822_s25 + $0x78] sm:$0xff] }
  0x1a   : > { %v270_v43 = vpack.c.bf16 %v253_v39, %v252_v38  ;;  %v254_v46 = vld [vmem:[%s822_s25 + $0xf0] sm:$0xff]  ;;  %v255_v47 = vld [vmem:[%s822_s25 + $0xf8] sm:$0xff]  ;;  %v263_v48 = vpack.c.bf16 %v239_v45, %v238_v44  ;;  %v505_v57 = vld [vmem:[%s876_s28] sm:$0xff] }
  0x1b   : > { %v271_v49 = vpack.c.bf16 %v255_v47, %v254_v46  ;;  %v507_v52 = vld [vmem:[%s876_s28 + $0x10] sm:$0xff]  ;;  %v521_v61 = vld [vmem:[%s876_s28 + $0x80] sm:$0xff]  ;;  %v508_v63 = vld [vmem:[%s876_s28 + $0x18] sm:$0xff] }
  0x1c   : > { %728 = vmatmul.mubr.msk.bf16.gmra.mrb[4].mxu0 %vm295_vm0, %v259_v28  ;;  %v523_v55 = vld [vmem:[%s876_s28 + $0x90] sm:$0xff]  ;;  %v524_v4 = vld [vmem:[%s876_s28 + $0x98] sm:$0xff]  ;;  %v506_v6 = vld [vmem:[%s876_s28 + $0x8] sm:$0xff] }
  0x1d   : > { %744 = vmatmul.mubr.msk.bf16.gmra.mrb[4].mxu1 %vm295_vm0, %v267_v29  ;;  %731 = vmatprep.mubr.msk.bf16.mxu0 %vm295_vm0, %v260_v30  ;;  %v522_v12 = vld [vmem:[%s876_s28 + $0x88] sm:$0xff]  ;;  %v511_v20 = vld [vmem:[%s876_s28 + $0x30] sm:$0xff]  ;;  %v509_v25 = vld [vmem:[%s876_s28 + $0x20] sm:$0xff] }
  0x1e   : > { %747 = vmatprep.mubr.msk.bf16.mxu1 %vm295_vm0, %v268_v31  ;;  %v527_v23 = vld [vmem:[%s876_s28 + $0xb0] sm:$0xff]  ;;  %v525_v29 = vld [vmem:[%s876_s28 + $0xa0] sm:$0xff]  ;;  %v512_v31 = vld [vmem:[%s876_s28 + $0x38] sm:$0xff] }
  0x1f   : > { %v528_v36 = vld [vmem:[%s876_s28 + $0xb8] sm:$0xff]  ;;  %v510_v38 = vld [vmem:[%s876_s28 + $0x28] sm:$0xff] }
  0x20   : > { %v526_v44 = vld [vmem:[%s876_s28 + $0xa8] sm:$0xff] }
  0x24   : > { %732 = vmatmul.mubr.msk.bf16.gmra.mrb[8].mxu0 %vm295_vm0, %v261_v40 }
  0x25   : > { %748 = vmatmul.mubr.msk.bf16.gmra.mrb[8].mxu1 %vm295_vm0, %v269_v41  ;;  %735 = vmatprep.mubr.msk.bf16.mxu0 %vm295_vm0, %v262_v42 }
  0x26   : > { %751 = vmatprep.mubr.msk.bf16.mxu1 %vm295_vm0, %v270_v43 }
  0x2c   : > { %736 = vmatmul.mubr.msk.bf16.gmra.mrb[12].mxu0 %vm295_vm0, %v263_v48 }
  0x2d   : > { %752 = vmatmul.mubr.msk.bf16.gmra.mrb[12].mxu1 %vm295_vm0, %v271_v49 }
  0xe7   : > { %v725_v51 = vpop.f32.mrb[0].mxu0 }
  0xe8   : > { %v387_v53 = vadd.f32 %v725_v51, %v881_v50  ;;  %v741_v54 = vpop.f32.mrb[0].mxu1  ;;  %v378_v56 = vpop.f32.mrb[1].mxu0 }
  0xe9   : > { %v451_v58 = vadd.f32 %v741_v54, %v881_v50  ;;  %v379_v59 = vadd.f32 %v881_v50, %v378_v56  ;;  %v442_v60 = vpop.f32.mrb[1].mxu1  ;;  %v726_v62 = vpop.f32.mrb[2].mxu0  ;;  %v531_v56 = vld [vmem:[%s876_s28 + $0xd0] sm:$0xff] }
  0xea   : > { %v539_v0 = vadd.f32 %v507_v52, %v387_v53  ;;  %v443_v1 = vadd.f32 %v881_v50, %v442_v60  ;;  %v390_v2 = vadd.f32 %v726_v62, %v881_v50  ;;  %v742_v3 = vpop.f32.mrb[2].mxu1  ;;  %v381_v5 = vpop.f32.mrb[3].mxu0  ;;  %v515_v53 = vld [vmem:[%s876_s28 + $0x50] sm:$0xff]  ;;  %v529_v62 = vld [vmem:[%s876_s28 + $0xc0] sm:$0xff] }
  0xeb   : > { %v555_v7 = vadd.f32 %v523_v55, %v451_v58  ;;  %v537_v8 = vadd.f32 %v505_v57, %v379_v59  ;;  %v454_v9 = vadd.f32 %v742_v3, %v881_v50  ;;  %v382_v10 = vadd.f32 %v881_v50, %v381_v5  ;;  %v445_v11 = vpop.f32.mrb[3].mxu1  ;;  %v513_v58 = vld [vmem:[%s876_s28 + $0x40] sm:$0xff]  ;;  %v532_v5 = vld [vmem:[%s876_s28 + $0xd8] sm:$0xff] }
  0xec   : > { %571 = vst.msk [vmem:[%s891_s7 + $0x10] sm:$0xff] %vm295_vm0, %v539_v0  ;;  %v553_v13 = vadd.f32 %v521_v61, %v443_v1  ;;  %v540_v14 = vadd.f32 %v508_v63, %v390_v2  ;;  %v446_v15 = vadd.f32 %v881_v50, %v445_v11  ;;  %v516_v0 = vld [vmem:[%s876_s28 + $0x58] sm:$0xff] }
  0xed   : > { %587 = vst.msk [vmem:[%s891_s7 + $0x90] sm:$0xff] %vm295_vm0, %v555_v7  ;;  %569 = vst.msk [vmem:[%s891_s7] sm:$0xff] %vm295_vm0, %v537_v8  ;;  %v556_v16 = vadd.f32 %v524_v4, %v454_v9  ;;  %v538_v17 = vadd.f32 %v506_v6, %v382_v10  ;;  %v514_v7 = vld [vmem:[%s876_s28 + $0x48] sm:$0xff] }
  0xee   : > { %585 = vst.msk [vmem:[%s891_s7 + $0x80] sm:$0xff] %vm295_vm0, %v553_v13  ;;  %572 = vst.msk [vmem:[%s891_s7 + $0x18] sm:$0xff] %vm295_vm0, %v540_v14  ;;  %v554_v18 = vadd.f32 %v522_v12, %v446_v15  ;;  %v530_v13 = vld [vmem:[%s876_s28 + $0xc8] sm:$0xff] }
  0xef   : > { %588 = vst.msk [vmem:[%s891_s7 + $0x98] sm:$0xff] %vm295_vm0, %v556_v16  ;;  %570 = vst.msk [vmem:[%s891_s7 + $0x8] sm:$0xff] %vm295_vm0, %v538_v17  ;;  %v729_v19 = vpop.f32.mrb[4].mxu0 }
  0xf0   : > { %586 = vst.msk [vmem:[%s891_s7 + $0x88] sm:$0xff] %vm295_vm0, %v554_v18  ;;  %v403_v21 = vadd.f32 %v729_v19, %v881_v50  ;;  %v745_v22 = vpop.f32.mrb[4].mxu1  ;;  %v394_v24 = vpop.f32.mrb[5].mxu0 }
  0xf1   : > { %v467_v26 = vadd.f32 %v745_v22, %v881_v50  ;;  %v395_v27 = vadd.f32 %v881_v50, %v394_v24  ;;  %v458_v28 = vpop.f32.mrb[5].mxu1  ;;  %v730_v30 = vpop.f32.mrb[6].mxu0  ;;  %v535_v24 = vld [vmem:[%s876_s28 + $0xf0] sm:$0xff] }
  0xf2   : > { %v543_v32 = vadd.f32 %v511_v20, %v403_v21  ;;  %v459_v33 = vadd.f32 %v881_v50, %v458_v28  ;;  %v406_v34 = vadd.f32 %v730_v30, %v881_v50  ;;  %v746_v35 = vpop.f32.mrb[6].mxu1  ;;  %v397_v37 = vpop.f32.mrb[7].mxu0  ;;  %v519_v21 = vld [vmem:[%s876_s28 + $0x70] sm:$0xff]  ;;  %v533_v30 = vld [vmem:[%s876_s28 + $0xe0] sm:$0xff] }
  0xf3   : > { %v559_v39 = vadd.f32 %v527_v23, %v467_v26  ;;  %v541_v40 = vadd.f32 %v509_v25, %v395_v27  ;;  %v470_v41 = vadd.f32 %v746_v35, %v881_v50  ;;  %v398_v42 = vadd.f32 %v881_v50, %v397_v37  ;;  %v461_v43 = vpop.f32.mrb[7].mxu1  ;;  %v517_v26 = vld [vmem:[%s876_s28 + $0x60] sm:$0xff]  ;;  %v536_v37 = vld [vmem:[%s876_s28 + $0xf8] sm:$0xff] }
  0xf4   : > { %575 = vst.msk [vmem:[%s891_s7 + $0x30] sm:$0xff] %vm295_vm0, %v543_v32  ;;  %v557_v45 = vadd.f32 %v525_v29, %v459_v33  ;;  %v544_v46 = vadd.f32 %v512_v31, %v406_v34  ;;  %v462_v47 = vadd.f32 %v881_v50, %v461_v43  ;;  %v520_v32 = vld [vmem:[%s876_s28 + $0x78] sm:$0xff] }
  0xf5   : > { %591 = vst.msk [vmem:[%s891_s7 + $0xb0] sm:$0xff] %vm295_vm0, %v559_v39  ;;  %573 = vst.msk [vmem:[%s891_s7 + $0x20] sm:$0xff] %vm295_vm0, %v541_v40  ;;  %v560_v48 = vadd.f32 %v528_v36, %v470_v41  ;;  %v542_v49 = vadd.f32 %v510_v38, %v398_v42  ;;  %v518_v39 = vld [vmem:[%s876_s28 + $0x68] sm:$0xff] }
  0xf6   : > { %589 = vst.msk [vmem:[%s891_s7 + $0xa0] sm:$0xff] %vm295_vm0, %v557_v45  ;;  %576 = vst.msk [vmem:[%s891_s7 + $0x38] sm:$0xff] %vm295_vm0, %v544_v46  ;;  %v558_v51 = vadd.f32 %v526_v44, %v462_v47  ;;  %v534_v45 = vld [vmem:[%s876_s28 + $0xe8] sm:$0xff] }
  0xf7   : > { %592 = vst.msk [vmem:[%s891_s7 + $0xb8] sm:$0xff] %vm295_vm0, %v560_v48  ;;  %574 = vst.msk [vmem:[%s891_s7 + $0x28] sm:$0xff] %vm295_vm0, %v542_v49  ;;  %v733_v52 = vpop.f32.mrb[8].mxu0 }
  0xf8   : > { %590 = vst.msk [vmem:[%s891_s7 + $0xa8] sm:$0xff] %vm295_vm0, %v558_v51  ;;  %v419_v54 = vadd.f32 %v733_v52, %v881_v50  ;;  %v749_v55 = vpop.f32.mrb[8].mxu1  ;;  %v410_v57 = vpop.f32.mrb[9].mxu0 }
  0xf9   : > { %v483_v59 = vadd.f32 %v749_v55, %v881_v50  ;;  %v411_v60 = vadd.f32 %v881_v50, %v410_v57  ;;  %v474_v61 = vpop.f32.mrb[9].mxu1  ;;  %v734_v63 = vpop.f32.mrb[10].mxu0 }
  0xfa   : > { %v547_v1 = vadd.f32 %v515_v53, %v419_v54  ;;  %v475_v2 = vadd.f32 %v881_v50, %v474_v61  ;;  %v422_v3 = vadd.f32 %v734_v63, %v881_v50  ;;  %v750_v4 = vpop.f32.mrb[10].mxu1  ;;  %v413_v6 = vpop.f32.mrb[11].mxu0 }
  0xfb   : > { %v563_v8 = vadd.f32 %v531_v56, %v483_v59  ;;  %v545_v9 = vadd.f32 %v513_v58, %v411_v60  ;;  %v486_v10 = vadd.f32 %v750_v4, %v881_v50  ;;  %v414_v11 = vadd.f32 %v881_v50, %v413_v6  ;;  %v477_v12 = vpop.f32.mrb[11].mxu1 }
  0xfc   : > { %579 = vst.msk [vmem:[%s891_s7 + $0x50] sm:$0xff] %vm295_vm0, %v547_v1  ;;  %v561_v14 = vadd.f32 %v529_v62, %v475_v2  ;;  %v548_v15 = vadd.f32 %v516_v0, %v422_v3  ;;  %v478_v16 = vadd.f32 %v881_v50, %v477_v12 }
  0xfd   : > { %595 = vst.msk [vmem:[%s891_s7 + $0xd0] sm:$0xff] %vm295_vm0, %v563_v8  ;;  %577 = vst.msk [vmem:[%s891_s7 + $0x40] sm:$0xff] %vm295_vm0, %v545_v9  ;;  %v564_v17 = vadd.f32 %v532_v5, %v486_v10  ;;  %v546_v18 = vadd.f32 %v514_v7, %v414_v11 }
  0xfe   : > { %593 = vst.msk [vmem:[%s891_s7 + $0xc0] sm:$0xff] %vm295_vm0, %v561_v14  ;;  %580 = vst.msk [vmem:[%s891_s7 + $0x58] sm:$0xff] %vm295_vm0, %v548_v15  ;;  %v562_v19 = vadd.f32 %v530_v13, %v478_v16 }
  0xff   : > { %596 = vst.msk [vmem:[%s891_s7 + $0xd8] sm:$0xff] %vm295_vm0, %v564_v17  ;;  %578 = vst.msk [vmem:[%s891_s7 + $0x48] sm:$0xff] %vm295_vm0, %v546_v18  ;;  %v737_v20 = vpop.f32.mrb[12].mxu0 }
 0x100   : > { %594 = vst.msk [vmem:[%s891_s7 + $0xc8] sm:$0xff] %vm295_vm0, %v562_v19  ;;  %v435_v22 = vadd.f32 %v737_v20, %v881_v50  ;;  %v753_v23 = vpop.f32.mrb[12].mxu1  ;;  %v426_v25 = vpop.f32.mrb[13].mxu0 }
 0x101   : > { %v499_v27 = vadd.f32 %v753_v23, %v881_v50  ;;  %v427_v28 = vadd.f32 %v881_v50, %v426_v25  ;;  %v490_v29 = vpop.f32.mrb[13].mxu1  ;;  %v738_v31 = vpop.f32.mrb[14].mxu0 }
 0x102   : > { %v551_v33 = vadd.f32 %v519_v21, %v435_v22  ;;  %v491_v34 = vadd.f32 %v881_v50, %v490_v29  ;;  %v438_v35 = vadd.f32 %v738_v31, %v881_v50  ;;  %v754_v36 = vpop.f32.mrb[14].mxu1  ;;  %v429_v38 = vpop.f32.mrb[15].mxu0 }
 0x103   : > { %v567_v40 = vadd.f32 %v535_v24, %v499_v27  ;;  %v549_v41 = vadd.f32 %v517_v26, %v427_v28  ;;  %v502_v42 = vadd.f32 %v754_v36, %v881_v50  ;;  %v430_v43 = vadd.f32 %v881_v50, %v429_v38  ;;  %v493_v44 = vpop.f32.mrb[15].mxu1 }
 0x104   : > { %583 = vst.msk [vmem:[%s891_s7 + $0x70] sm:$0xff] %vm295_vm0, %v551_v33  ;;  %v565_v46 = vadd.f32 %v533_v30, %v491_v34  ;;  %v552_v47 = vadd.f32 %v520_v32, %v438_v35  ;;  %v494_v48 = vadd.f32 %v881_v50, %v493_v44 }
 0x105   : > { %599 = vst.msk [vmem:[%s891_s7 + $0xf0] sm:$0xff] %vm295_vm0, %v567_v40  ;;  %581 = vst.msk [vmem:[%s891_s7 + $0x60] sm:$0xff] %vm295_vm0, %v549_v41  ;;  %v568_v49 = vadd.f32 %v536_v37, %v502_v42  ;;  %v550_v51 = vadd.f32 %v518_v39, %v430_v43 }
 0x106   : > { %597 = vst.msk [vmem:[%s891_s7 + $0xe0] sm:$0xff] %vm295_vm0, %v565_v46  ;;  %584 = vst.msk [vmem:[%s891_s7 + $0x78] sm:$0xff] %vm295_vm0, %v552_v47  ;;  %v566_v52 = vadd.f32 %v534_v45, %v494_v48 }
 0x107   : > { %600 = vst.msk [vmem:[%s891_s7 + $0xf8] sm:$0xff] %vm295_vm0, %v568_v49  ;;  %582 = vst.msk [vmem:[%s891_s7 + $0x68] sm:$0xff] %vm295_vm0, %v550_v51 }
 0x108   : > { %598 = vst.msk [vmem:[%s891_s7 + $0xe8] sm:$0xff] %vm295_vm0, %v566_v52 }
 0x109 PF: > { %s14_s15 = sadd.s32 1, %s775_s15  }
 0x10a   : > { %p11_p4 = scmp.ge.s32.totalorder %s14_s15, 4  }
 0x10c   :  { %13 = sbr.rel (!%p11_p4) target bundleno = 1 (0x1), region = 69 }

// kernel: fno_block2d_forward.19
= control target key start
LH: loop header
LB: loop body
LE: loop exit
PB: predicated region body
PF: predicated region fallthrough
CT: control target
= control target key end

     0   :  { %s1115_s18 = smov 0   ;;  %s1327_s0 = inlined_call_operand.vmem [shape: f32[512,32], index: 0, kind: input, shape index: {}]   ;;  %s1328_s1 = inlined_call_operand.vmem [shape: bf16[32,128], index: 1, kind: input, shape index: {}]   ;;  %s1329_s2 = inlined_call_operand.vmem [shape: f32[1,128], index: 2, kind: input, shape index: {}]   ;;  %s1330_s3 = inlined_call_operand.vmem [shape: bf16[128,128], index: 3, kind: input, shape index: {}]   ;;  %s1331_s4 = inlined_call_operand.vmem [shape: f32[1,128], index: 4, kind: input, shape index: {}]   ;;  %s1332_s5 = inlined_call_operand.vmem [shape: f32[512,128], index: 5, kind: output, shape index: {}]  }
   0x1 LB: > { %s878_s19 = sadd.s32 4294967295, %s1083_s18   ;;  %p882_p0 = scmp.ge.s32.totalorder %s1083_s18, 1  ;;  %s1083_s18 = sphi %s1115_s18, %s15_s18  }
   0x2   : > { %p188_p1 = scmp.lt.s32.totalorder %s1083_s18, 3 }
   0x4   : > { %p189_p2 = pnand %p882_p0, %p188_p1 }
   0x5   : > { %v1067_v0 = vld [vmem:[%s1328_s1] sm:$0xff] (!%p189_p2)   ;;  %s883_s22 = sshll.u32 (!%p189_p2), %s878_s19, 5  ;;  %v1068_v1 = vld [vmem:[%s1328_s1 + $0x8] sm:$0xff] (!%p189_p2)   ;;  %v1071_v4 = vld [vmem:[%s1330_s3 + $0x10] sm:$0xff] (!%p189_p2)   ;;  %vm300_vm0 = vcmask (!%p189_p2), 261120  }
   0x6   : > { %192 = sbr.rel (%p189_p2) target bundleno = 516 (0x204), region = 40  ;;  %p217_p3 = scmp.lt.s32.totalorder (!%p189_p2), %s883_s22, 63  ;;  %959 = vmatprep.subr.bf16.mxu0 (!%p189_p2), %v1067_v0  ;;  %v1069_v2 = vld [vmem:[%s1330_s3] sm:$0xff] (!%p189_p2)   ;;  %v1070_v3 = vld [vmem:[%s1330_s3 + $0x8] sm:$0xff] (!%p189_p2)   ;;  %v1072_v16 = vld [vmem:[%s1330_s3 + $0x18] sm:$0xff] (!%p189_p2)  }
   0x7   : > { %960 = vmatpush3.bf16.msra.mxu0 (!%p189_p2), %v1067_v0  ;;  %1043 = vmatprep.subr.bf16.mxu1 (!%p189_p2), %v1069_v2  ;;  %v1073_v21 = vld [vmem:[%s1330_s3 + $0x20] sm:$0xff] (!%p189_p2)   ;;  %v1074_v24 = vld [vmem:[%s1330_s3 + $0x28] sm:$0xff] (!%p189_p2)   ;;  %v1075_v56 = vld [vmem:[%s1330_s3 + $0x30] sm:$0xff] (!%p189_p2)  }
   0x8   : > { %961 = vmatprep.subr.bf16.mxu0 (!%p189_p2), %v1068_v1  ;;  %1051 = vmatpush3.bf16.msra.mxu1 (!%p189_p2), %v1069_v2  ;;  %v1076_v57 = vld [vmem:[%s1330_s3 + $0x38] sm:$0xff] (!%p189_p2)   ;;  %v1214_v58 = vld [vmem:[%s1329_s2] ss:$0 sm:$0xff] (!%p189_p2) }
   0x9   : > { %1044 = vmatprep.subr.bf16.mxu1 (!%p189_p2), %v1070_v3 }
   0xb   : > { %962 = vmatpush3.bf16.msra.mxu0 (!%p189_p2), %v1068_v1 }
   0xc   : > { %995 = vmatprep.subr.bf16.mxu0 (!%p189_p2), %v1069_v2  ;;  %1052 = vmatpush3.bf16.msra.mxu1 (!%p189_p2), %v1070_v3 }
   0xd   : > { %s1334_s22 = smov (!%p217_p3, %s883_s22), 63  ;;  %1045 = vmatprep.subr.bf16.mxu1 %v1071_v4 }
   0xe   : > { %s884_s29 = sshll.u32 %s1334_s22, 3 }
   0xf   : > { %s1143_s7 = scalar_lea.vmem %s1327_s0, %s884_s29  ;;  %s1258_s28 = scalar_lea.vmem %s1332_s5, %s884_s29 }
  0x10   : > { %v229_v5 = vld [vmem:[%s1143_s7] sm:$0xff]  ;;  %v230_v6 = vld [vmem:[%s1143_s7 + $0x8] sm:$0xff]  ;;  %v231_v7 = vld [vmem:[%s1143_s7 + $0x10] sm:$0xff]  ;;  %1053 = vmatpush3.bf16.msra.mxu1 %v1071_v4 }
  0x11   : > { %v261_v8 = vpack.c.bf16 %v230_v6, %v229_v5  ;;  %v232_v9 = vld [vmem:[%s1143_s7 + $0x18] sm:$0xff]  ;;  %v233_v10 = vld [vmem:[%s1143_s7 + $0x20] sm:$0xff]  ;;  %v234_v11 = vld [vmem:[%s1143_s7 + $0x28] sm:$0xff]  ;;  %1046 = vmatprep.subr.bf16.mxu1 %v1072_v16 }
  0x12   : > { %v262_v12 = vpack.c.bf16 %v232_v9, %v231_v7  ;;  %v263_v13 = vpack.c.bf16 %v234_v11, %v233_v10  ;;  %v235_v14 = vld [vmem:[%s1143_s7 + $0x30] sm:$0xff]  ;;  %v236_v15 = vld [vmem:[%s1143_s7 + $0x38] sm:$0xff]  ;;  %v237_v17 = vld [vmem:[%s1143_s7 + $0x40] sm:$0xff] }
  0x13   : > { %963 = vmatprep.mubr.msk.bf16.mxu0 %vm300_vm0, %v261_v8  ;;  %v238_v18 = vld [vmem:[%s1143_s7 + $0x48] sm:$0xff]  ;;  %v264_v19 = vpack.c.bf16 %v236_v15, %v235_v14  ;;  %v239_v22 = vld [vmem:[%s1143_s7 + $0x50] sm:$0xff]  ;;  %v240_v23 = vld [vmem:[%s1143_s7 + $0x58] sm:$0xff] }
  0x14   : > { %964 = vmatmul.mubr.msk.bf16.vlgmr.msra.gmra.mrb[0].mxu0 %vm300_vm0, %v262_v12  ;;  %v265_v20 = vpack.c.bf16 %v238_v18, %v237_v17  ;;  %1054 = vmatpush3.bf16.msra.mxu1 %v1072_v16  ;;  %v241_v25 = vld [vmem:[%s1143_s7 + $0x60] sm:$0xff]  ;;  %v242_v26 = vld [vmem:[%s1143_s7 + $0x68] sm:$0xff]  ;;  %v266_v27 = vpack.c.bf16 %v240_v23, %v239_v22  ;;  %v243_v29 = vld [vmem:[%s1143_s7 + $0x70] sm:$0xff] }
  0x15   : > { %967 = vmatprep.mubr.msk.bf16.mxu0 %vm300_vm0, %v263_v13  ;;  %996 = vmatpush3.bf16.msra.mxu0 %v1069_v2  ;;  %v267_v28 = vpack.c.bf16 %v242_v26, %v241_v25  ;;  %v244_v30 = vld [vmem:[%s1143_s7 + $0x78] sm:$0xff]  ;;  %v245_v31 = vld [vmem:[%s1143_s7 + $0x80] sm:$0xff]  ;;  %v246_v32 = vld [vmem:[%s1143_s7 + $0x88] sm:$0xff] }
  0x16   : > { %997 = vmatprep.subr.bf16.mxu0 %v1070_v3  ;;  %1047 = vmatprep.subr.bf16.mxu1 %v1073_v21  ;;  %v268_v33 = vpack.c.bf16 %v244_v30, %v243_v29  ;;  %v269_v34 = vpack.c.bf16 %v246_v32, %v245_v31  ;;  %v247_v35 = vld [vmem:[%s1143_s7 + $0x90] sm:$0xff]  ;;  %v248_v36 = vld [vmem:[%s1143_s7 + $0x98] sm:$0xff]  ;;  %v249_v37 = vld [vmem:[%s1143_s7 + $0xa0] sm:$0xff] }
  0x17   : > { %v250_v38 = vld [vmem:[%s1143_s7 + $0xa8] sm:$0xff]  ;;  %v270_v39 = vpack.c.bf16 %v248_v36, %v247_v35  ;;  %v251_v41 = vld [vmem:[%s1143_s7 + $0xb0] sm:$0xff]  ;;  %v252_v42 = vld [vmem:[%s1143_s7 + $0xb8] sm:$0xff] }
  0x18   : > { %1055 = vmatpush3.bf16.msra.mxu1 %v1073_v21  ;;  %v271_v40 = vpack.c.bf16 %v250_v38, %v249_v37  ;;  %v253_v43 = vld [vmem:[%s1143_s7 + $0xc0] sm:$0xff]  ;;  %v254_v44 = vld [vmem:[%s1143_s7 + $0xc8] sm:$0xff]  ;;  %v272_v45 = vpack.c.bf16 %v252_v42, %v251_v41  ;;  %v255_v47 = vld [vmem:[%s1143_s7 + $0xd0] sm:$0xff] }
  0x19   : > { %998 = vmatpush3.bf16.msra.mxu0 %v1070_v3  ;;  %1048 = vmatprep.subr.bf16.mxu1 %v1074_v24  ;;  %v273_v46 = vpack.c.bf16 %v254_v44, %v253_v43  ;;  %v256_v48 = vld [vmem:[%s1143_s7 + $0xd8] sm:$0xff]  ;;  %v257_v49 = vld [vmem:[%s1143_s7 + $0xe0] sm:$0xff]  ;;  %v258_v50 = vld [vmem:[%s1143_s7 + $0xe8] sm:$0xff] }
  0x1a   : > { %999 = vmatprep.subr.bf16.mxu0 %v1071_v4  ;;  %v274_v51 = vpack.c.bf16 %v256_v48, %v255_v47  ;;  %v275_v52 = vpack.c.bf16 %v258_v50, %v257_v49  ;;  %v259_v53 = vld [vmem:[%s1143_s7 + $0xf0] sm:$0xff]  ;;  %v260_v54 = vld [vmem:[%s1143_s7 + $0xf8] sm:$0xff] }
  0x1b   : > { %v276_v55 = vpack.c.bf16 %v260_v54, %v259_v53 }
  0x1c   : > { %968 = vmatmul.mubr.msk.bf16.gmra.mrb[4].mxu0 %vm300_vm0, %v264_v19  ;;  %1056 = vmatpush3.bf16.msra.mxu1 %v1074_v24 }
  0x1d   : > { %971 = vmatprep.mubr.msk.bf16.mxu0 %vm300_vm0, %v265_v20  ;;  %1000 = vmatpush3.bf16.msra.mxu0 %v1071_v4 }
  0x1e   : > { %1001 = vmatprep.subr.bf16.mxu0 %v1072_v16  ;;  %1049 = vmatprep.subr.bf16.mxu1 %v1075_v56 }
  0x20   : > { %1057 = vmatpush3.bf16.msra.mxu1 %v1075_v56 }
  0x21   : > { %1002 = vmatpush3.bf16.msra.mxu0 %v1072_v16  ;;  %1050 = vmatprep.subr.bf16.mxu1 %v1076_v57 }
  0x22   : > { %1003 = vmatprep.subr.bf16.mxu0 %v1073_v21 }
  0x24   : > { %972 = vmatmul.mubr.msk.bf16.gmra.mrb[8].mxu0 %vm300_vm0, %v266_v27  ;;  %1058 = vmatpush3.bf16.msra.mxu1 %v1076_v57 }
  0x25   : > { %975 = vmatprep.mubr.msk.bf16.mxu0 %vm300_vm0, %v267_v28  ;;  %1004 = vmatpush3.bf16.msra.mxu0 %v1073_v21 }
  0x26   : > { %1005 = vmatprep.subr.bf16.mxu0 %v1074_v24 }
  0x29   : > { %1006 = vmatpush3.bf16.msra.mxu0 %v1074_v24 }
  0x2a   : > { %1007 = vmatprep.subr.bf16.mxu0 %v1075_v56 }
  0x2c   : > { %976 = vmatmul.mubr.msk.bf16.gmra.mrb[12].mxu0 %vm300_vm0, %v268_v33 }
  0x2d   : > { %979 = vmatprep.mubr.msk.bf16.mxu0 %vm300_vm0, %v269_v34  ;;  %1008 = vmatpush3.bf16.msra.mxu0 %v1075_v56 }
  0x2e   : > { %1009 = vmatprep.subr.bf16.mxu0 %v1076_v57 }
  0x31   : > { %1010 = vmatpush3.bf16.msra.mxu0 %v1076_v57 }
  0x34   : > { %980 = vmatmul.mubr.msk.bf16.gmra.mrb[16].mxu0 %vm300_vm0, %v270_v39 }
  0x35   : > { %983 = vmatprep.mubr.msk.bf16.mxu0 %vm300_vm0, %v271_v40 }
  0x3c   : > { %984 = vmatmul.mubr.msk.bf16.gmra.mrb[20].mxu0 %vm300_vm0, %v272_v45 }
  0x3d   : > { %987 = vmatprep.mubr.msk.bf16.mxu0 %vm300_vm0, %v273_v46 }
  0x44   : > { %988 = vmatmul.mubr.msk.bf16.gmra.mrb[24].mxu0 %vm300_vm0, %v274_v51 }
  0x45   : > { %991 = vmatprep.mubr.msk.bf16.mxu0 %vm300_vm0, %v275_v52 }
  0x4c   : > { %992 = vmatmul.mubr.msk.bf16.gmra.mrb[28].mxu0 %vm300_vm0, %v276_v55 }
  0xe7   : > { %v965_v59 = vpop.f32.mrb[0].mxu0 }
  0xe8   : > { %v392_v60 = vadd.f32 %v965_v59, %v1214_v58  ;;  %v383_v61 = vpop.f32.mrb[1].mxu0 }
  0xe9   : > { %v384_v62 = vadd.f32 %v1214_v58, %v383_v61  ;;  %v966_v63 = vpop.f32.mrb[2].mxu0 }
  0xea   : > { %v395_v0 = vadd.f32 %v966_v63, %v1214_v58  ;;  %v386_v1 = vpop.f32.mrb[3].mxu0  ;;  %v512_v3 = vmax.f32 %v392_v60, 0.0 }
  0xeb   : > { %v387_v2 = vadd.f32 %v1214_v58, %v386_v1  ;;  %v510_v5 = vmax.f32 %v384_v62, 0.0 }
  0xec   : > { %v513_v4 = vmax.f32 %v395_v0, 0.0 }
  0xed   : > { %v511_v6 = vmax.f32 %v387_v2, 0.0 }
  0xee   : > { %v559_v7 = vpack.c.bf16 %v513_v4, %v512_v3 }
  0xef   : > { %v558_v8 = vpack.c.bf16 %v511_v6, %v510_v5  ;;  %v969_v9 = vpop.f32.mrb[4].mxu0 }
  0xf0   : > { %v408_v10 = vadd.f32 %v969_v9, %v1214_v58  ;;  %v399_v11 = vpop.f32.mrb[5].mxu0 }
  0xf1   : > { %v400_v12 = vadd.f32 %v1214_v58, %v399_v11  ;;  %v970_v13 = vpop.f32.mrb[6].mxu0  ;;  %1011 = vmatprep.mubr.bf16.mxu0 %v558_v8 }
  0xf2   : > { %v411_v14 = vadd.f32 %v970_v13, %v1214_v58  ;;  %v402_v15 = vpop.f32.mrb[7].mxu0  ;;  %1012 = vmatmul.mubr.bf16.vlgmr.msra.gmra.mrb[32].mxu0 %v559_v7  ;;  %v516_v17 = vmax.f32 %v408_v10, 0.0 }
  0xf3   : > { %v403_v16 = vadd.f32 %v1214_v58, %v402_v15  ;;  %v514_v19 = vmax.f32 %v400_v12, 0.0 }
  0xf4   : > { %v517_v18 = vmax.f32 %v411_v14, 0.0 }
  0xf5   : > { %v515_v20 = vmax.f32 %v403_v16, 0.0 }
  0xf6   : > { %v561_v21 = vpack.c.bf16 %v517_v18, %v516_v17 }
  0xf7   : > { %v973_v22 = vpop.f32.mrb[8].mxu0  ;;  %v560_v23 = vpack.c.bf16 %v515_v20, %v514_v19 }
  0xf8   : > { %v424_v24 = vadd.f32 %v973_v22, %v1214_v58  ;;  %v415_v25 = vpop.f32.mrb[9].mxu0 }
  0xf9   : > { %v416_v26 = vadd.f32 %v1214_v58, %v415_v25  ;;  %v974_v27 = vpop.f32.mrb[10].mxu0  ;;  %1015 = vmatprep.mubr.bf16.mxu1 %v560_v23 }
  0xfa   : > { %v427_v28 = vadd.f32 %v974_v27, %v1214_v58  ;;  %v418_v29 = vpop.f32.mrb[11].mxu0  ;;  %1016 = vmatmul.mubr.bf16.vlgmr.msra.gmra.mrb[0].mxu1 %v561_v21  ;;  %v520_v31 = vmax.f32 %v424_v24, 0.0 }
  0xfb   : > { %v419_v30 = vadd.f32 %v1214_v58, %v418_v29  ;;  %v518_v33 = vmax.f32 %v416_v26, 0.0 }
  0xfc   : > { %v521_v32 = vmax.f32 %v427_v28, 0.0 }
  0xfd   : > { %v519_v34 = vmax.f32 %v419_v30, 0.0 }
  0xfe   : > { %v563_v35 = vpack.c.bf16 %v521_v32, %v520_v31 }
  0xff   : > { %v562_v36 = vpack.c.bf16 %v519_v34, %v518_v33  ;;  %v977_v37 = vpop.f32.mrb[12].mxu0 }
 0x100   : > { %v440_v38 = vadd.f32 %v977_v37, %v1214_v58  ;;  %v431_v39 = vpop.f32.mrb[13].mxu0 }
 0x101   : > { %v432_v40 = vadd.f32 %v1214_v58, %v431_v39  ;;  %v978_v41 = vpop.f32.mrb[14].mxu0  ;;  %1019 = vmatprep.mubr.bf16.mxu1 %v562_v36 }
 0x102   : > { %v443_v42 = vadd.f32 %v978_v41, %v1214_v58  ;;  %v434_v43 = vpop.f32.mrb[15].mxu0  ;;  %1020 = vmatmul.mubr.bf16.gmra.mrb[4].mxu1 %v563_v35  ;;  %v524_v45 = vmax.f32 %v440_v38, 0.0 }
 0x103   : > { %v435_v44 = vadd.f32 %v1214_v58, %v434_v43  ;;  %v522_v47 = vmax.f32 %v432_v40, 0.0 }
 0x104   : > { %v525_v46 = vmax.f32 %v443_v42, 0.0 }
 0x105   : > { %v523_v48 = vmax.f32 %v435_v44, 0.0  ;;  %v1251_v44 = vld [vmem:[%s1331_s4] ss:$0 sm:$0xff] }
 0x106   : > { %v565_v49 = vpack.c.bf16 %v525_v46, %v524_v45 }
 0x107   : > { %v564_v50 = vpack.c.bf16 %v523_v48, %v522_v47  ;;  %v981_v51 = vpop.f32.mrb[16].mxu0 }
 0x108   : > { %v456_v52 = vadd.f32 %v981_v51, %v1214_v58  ;;  %v447_v53 = vpop.f32.mrb[17].mxu0 }
 0x109   : > { %v448_v54 = vadd.f32 %v1214_v58, %v447_v53  ;;  %v982_v55 = vpop.f32.mrb[18].mxu0  ;;  %1023 = vmatprep.mubr.bf16.mxu1 %v564_v50 }
 0x10a   : > { %v459_v56 = vadd.f32 %v982_v55, %v1214_v58  ;;  %v450_v57 = vpop.f32.mrb[19].mxu0  ;;  %1024 = vmatmul.mubr.bf16.gmra.mrb[8].mxu1 %v565_v49  ;;  %v528_v60 = vmax.f32 %v456_v52, 0.0 }
 0x10b   : > { %v451_v59 = vadd.f32 %v1214_v58, %v450_v57  ;;  %v526_v62 = vmax.f32 %v448_v54, 0.0 }
 0x10c   : > { %v529_v61 = vmax.f32 %v459_v56, 0.0 }
 0x10d   : > { %v527_v63 = vmax.f32 %v451_v59, 0.0 }
 0x10e   : > { %v567_v0 = vpack.c.bf16 %v529_v61, %v528_v60 }
 0x10f   : > { %v566_v1 = vpack.c.bf16 %v527_v63, %v526_v62  ;;  %v985_v2 = vpop.f32.mrb[20].mxu0 }
 0x110   : > { %v472_v3 = vadd.f32 %v985_v2, %v1214_v58  ;;  %v463_v4 = vpop.f32.mrb[21].mxu0 }
 0x111   : > { %v464_v5 = vadd.f32 %v1214_v58, %v463_v4  ;;  %v986_v6 = vpop.f32.mrb[22].mxu0  ;;  %1027 = vmatprep.mubr.bf16.mxu1 %v566_v1 }
 0x112   : > { %v475_v7 = vadd.f32 %v986_v6, %v1214_v58  ;;  %v466_v8 = vpop.f32.mrb[23].mxu0  ;;  %1028 = vmatmul.mubr.bf16.gmra.mrb[12].mxu1 %v567_v0  ;;  %v532_v10 = vmax.f32 %v472_v3, 0.0 }
 0x113   : > { %v467_v9 = vadd.f32 %v1214_v58, %v466_v8  ;;  %v530_v12 = vmax.f32 %v464_v5, 0.0 }
 0x114   : > { %v533_v11 = vmax.f32 %v475_v7, 0.0 }
 0x115   : > { %v531_v13 = vmax.f32 %v467_v9, 0.0 }
 0x116   : > { %v569_v14 = vpack.c.bf16 %v533_v11, %v532_v10 }
 0x117   : > { %v568_v15 = vpack.c.bf16 %v531_v13, %v530_v12  ;;  %v989_v16 = vpop.f32.mrb[24].mxu0 }
 0x118   : > { %v488_v17 = vadd.f32 %v989_v16, %v1214_v58  ;;  %v479_v18 = vpop.f32.mrb[25].mxu0 }
 0x119   : > { %v480_v19 = vadd.f32 %v1214_v58, %v479_v18  ;;  %v990_v20 = vpop.f32.mrb[26].mxu0  ;;  %1031 = vmatprep.mubr.bf16.mxu1 %v568_v15 }
 0x11a   : > { %v491_v21 = vadd.f32 %v990_v20, %v1214_v58  ;;  %v482_v22 = vpop.f32.mrb[27].mxu0  ;;  %1032 = vmatmul.mubr.bf16.gmra.mrb[16].mxu1 %v569_v14  ;;  %v536_v24 = vmax.f32 %v488_v17, 0.0 }
 0x11b   : > { %v483_v23 = vadd.f32 %v1214_v58, %v482_v22  ;;  %v534_v26 = vmax.f32 %v480_v19, 0.0 }
 0x11c   : > { %v537_v25 = vmax.f32 %v491_v21, 0.0 }
 0x11d   : > { %v535_v27 = vmax.f32 %v483_v23, 0.0 }
 0x11e   : > { %v571_v28 = vpack.c.bf16 %v537_v25, %v536_v24 }
 0x11f   : > { %v570_v29 = vpack.c.bf16 %v535_v27, %v534_v26  ;;  %v993_v30 = vpop.f32.mrb[28].mxu0 }
 0x120   : > { %v504_v31 = vadd.f32 %v993_v30, %v1214_v58  ;;  %v495_v32 = vpop.f32.mrb[29].mxu0 }
 0x121   : > { %v496_v33 = vadd.f32 %v1214_v58, %v495_v32  ;;  %v994_v34 = vpop.f32.mrb[30].mxu0  ;;  %1035 = vmatprep.mubr.bf16.mxu1 %v570_v29 }
 0x122   : > { %v507_v35 = vadd.f32 %v994_v34, %v1214_v58  ;;  %v498_v36 = vpop.f32.mrb[31].mxu0  ;;  %1036 = vmatmul.mubr.bf16.gmra.mrb[20].mxu1 %v571_v28  ;;  %v540_v38 = vmax.f32 %v504_v31, 0.0 }
 0x123   : > { %v499_v37 = vadd.f32 %v1214_v58, %v498_v36  ;;  %v538_v40 = vmax.f32 %v496_v33, 0.0 }
 0x124   : > { %v541_v39 = vmax.f32 %v507_v35, 0.0 }
 0x125   : > { %v539_v41 = vmax.f32 %v499_v37, 0.0 }
 0x126   : > { %v573_v42 = vpack.c.bf16 %v541_v39, %v540_v38 }
 0x127   : > { %v572_v43 = vpack.c.bf16 %v539_v41, %v538_v40 }
 0x129   : > { %1039 = vmatprep.mubr.bf16.mxu1 %v572_v43 }
 0x12a   : > { %1040 = vmatmul.mubr.bf16.gmra.mrb[24].mxu1 %v573_v42 }
 0x1c5   : > { %v1013_v58 = vpop.f32.mrb[32].mxu0 }
 0x1c6   : > { %v672_v45 = vadd.f32 %v1013_v58, %v1251_v44  ;;  %v663_v46 = vpop.f32.mrb[33].mxu0 }
 0x1c7   : > { %v664_v47 = vadd.f32 %v1251_v44, %v663_v46  ;;  %v1014_v48 = vpop.f32.mrb[34].mxu0 }
 0x1c8   : > { %792 = vst [vmem:[%s1258_s28 + $0x10] sm:$0xff] %v672_v45  ;;  %v675_v49 = vadd.f32 %v1014_v48, %v1251_v44  ;;  %v666_v50 = vpop.f32.mrb[35].mxu0 }
 0x1c9   : > { %790 = vst [vmem:[%s1258_s28] sm:$0xff] %v664_v47  ;;  %v667_v51 = vadd.f32 %v1251_v44, %v666_v50 }
 0x1ca   : > { %793 = vst [vmem:[%s1258_s28 + $0x18] sm:$0xff] %v675_v49 }
 0x1cb   : > { %791 = vst [vmem:[%s1258_s28 + $0x8] sm:$0xff] %v667_v51 }
 0x1cd   : > { %v1017_v52 = vpop.f32.mrb[0].mxu1 }
 0x1ce   : > { %v688_v53 = vadd.f32 %v1017_v52, %v1251_v44  ;;  %v679_v54 = vpop.f32.mrb[1].mxu1 }
 0x1cf   : > { %v680_v55 = vadd.f32 %v1251_v44, %v679_v54  ;;  %v1018_v56 = vpop.f32.mrb[2].mxu1 }
 0x1d0   : > { %796 = vst [vmem:[%s1258_s28 + $0x30] sm:$0xff] %v688_v53  ;;  %v691_v57 = vadd.f32 %v1018_v56, %v1251_v44  ;;  %v682_v59 = vpop.f32.mrb[3].mxu1 }
 0x1d1   : > { %794 = vst [vmem:[%s1258_s28 + $0x20] sm:$0xff] %v680_v55  ;;  %v683_v60 = vadd.f32 %v1251_v44, %v682_v59 }
 0x1d2   : > { %797 = vst [vmem:[%s1258_s28 + $0x38] sm:$0xff] %v691_v57 }
 0x1d3   : > { %795 = vst [vmem:[%s1258_s28 + $0x28] sm:$0xff] %v683_v60 }
 0x1d5   : > { %v1021_v61 = vpop.f32.mrb[4].mxu1 }
 0x1d6   : > { %v704_v62 = vadd.f32 %v1021_v61, %v1251_v44  ;;  %v695_v63 = vpop.f32.mrb[5].mxu1 }
 0x1d7   : > { %v696_v0 = vadd.f32 %v1251_v44, %v695_v63  ;;  %v1022_v1 = vpop.f32.mrb[6].mxu1 }
 0x1d8   : > { %800 = vst [vmem:[%s1258_s28 + $0x50] sm:$0xff] %v704_v62  ;;  %v707_v2 = vadd.f32 %v1022_v1, %v1251_v44  ;;  %v698_v3 = vpop.f32.mrb[7].mxu1 }
 0x1d9   : > { %798 = vst [vmem:[%s1258_s28 + $0x40] sm:$0xff] %v696_v0  ;;  %v699_v4 = vadd.f32 %v1251_v44, %v698_v3 }
 0x1da   : > { %801 = vst [vmem:[%s1258_s28 + $0x58] sm:$0xff] %v707_v2 }
 0x1db   : > { %799 = vst [vmem:[%s1258_s28 + $0x48] sm:$0xff] %v699_v4 }
 0x1dd   : > { %v1025_v5 = vpop.f32.mrb[8].mxu1 }
 0x1de   : > { %v720_v6 = vadd.f32 %v1025_v5, %v1251_v44  ;;  %v711_v7 = vpop.f32.mrb[9].mxu1 }
 0x1df   : > { %v712_v8 = vadd.f32 %v1251_v44, %v711_v7  ;;  %v1026_v9 = vpop.f32.mrb[10].mxu1 }
 0x1e0   : > { %804 = vst [vmem:[%s1258_s28 + $0x70] sm:$0xff] %v720_v6  ;;  %v723_v10 = vadd.f32 %v1026_v9, %v1251_v44  ;;  %v714_v11 = vpop.f32.mrb[11].mxu1 }
 0x1e1   : > { %802 = vst [vmem:[%s1258_s28 + $0x60] sm:$0xff] %v712_v8  ;;  %v715_v12 = vadd.f32 %v1251_v44, %v714_v11 }
 0x1e2   : > { %805 = vst [vmem:[%s1258_s28 + $0x78] sm:$0xff] %v723_v10 }
 0x1e3   : > { %803 = vst [vmem:[%s1258_s28 + $0x68] sm:$0xff] %v715_v12 }
 0x1e5   : > { %v1029_v13 = vpop.f32.mrb[12].mxu1 }
 0x1e6   : > { %v736_v14 = vadd.f32 %v1029_v13, %v1251_v44  ;;  %v727_v15 = vpop.f32.mrb[13].mxu1 }
 0x1e7   : > { %v728_v16 = vadd.f32 %v1251_v44, %v727_v15  ;;  %v1030_v17 = vpop.f32.mrb[14].mxu1 }
 0x1e8   : > { %808 = vst [vmem:[%s1258_s28 + $0x90] sm:$0xff] %v736_v14  ;;  %v739_v18 = vadd.f32 %v1030_v17, %v1251_v44  ;;  %v730_v19 = vpop.f32.mrb[15].mxu1 }
 0x1e9   : > { %806 = vst [vmem:[%s1258_s28 + $0x80] sm:$0xff] %v728_v16  ;;  %v731_v20 = vadd.f32 %v1251_v44, %v730_v19 }
 0x1ea   : > { %809 = vst [vmem:[%s1258_s28 + $0x98] sm:$0xff] %v739_v18 }
 0x1eb   : > { %807 = vst [vmem:[%s1258_s28 + $0x88] sm:$0xff] %v731_v20 }
 0x1ed   : > { %v1033_v21 = vpop.f32.mrb[16].mxu1 }
 0x1ee   : > { %v752_v22 = vadd.f32 %v1033_v21, %v1251_v44  ;;  %v743_v23 = vpop.f32.mrb[17].mxu1 }
 0x1ef   : > { %v744_v24 = vadd.f32 %v1251_v44, %v743_v23  ;;  %v1034_v25 = vpop.f32.mrb[18].mxu1 }
 0x1f0   : > { %812 = vst [vmem:[%s1258_s28 + $0xb0] sm:$0xff] %v752_v22  ;;  %v755_v26 = vadd.f32 %v1034_v25, %v1251_v44  ;;  %v746_v27 = vpop.f32.mrb[19].mxu1 }
 0x1f1   : > { %810 = vst [vmem:[%s1258_s28 + $0xa0] sm:$0xff] %v744_v24  ;;  %v747_v28 = vadd.f32 %v1251_v44, %v746_v27 }
 0x1f2   : > { %813 = vst [vmem:[%s1258_s28 + $0xb8] sm:$0xff] %v755_v26 }
 0x1f3   : > { %811 = vst [vmem:[%s1258_s28 + $0xa8] sm:$0xff] %v747_v28 }
 0x1f5   : > { %v1037_v29 = vpop.f32.mrb[20].mxu1 }
 0x1f6   : > { %v768_v30 = vadd.f32 %v1037_v29, %v1251_v44  ;;  %v759_v31 = vpop.f32.mrb[21].mxu1 }
 0x1f7   : > { %v760_v32 = vadd.f32 %v1251_v44, %v759_v31  ;;  %v1038_v33 = vpop.f32.mrb[22].mxu1 }
 0x1f8   : > { %816 = vst [vmem:[%s1258_s28 + $0xd0] sm:$0xff] %v768_v30  ;;  %v771_v34 = vadd.f32 %v1038_v33, %v1251_v44  ;;  %v762_v35 = vpop.f32.mrb[23].mxu1 }
 0x1f9   : > { %814 = vst [vmem:[%s1258_s28 + $0xc0] sm:$0xff] %v760_v32  ;;  %v763_v36 = vadd.f32 %v1251_v44, %v762_v35 }
 0x1fa   : > { %817 = vst [vmem:[%s1258_s28 + $0xd8] sm:$0xff] %v771_v34 }
 0x1fb   : > { %815 = vst [vmem:[%s1258_s28 + $0xc8] sm:$0xff] %v763_v36 }
 0x1fd   : > { %v1041_v37 = vpop.f32.mrb[24].mxu1 }
 0x1fe   : > { %v784_v38 = vadd.f32 %v1041_v37, %v1251_v44  ;;  %v775_v39 = vpop.f32.mrb[25].mxu1 }
 0x1ff   : > { %v776_v40 = vadd.f32 %v1251_v44, %v775_v39  ;;  %v1042_v41 = vpop.f32.mrb[26].mxu1 }
 0x200   : > { %820 = vst [vmem:[%s1258_s28 + $0xf0] sm:$0xff] %v784_v38  ;;  %v787_v42 = vadd.f32 %v1042_v41, %v1251_v44  ;;  %v778_v43 = vpop.f32.mrb[27].mxu1 }
 0x201   : > { %818 = vst [vmem:[%s1258_s28 + $0xe0] sm:$0xff] %v776_v40  ;;  %v779_v58 = vadd.f32 %v1251_v44, %v778_v43 }
 0x202   : > { %821 = vst [vmem:[%s1258_s28 + $0xf8] sm:$0xff] %v787_v42 }
 0x203   : > { %819 = vst [vmem:[%s1258_s28 + $0xe8] sm:$0xff] %v779_v58 }
 0x204 PF: > { %s15_s18 = sadd.s32 1, %s1083_s18  }
 0x205   : > { %p12_p4 = scmp.ge.s32.totalorder %s15_s18, 4  }
 0x207   :  { %14 = sbr.rel (!%p12_p4) target bundleno = 1 (0x1), region = 70 }

</bundles_post_ra>
